<compile_context>
chip_gen: v7x
topology: tpu7x:2x2x1
jax: 0.10.0
libtpu: 0.0.40
codegen_flags: <defaults>
</compile_context>

<pallas_src>
import math

import jax
import jax.numpy as jnp
from jax import lax
from jax.experimental import pallas as pl
from jax.experimental.pallas import tpu as pltpu

# ----------------------- model config (matches the PyTorch module) -----------
DIM = 16           # token feature dim
DEPTH = 2
HEADS = 2
DIM_HEAD = 8
MLP_DIM = 32
LOCAL_WINDOW = 8   # local_window_size
TILE_SIZE = 8
TILE_WINDOW = 32   # tile_window_size (>= SEQ -> band check vacuous)
BATCH = 2
SEQ = 16

INNER = HEADS * DIM_HEAD            # 16
BN = BATCH * SEQ                    # 32: batch folded into the row axis
NUM_TILES_GLOBAL = BN // TILE_SIZE  # 4 (2 tiles per batch block; SEQ % TILE_SIZE == 0)
NEG_VALUE = float(-jnp.finfo(jnp.float32).max)      # -torch.finfo(float32).max
ATTN_SCALE = float(DIM_HEAD ** -0.5)                # temperature.exp() at init


# ----------------------------- in-kernel helpers ------------------------------
def _erf(x):
    # Abramowitz & Stegun 7.1.26 rational approximation, |err| <= 1.5e-7.
    # (lax.erf lowering is not guaranteed in Mosaic; this costs ~a dozen VPU
    #  ops on a single (32,32) tile per layer, negligible here.)
    a1, a2, a3, a4, a5 = 0.254829592, -0.284496736, 1.421413741, -1.453152027, 1.061405429
    p = 0.3275911
    s = jnp.where(x < 0.0, -1.0, 1.0)
    ax = jnp.abs(x)
    t = 1.0 / (1.0 + p * ax)
    poly = ((((a5 * t + a4) * t + a3) * t + a2) * t + a1) * t
    return s * (1.0 - poly * jnp.exp(-ax * ax))


def _gelu_exact(x):
    # torch nn.GELU() default: 0.5 * x * (1 + erf(x / sqrt(2)))
    return 0.5 * x * (1.0 + _erf(x * (1.0 / math.sqrt(2.0))))


def _dot_t(a, w):
    # a @ w.T without materializing the transpose (MXU-native (out, in) weight).
    return lax.dot_general(a, w, (((1,), (1,)), ((), ())),
                           preferred_element_type=jnp.float32)


def _lsa_block(x2d, wqkv, wout_heads, bout, fill_mask, want_scores):
    """One LSA call on the (B*N, D) slab.

    wqkv:       (3*INNER, D) fused qkv weight, Q rows pre-scaled by temperature.exp()
    wout_heads: (HEADS, D, DIM_HEAD) per-head slices of the to_out weight
    fill_mask:  (B*N, B*N) bool, True where the reference masked_fill writes -max
                (includes all cross-batch positions, which makes the folded batch exact).
    """
    qkv = _dot_t(x2d, wqkv)                                  # (BN, 3*INNER), bias=False
    y = jnp.zeros((BN, DIM), jnp.float32)
    ts = jnp.zeros((1, BN), jnp.float32) if want_scores else None

    for h in range(HEADS):
        q = qkv[:, h * DIM_HEAD:(h + 1) * DIM_HEAD]                       # (BN, Dh)
        k = qkv[:, INNER + h * DIM_HEAD:INNER + (h + 1) * DIM_HEAD]
        v = qkv[:, 2 * INNER + h * DIM_HEAD:2 * INNER + (h + 1) * DIM_HEAD]

        dots = _dot_t(q, k)                                  # (BN, BN); scale folded into q
        dots = jnp.where(fill_mask, NEG_VALUE, dots)         # masked_fill(mask, -max)
        m = jnp.max(dots, axis=-1, keepdims=True)
        e = jnp.exp(dots - m)                                # cross-batch / filled -> exactly 0
        denom = jnp.sum(e, axis=-1, keepdims=True)
        attn = e * pl.reciprocal(denom, approx=True)         # softmax(dim=-1), EUP recip

        if want_scores:
            # token_scores = attn.sum(dim=-2).sum(dim=-2): queries then heads.
            # Cross-batch weights are exactly 0, so the global column sum equals
            # the per-batch sum.
            ts = ts + jnp.sum(attn, axis=0, keepdims=True)   # (1, BN)

        out_h = jnp.dot(attn, v, preferred_element_type=jnp.float32)     # (BN, Dh)
        y = y + _dot_t(out_h, wout_heads[h])                 # per-head out-proj accumulation

    return x2d + y + bout, ts                                # to_out bias + residual


def _topk_fill_mask(ts, colj, colj_f, topk_static, topk_tril):
    """create_topk_attention_mask(...) fill positions, batch-folded.

    Data-dependent part only: per 8-wide tile of the global (1, BN) token-score
    row, mark the lowest-index argmax column.  Static parts (cross-batch, eye,
    tril) are precomputed host-side; the band check is vacuous and dropped.
    """
    sel = None
    for t in range(NUM_TILES_GLOBAL):
        in_tile = (colj >= t * TILE_SIZE) & (colj < (t + 1) * TILE_SIZE)
        tile_vals = jnp.where(in_tile, ts, NEG_VALUE)
        tmax = jnp.max(tile_vals, axis=1, keepdims=True)                 # (1, 1)
        is_max = in_tile & (ts >= tmax)
        # topk(1) == first (lowest) index achieving the per-tile max
        idx = jnp.min(jnp.where(is_max, colj_f, float(BN)), axis=1, keepdims=True)
        sel_t = colj_f == idx
        sel = sel_t if sel is None else (sel | sel_t)
    return topk_static | (topk_tril & jnp.broadcast_to(sel, (BN, BN)))


# --------------------------- the single fused kernel ---------------------------
def _transformer_kernel(x_ref, masks_ref, wqkv_ref, wouth_ref, bout_ref,
                        w1_ref, b1_ref, w2_ref, b2_ref, o_ref):
    x2d = x_ref[...]                                   # (BN, D)
    local_fill = masks_ref[0] > 0.5                    # (BN, BN) static fill masks
    topk_static = masks_ref[1] > 0.5
    topk_tril = masks_ref[2] > 0.5
    colj = lax.broadcasted_iota(jnp.int32, (1, BN), 1)  # hoisted out of the layer loop
    colj_f = colj.astype(jnp.float32)

    for l in range(DEPTH):
        # --- LSA call 1: local-window mask, generate token scores -------------
        x2d, ts = _lsa_block(x2d, wqkv_ref[2 * l], wouth_ref[2 * l], bout_ref[l],
                             local_fill, want_scores=True)

        # --- data-dependent top-k fill mask (once per layer) -------------------
        topk_fill = _topk_fill_mask(ts, colj, colj_f, topk_static, topk_tril)

        # --- LSA call 2: top-k mask, second power-iteration weights -----------
        x2d, _ = _lsa_block(x2d, wqkv_ref[2 * l + 1], wouth_ref[2 * l + 1], bout_ref[l],
                            topk_fill, want_scores=False)

        # --- FeedForward (dropout p=0 -> identity), GELU fused ----------------
        h = _gelu_exact(_dot_t(x2d, w1_ref[l]) + b1_ref[l])
        x2d = x2d + _dot_t(h, w2_ref[l]) + b2_ref[l]

    o_ref[...] = x2d


# ------------------------------- plain-JAX glue --------------------------------
def _build_fill_masks():
    """Static fill masks for the batch-folded (BN, BN) attention matrices.

    Polarity follows the reference literally: masked_fill fills the True
    positions (in-window causal / selected-column / diagonal) with -finfo.max.
    Cross-batch positions are always filled, which makes the batch fold exact.
    """
    r = jnp.arange(BN)[:, None]
    c = jnp.arange(BN)[None, :]
    same = (r // SEQ) == (c // SEQ)
    causal = c <= r
    in_window = same & causal & (c >= r - (LOCAL_WINDOW - 1))
    local_fill = in_window | ~same                     # create_local_attention_mask fill
    topk_static = (~same) | (r == c)                   # cross-batch OR eye (eye ⊂ tril)
    topk_tril = same & causal                          # where selected columns apply
    # TILE_WINDOW (32) >= SEQ (16) -> the reference triu band check is always true.
    return jnp.stack([local_fill, topk_static, topk_tril]).astype(jnp.float32)


def _sn_power_iteration(W, u):
    # SpectralNormedWeight.get_sigma: one power-iteration step (normalize eps=1e-12)
    v = W @ u
    v = v / jnp.maximum(jnp.linalg.norm(v), 1e-12)
    u_new = W.T @ v
    u_new = u_new / jnp.maximum(jnp.linalg.norm(u_new), 1e-12)
    sigma = v @ (W @ u_new)
    return sigma, u_new


def _sn_weights_for_two_calls(p):
    """Effective SNLinear weight for the 1st and 2nd call inside one layer.

    PyTorch (training mode) updates the u buffer in call 1, so call 2 sees one
    extra power-iteration step; the u state is threaded functionally here.
    """
    W, u0, sigma_param = p["W"], p["u"], p["sigma"]
    s1, u1 = _sn_power_iteration(W, u0)
    s2, _ = _sn_power_iteration(W, u1)
    return (W / s1) * sigma_param, (W / s2) * sigma_param


def _pack_params(layers):
    wqkv, wouth, bout, w1, b1, w2, b2 = [], [], [], [], [], [], []
    # Fold temperature.exp() (= dim_head**-0.5 at init) into the Q rows of the
    # fused qkv weight at pack time.
    qscale = jnp.concatenate([jnp.full((INNER, 1), ATTN_SCALE, jnp.float32),
                              jnp.ones((2 * INNER, 1), jnp.float32)], axis=0)
    for layer in layers:
        ap, fp = layer["attn"], layer["ff"]
        Wqkv1, Wqkv2 = _sn_weights_for_two_calls(ap["qkv"])   # (3*INNER, D)
        Wout1, Wout2 = _sn_weights_for_two_calls(ap["out"])   # (D, INNER)
        for Wq, Wo in ((Wqkv1, Wout1), (Wqkv2, Wout2)):
            wqkv.append(Wq * qscale)                          # fused qkv weight, q pre-scaled
            wouth.append(jnp.stack([Wo[:, h * DIM_HEAD:(h + 1) * DIM_HEAD]
                                    for h in range(HEADS)]))  # (HEADS, D, Dh)
        bout.append(ap["out"]["b"].reshape(1, DIM))
        w1.append(fp["lin1"]["W"])
        b1.append(fp["lin1"]["b"].reshape(1, MLP_DIM))
        w2.append(fp["lin2"]["W"])
        b2.append(fp["lin2"]["b"].reshape(1, DIM))
    return (jnp.stack(wqkv), jnp.stack(wouth), jnp.stack(bout),
            jnp.stack(w1), jnp.stack(b1), jnp.stack(w2), jnp.stack(b2))


def _full_spec(shape):
    nd = len(shape)
    return pl.BlockSpec(tuple(shape), lambda i, _nd=nd: (0,) * _nd)


def _cost_estimate(inputs, out_bytes):
    per_lsa = (2 * BN * DIM * 3 * INNER                               # fused qkv projection
               + HEADS * (2 * (2 * BN * BN * DIM_HEAD)                # qk^T and attn@v
                          + 2 * BN * DIM_HEAD * DIM))                 # per-head out projection
    per_ff = 2 * BN * DIM * MLP_DIM + 2 * BN * MLP_DIM * DIM
    flops = DEPTH * (2 * per_lsa + per_ff)
    transcendentals = DEPTH * (2 * HEADS * BN * BN + 2 * HEADS * BN + BN * MLP_DIM)
    bytes_accessed = int(sum(int(a.size) * 4 for a in inputs)) + int(out_bytes)
    return pl.CostEstimate(flops=int(flops), transcendentals=int(transcendentals),
                           bytes_accessed=bytes_accessed)


def transformer_forward(x, layers):
    B, N, D = x.shape
    assert (B, N, D) == (BATCH, SEQ, DIM) and SEQ % TILE_SIZE == 0
    params = _pack_params(layers)
    masks = _build_fill_masks()
    x2d = x.reshape(B * N, D).astype(jnp.float32)

    inputs = (x2d, masks) + params
    out2d = pl.pallas_call(
        _transformer_kernel,
        out_shape=jax.ShapeDtypeStruct((B * N, D), jnp.float32),
        grid=(1,),
        in_specs=[_full_spec(tuple(a.shape)) for a in inputs],
        out_specs=_full_spec((B * N, D)),
        cost_estimate=_cost_estimate(inputs, out_bytes=B * N * D * 4),
        compiler_params=pltpu.CompilerParams(
            dimension_semantics=("arbitrary",)),   # tiny workload: keep on one TC
    )(*inputs)
    return out2d.reshape(B, N, D)


# ------------------------------- initialization --------------------------------
def _init_sn_linear(key, in_f, out_f, bias):
    kw, kb = jax.random.split(key)
    W = 0.02 * jax.random.normal(kw, (out_f, in_f), jnp.float32)   # trunc_normal(std=.02)
    _, s, vh = jnp.linalg.svd(W, full_matrices=False)              # init-time SVD (glue)
    if bias:
        bound = 1.0 / math.sqrt(in_f)
        b = jax.random.uniform(kb, (out_f,), jnp.float32, -bound, bound)
    else:
        b = jnp.zeros((out_f,), jnp.float32)
    return {"W": W, "u": vh[0], "sigma": s[0], "b": b}


def _init_linear(key, in_f, out_f):
    kw, kb = jax.random.split(key)
    bound = 1.0 / math.sqrt(in_f)
    return {"W": jax.random.uniform(kw, (out_f, in_f), jnp.float32, -bound, bound),
            "b": jax.random.uniform(kb, (out_f,), jnp.float32, -bound, bound)}


def init_transformer(key):
    layers = []
    for _ in range(DEPTH):
        k1, k2, k3, k4, key = jax.random.split(key, 5)
        layers.append({
            "attn": {"qkv": _init_sn_linear(k1, DIM, 3 * INNER, bias=False),
                     "out": _init_sn_linear(k2, INNER, DIM, bias=True)},
            "ff": {"lin1": _init_linear(k3, DIM, MLP_DIM),
                   "lin2": _init_linear(k4, MLP_DIM, DIM)},
        })
    return layers


# ------------------------------------ main -------------------------------------
if __name__ == "__main__":
    key = jax.random.PRNGKey(0)
    kp, kx = jax.random.split(key)
    layers = init_transformer(kp)
    x = jax.random.normal(kx, (BATCH, SEQ, DIM), jnp.float32)

    fwd = jax.jit(transformer_forward)
    out = jax.block_until_ready(fwd(x, layers))

    assert out.shape == (BATCH, SEQ, DIM)
    assert out.dtype == jnp.float32
    assert bool(jnp.all(jnp.isfinite(out)))
    print("KERNEL_OK")
</pallas_src>

<mosaic_0001>
module attributes {stable_mosaic.version = 11 : i64} {
  func.func @_transformer_kernel(%arg0: i32, %arg1: memref<32x16xf32, #tpu.memory_space<vmem>>, %arg2: memref<3x32x32xf32, #tpu.memory_space<vmem>>, %arg3: memref<4x48x16xf32, #tpu.memory_space<vmem>>, %arg4: memref<4x2x16x8xf32, #tpu.memory_space<vmem>>, %arg5: memref<2x1x16xf32, #tpu.memory_space<vmem>>, %arg6: memref<2x32x16xf32, #tpu.memory_space<vmem>>, %arg7: memref<2x1x32xf32, #tpu.memory_space<vmem>>, %arg8: memref<2x16x32xf32, #tpu.memory_space<vmem>>, %arg9: memref<2x1x16xf32, #tpu.memory_space<vmem>>, %arg10: memref<32x16xf32, #tpu.memory_space<vmem>>) attributes {dimension_semantics = [#tpu.dimension_semantics<arbitrary>], iteration_bounds = array<i64: 1>, scalar_prefetch = 0 : i64, scratch_operands = 0 : i64, tpu.core_type = #tpu.core_type<tc>, window_params = [{pipeline_mode = #tpu.pipeline_mode<synchronous>, transform_indices = @transform_0, window_bounds = array<i64: 32, 16>}, {pipeline_mode = #tpu.pipeline_mode<synchronous>, transform_indices = @transform_1, window_bounds = array<i64: 3, 32, 32>}, {pipeline_mode = #tpu.pipeline_mode<synchronous>, transform_indices = @transform_2, window_bounds = array<i64: 4, 48, 16>}, {pipeline_mode = #tpu.pipeline_mode<synchronous>, transform_indices = @transform_3, window_bounds = array<i64: 4, 2, 16, 8>}, {pipeline_mode = #tpu.pipeline_mode<synchronous>, transform_indices = @transform_4, window_bounds = array<i64: 2, 1, 16>}, {pipeline_mode = #tpu.pipeline_mode<synchronous>, transform_indices = @transform_5, window_bounds = array<i64: 2, 32, 16>}, {pipeline_mode = #tpu.pipeline_mode<synchronous>, transform_indices = @transform_6, window_bounds = array<i64: 2, 1, 32>}, {pipeline_mode = #tpu.pipeline_mode<synchronous>, transform_indices = @transform_7, window_bounds = array<i64: 2, 16, 32>}, {pipeline_mode = #tpu.pipeline_mode<synchronous>, transform_indices = @transform_8, window_bounds = array<i64: 2, 1, 16>}, {pipeline_mode = #tpu.pipeline_mode<synchronous>, transform_indices = @transform_9, window_bounds = array<i64: 32, 16>}]} {
    %c0 = arith.constant 0 : index
    %c0_0 = arith.constant 0 : index
    %0 = vector.load %arg1[%c0, %c0_0] : memref<32x16xf32, #tpu.memory_space<vmem>>, vector<32x16xf32>
    %c0_1 = arith.constant 0 : index
    %c0_2 = arith.constant 0 : index
    %c0_3 = arith.constant 0 : index
    %1 = vector.load %arg2[%c0_1, %c0_2, %c0_3] : memref<3x32x32xf32, #tpu.memory_space<vmem>>, vector<1x32x32xf32>
    %2 = vector.shape_cast %1 : vector<1x32x32xf32> to vector<32x32xf32>
    %cst = arith.constant 5.000000e-01 : f32
    %3 = vector.broadcast %cst : f32 to vector<32x32xf32>
    %4 = arith.cmpf ogt, %2, %3 : vector<32x32xf32>
    %c1 = arith.constant 1 : index
    %c0_4 = arith.constant 0 : index
    %c0_5 = arith.constant 0 : index
    %5 = vector.load %arg2[%c1, %c0_4, %c0_5] : memref<3x32x32xf32, #tpu.memory_space<vmem>>, vector<1x32x32xf32>
    %6 = vector.shape_cast %5 : vector<1x32x32xf32> to vector<32x32xf32>
    %cst_6 = arith.constant 5.000000e-01 : f32
    %7 = vector.broadcast %cst_6 : f32 to vector<32x32xf32>
    %8 = arith.cmpf ogt, %6, %7 : vector<32x32xf32>
    %c2 = arith.constant 2 : index
    %c0_7 = arith.constant 0 : index
    %c0_8 = arith.constant 0 : index
    %9 = vector.load %arg2[%c2, %c0_7, %c0_8] : memref<3x32x32xf32, #tpu.memory_space<vmem>>, vector<1x32x32xf32>
    %10 = vector.shape_cast %9 : vector<1x32x32xf32> to vector<32x32xf32>
    %cst_9 = arith.constant 5.000000e-01 : f32
    %11 = vector.broadcast %cst_9 : f32 to vector<32x32xf32>
    %12 = arith.cmpf ogt, %10, %11 : vector<32x32xf32>
    %13 = tpu.iota {dimensions = array<i32: 1>} : vector<1x32xi32>
    %14 = arith.sitofp %13 : vector<1x32xi32> to vector<1x32xf32>
    %c0_10 = arith.constant 0 : index
    %c0_11 = arith.constant 0 : index
    %c0_12 = arith.constant 0 : index
    %15 = vector.load %arg3[%c0_10, %c0_11, %c0_12] : memref<4x48x16xf32, #tpu.memory_space<vmem>>, vector<1x48x16xf32>
    %16 = vector.shape_cast %15 : vector<1x48x16xf32> to vector<48x16xf32>
    %c0_13 = arith.constant 0 : index
    %c0_14 = arith.constant 0 : index
    %c0_15 = arith.constant 0 : index
    %c0_16 = arith.constant 0 : index
    %17 = vector.load %arg4[%c0_13, %c0_14, %c0_15, %c0_16] : memref<4x2x16x8xf32, #tpu.memory_space<vmem>>, vector<1x2x16x8xf32>
    %18 = vector.shape_cast %17 : vector<1x2x16x8xf32> to vector<2x16x8xf32>
    %c0_17 = arith.constant 0 : index
    %c0_18 = arith.constant 0 : index
    %c0_19 = arith.constant 0 : index
    %19 = vector.load %arg5[%c0_17, %c0_18, %c0_19] : memref<2x1x16xf32, #tpu.memory_space<vmem>>, vector<1x1x16xf32>
    %20 = vector.shape_cast %19 : vector<1x1x16xf32> to vector<1x16xf32>
    %cst_20 = arith.constant dense<0.000000e+00> : vector<32x48xf32>
    %21 = tpu.matmul %0, %16, %cst_20 {dimension_numbers = #tpu.dot_dimension_numbers<[1], [1], [0], [0], [0, 0, 1, 0], [], []>} : vector<32x16xf32>, vector<48x16xf32>, vector<32x48xf32> -> vector<32x48xf32>
    %cst_21 = arith.constant 0.000000e+00 : f32
    %22 = vector.broadcast %cst_21 : f32 to vector<32x16xf32>
    %cst_22 = arith.constant 0.000000e+00 : f32
    %23 = vector.broadcast %cst_22 : f32 to vector<1x32xf32>
    %24 = vector.extract_strided_slice %21 {offsets = [0, 0], sizes = [32, 8], strides = [1, 1]} : vector<32x48xf32> to vector<32x8xf32>
    %25 = vector.extract_strided_slice %21 {offsets = [0, 16], sizes = [32, 8], strides = [1, 1]} : vector<32x48xf32> to vector<32x8xf32>
    %26 = vector.extract_strided_slice %21 {offsets = [0, 32], sizes = [32, 8], strides = [1, 1]} : vector<32x48xf32> to vector<32x8xf32>
    %cst_23 = arith.constant dense<0.000000e+00> : vector<32x32xf32>
    %27 = tpu.matmul %24, %25, %cst_23 {dimension_numbers = #tpu.dot_dimension_numbers<[1], [1], [0], [0], [0, 0, 1, 0], [], []>} : vector<32x8xf32>, vector<32x8xf32>, vector<32x32xf32> -> vector<32x32xf32>
    %cst_24 = arith.constant -3.40282347E+38 : f32
    %28 = vector.broadcast %cst_24 : f32 to vector<32x32xf32>
    %29 = arith.select %4, %28, %27 : vector<32x32xi1>, vector<32x32xf32>
    %cst_25 = arith.constant dense<0xFF800000> : vector<32xf32>
    %30 = vector.multi_reduction <maximumf>, %29, %cst_25 [1] : vector<32x32xf32> to vector<32xf32>
    %31 = vector.shape_cast %30 : vector<32xf32> to vector<32x1xf32>
    %32 = vector.broadcast %31 : vector<32x1xf32> to vector<32x32xf32>
    %33 = arith.subf %29, %32 : vector<32x32xf32>
    %34 = math.exp %33 : vector<32x32xf32>
    %cst_26 = arith.constant dense<0.000000e+00> : vector<32xf32>
    %35 = vector.multi_reduction <add>, %34, %cst_26 [1] : vector<32x32xf32> to vector<32xf32>
    %36 = vector.shape_cast %35 : vector<32xf32> to vector<32x1xf32>
    %37 = tpu.reciprocal %36 {approx = true} : vector<32x1xf32> -> vector<32x1xf32>
    %38 = vector.broadcast %37 : vector<32x1xf32> to vector<32x32xf32>
    %39 = arith.mulf %34, %38 : vector<32x32xf32>
    %cst_27 = arith.constant dense<0.000000e+00> : vector<32xf32>
    %40 = vector.multi_reduction <add>, %39, %cst_27 [0] : vector<32x32xf32> to vector<32xf32>
    %41 = vector.shape_cast %40 : vector<32xf32> to vector<1x32xf32>
    %42 = arith.addf %23, %41 : vector<1x32xf32>
    %cst_28 = arith.constant dense<0.000000e+00> : vector<32x8xf32>
    %43 = tpu.matmul %39, %26, %cst_28 {dimension_numbers = #tpu.dot_dimension_numbers<[1], [0], [0], [1], [0, 0, 1, 1], [], []>} : vector<32x32xf32>, vector<32x8xf32>, vector<32x8xf32> -> vector<32x8xf32>
    %44 = vector.extract_strided_slice %18 {offsets = [0, 0, 0], sizes = [1, 16, 8], strides = [1, 1, 1]} : vector<2x16x8xf32> to vector<1x16x8xf32>
    %45 = vector.shape_cast %44 : vector<1x16x8xf32> to vector<16x8xf32>
    %cst_29 = arith.constant dense<0.000000e+00> : vector<32x16xf32>
    %46 = tpu.matmul %43, %45, %cst_29 {dimension_numbers = #tpu.dot_dimension_numbers<[1], [1], [0], [0], [0, 0, 1, 0], [], []>} : vector<32x8xf32>, vector<16x8xf32>, vector<32x16xf32> -> vector<32x16xf32>
    %47 = arith.addf %22, %46 : vector<32x16xf32>
    %48 = vector.extract_strided_slice %21 {offsets = [0, 8], sizes = [32, 8], strides = [1, 1]} : vector<32x48xf32> to vector<32x8xf32>
    %49 = vector.extract_strided_slice %21 {offsets = [0, 24], sizes = [32, 8], strides = [1, 1]} : vector<32x48xf32> to vector<32x8xf32>
    %50 = vector.extract_strided_slice %21 {offsets = [0, 40], sizes = [32, 8], strides = [1, 1]} : vector<32x48xf32> to vector<32x8xf32>
    %cst_30 = arith.constant dense<0.000000e+00> : vector<32x32xf32>
    %51 = tpu.matmul %48, %49, %cst_30 {dimension_numbers = #tpu.dot_dimension_numbers<[1], [1], [0], [0], [0, 0, 1, 0], [], []>} : vector<32x8xf32>, vector<32x8xf32>, vector<32x32xf32> -> vector<32x32xf32>
    %cst_31 = arith.constant -3.40282347E+38 : f32
    %52 = vector.broadcast %cst_31 : f32 to vector<32x32xf32>
    %53 = arith.select %4, %52, %51 : vector<32x32xi1>, vector<32x32xf32>
    %cst_32 = arith.constant dense<0xFF800000> : vector<32xf32>
    %54 = vector.multi_reduction <maximumf>, %53, %cst_32 [1] : vector<32x32xf32> to vector<32xf32>
    %55 = vector.shape_cast %54 : vector<32xf32> to vector<32x1xf32>
    %56 = vector.broadcast %55 : vector<32x1xf32> to vector<32x32xf32>
    %57 = arith.subf %53, %56 : vector<32x32xf32>
    %58 = math.exp %57 : vector<32x32xf32>
    %cst_33 = arith.constant dense<0.000000e+00> : vector<32xf32>
    %59 = vector.multi_reduction <add>, %58, %cst_33 [1] : vector<32x32xf32> to vector<32xf32>
    %60 = vector.shape_cast %59 : vector<32xf32> to vector<32x1xf32>
    %61 = tpu.reciprocal %60 {approx = true} : vector<32x1xf32> -> vector<32x1xf32>
    %62 = vector.broadcast %61 : vector<32x1xf32> to vector<32x32xf32>
    %63 = arith.mulf %58, %62 : vector<32x32xf32>
    %cst_34 = arith.constant dense<0.000000e+00> : vector<32xf32>
    %64 = vector.multi_reduction <add>, %63, %cst_34 [0] : vector<32x32xf32> to vector<32xf32>
    %65 = vector.shape_cast %64 : vector<32xf32> to vector<1x32xf32>
    %66 = arith.addf %42, %65 : vector<1x32xf32>
    %cst_35 = arith.constant dense<0.000000e+00> : vector<32x8xf32>
    %67 = tpu.matmul %63, %50, %cst_35 {dimension_numbers = #tpu.dot_dimension_numbers<[1], [0], [0], [1], [0, 0, 1, 1], [], []>} : vector<32x32xf32>, vector<32x8xf32>, vector<32x8xf32> -> vector<32x8xf32>
    %68 = vector.extract_strided_slice %18 {offsets = [1, 0, 0], sizes = [1, 16, 8], strides = [1, 1, 1]} : vector<2x16x8xf32> to vector<1x16x8xf32>
    %69 = vector.shape_cast %68 : vector<1x16x8xf32> to vector<16x8xf32>
    %cst_36 = arith.constant dense<0.000000e+00> : vector<32x16xf32>
    %70 = tpu.matmul %67, %69, %cst_36 {dimension_numbers = #tpu.dot_dimension_numbers<[1], [1], [0], [0], [0, 0, 1, 0], [], []>} : vector<32x8xf32>, vector<16x8xf32>, vector<32x16xf32> -> vector<32x16xf32>
    %71 = arith.addf %47, %70 : vector<32x16xf32>
    %72 = arith.addf %0, %71 : vector<32x16xf32>
    %73 = vector.broadcast %20 : vector<1x16xf32> to vector<32x16xf32>
    %74 = arith.addf %72, %73 : vector<32x16xf32>
    %c0_i32 = arith.constant 0 : i32
    %75 = vector.broadcast %c0_i32 : i32 to vector<1x32xi32>
    %76 = arith.cmpi sge, %13, %75 : vector<1x32xi32>
    %c8_i32 = arith.constant 8 : i32
    %77 = vector.broadcast %c8_i32 : i32 to vector<1x32xi32>
    %78 = arith.cmpi slt, %13, %77 : vector<1x32xi32>
    %79 = arith.andi %76, %78 : vector<1x32xi1>
    %cst_37 = arith.constant -3.40282347E+38 : f32
    %80 = vector.broadcast %cst_37 : f32 to vector<1x32xf32>
    %81 = arith.select %79, %66, %80 : vector<1x32xi1>, vector<1x32xf32>
    %cst_38 = arith.constant dense<0xFF800000> : vector<1xf32>
    %82 = vector.multi_reduction <maximumf>, %81, %cst_38 [1] : vector<1x32xf32> to vector<1xf32>
    %83 = vector.shape_cast %82 : vector<1xf32> to vector<1x1xf32>
    %84 = vector.broadcast %83 : vector<1x1xf32> to vector<1x32xf32>
    %85 = arith.cmpf oge, %66, %84 : vector<1x32xf32>
    %86 = arith.andi %79, %85 : vector<1x32xi1>
    %cst_39 = arith.constant 3.200000e+01 : f32
    %87 = vector.broadcast %cst_39 : f32 to vector<1x32xf32>
    %88 = arith.select %86, %14, %87 : vector<1x32xi1>, vector<1x32xf32>
    %cst_40 = arith.constant dense<0x7F800000> : vector<1xf32>
    %89 = vector.multi_reduction <minimumf>, %88, %cst_40 [1] : vector<1x32xf32> to vector<1xf32>
    %90 = vector.shape_cast %89 : vector<1xf32> to vector<1x1xf32>
    %91 = vector.broadcast %90 : vector<1x1xf32> to vector<1x32xf32>
    %92 = arith.cmpf oeq, %14, %91 : vector<1x32xf32>
    %c8_i32_41 = arith.constant 8 : i32
    %93 = vector.broadcast %c8_i32_41 : i32 to vector<1x32xi32>
    %94 = arith.cmpi sge, %13, %93 : vector<1x32xi32>
    %c16_i32 = arith.constant 16 : i32
    %95 = vector.broadcast %c16_i32 : i32 to vector<1x32xi32>
    %96 = arith.cmpi slt, %13, %95 : vector<1x32xi32>
    %97 = arith.andi %94, %96 : vector<1x32xi1>
    %cst_42 = arith.constant -3.40282347E+38 : f32
    %98 = vector.broadcast %cst_42 : f32 to vector<1x32xf32>
    %99 = arith.select %97, %66, %98 : vector<1x32xi1>, vector<1x32xf32>
    %cst_43 = arith.constant dense<0xFF800000> : vector<1xf32>
    %100 = vector.multi_reduction <maximumf>, %99, %cst_43 [1] : vector<1x32xf32> to vector<1xf32>
    %101 = vector.shape_cast %100 : vector<1xf32> to vector<1x1xf32>
    %102 = vector.broadcast %101 : vector<1x1xf32> to vector<1x32xf32>
    %103 = arith.cmpf oge, %66, %102 : vector<1x32xf32>
    %104 = arith.andi %97, %103 : vector<1x32xi1>
    %cst_44 = arith.constant 3.200000e+01 : f32
    %105 = vector.broadcast %cst_44 : f32 to vector<1x32xf32>
    %106 = arith.select %104, %14, %105 : vector<1x32xi1>, vector<1x32xf32>
    %cst_45 = arith.constant dense<0x7F800000> : vector<1xf32>
    %107 = vector.multi_reduction <minimumf>, %106, %cst_45 [1] : vector<1x32xf32> to vector<1xf32>
    %108 = vector.shape_cast %107 : vector<1xf32> to vector<1x1xf32>
    %109 = vector.broadcast %108 : vector<1x1xf32> to vector<1x32xf32>
    %110 = arith.cmpf oeq, %14, %109 : vector<1x32xf32>
    %111 = arith.ori %92, %110 : vector<1x32xi1>
    %c16_i32_46 = arith.constant 16 : i32
    %112 = vector.broadcast %c16_i32_46 : i32 to vector<1x32xi32>
    %113 = arith.cmpi sge, %13, %112 : vector<1x32xi32>
    %c24_i32 = arith.constant 24 : i32
    %114 = vector.broadcast %c24_i32 : i32 to vector<1x32xi32>
    %115 = arith.cmpi slt, %13, %114 : vector<1x32xi32>
    %116 = arith.andi %113, %115 : vector<1x32xi1>
    %cst_47 = arith.constant -3.40282347E+38 : f32
    %117 = vector.broadcast %cst_47 : f32 to vector<1x32xf32>
    %118 = arith.select %116, %66, %117 : vector<1x32xi1>, vector<1x32xf32>
    %cst_48 = arith.constant dense<0xFF800000> : vector<1xf32>
    %119 = vector.multi_reduction <maximumf>, %118, %cst_48 [1] : vector<1x32xf32> to vector<1xf32>
    %120 = vector.shape_cast %119 : vector<1xf32> to vector<1x1xf32>
    %121 = vector.broadcast %120 : vector<1x1xf32> to vector<1x32xf32>
    %122 = arith.cmpf oge, %66, %121 : vector<1x32xf32>
    %123 = arith.andi %116, %122 : vector<1x32xi1>
    %cst_49 = arith.constant 3.200000e+01 : f32
    %124 = vector.broadcast %cst_49 : f32 to vector<1x32xf32>
    %125 = arith.select %123, %14, %124 : vector<1x32xi1>, vector<1x32xf32>
    %cst_50 = arith.constant dense<0x7F800000> : vector<1xf32>
    %126 = vector.multi_reduction <minimumf>, %125, %cst_50 [1] : vector<1x32xf32> to vector<1xf32>
    %127 = vector.shape_cast %126 : vector<1xf32> to vector<1x1xf32>
    %128 = vector.broadcast %127 : vector<1x1xf32> to vector<1x32xf32>
    %129 = arith.cmpf oeq, %14, %128 : vector<1x32xf32>
    %130 = arith.ori %111, %129 : vector<1x32xi1>
    %c24_i32_51 = arith.constant 24 : i32
    %131 = vector.broadcast %c24_i32_51 : i32 to vector<1x32xi32>
    %132 = arith.cmpi sge, %13, %131 : vector<1x32xi32>
    %c32_i32 = arith.constant 32 : i32
    %133 = vector.broadcast %c32_i32 : i32 to vector<1x32xi32>
    %134 = arith.cmpi slt, %13, %133 : vector<1x32xi32>
    %135 = arith.andi %132, %134 : vector<1x32xi1>
    %cst_52 = arith.constant -3.40282347E+38 : f32
    %136 = vector.broadcast %cst_52 : f32 to vector<1x32xf32>
    %137 = arith.select %135, %66, %136 : vector<1x32xi1>, vector<1x32xf32>
    %cst_53 = arith.constant dense<0xFF800000> : vector<1xf32>
    %138 = vector.multi_reduction <maximumf>, %137, %cst_53 [1] : vector<1x32xf32> to vector<1xf32>
    %139 = vector.shape_cast %138 : vector<1xf32> to vector<1x1xf32>
    %140 = vector.broadcast %139 : vector<1x1xf32> to vector<1x32xf32>
    %141 = arith.cmpf oge, %66, %140 : vector<1x32xf32>
    %142 = arith.andi %135, %141 : vector<1x32xi1>
    %cst_54 = arith.constant 3.200000e+01 : f32
    %143 = vector.broadcast %cst_54 : f32 to vector<1x32xf32>
    %144 = arith.select %142, %14, %143 : vector<1x32xi1>, vector<1x32xf32>
    %cst_55 = arith.constant dense<0x7F800000> : vector<1xf32>
    %145 = vector.multi_reduction <minimumf>, %144, %cst_55 [1] : vector<1x32xf32> to vector<1xf32>
    %146 = vector.shape_cast %145 : vector<1xf32> to vector<1x1xf32>
    %147 = vector.broadcast %146 : vector<1x1xf32> to vector<1x32xf32>
    %148 = arith.cmpf oeq, %14, %147 : vector<1x32xf32>
    %149 = arith.ori %130, %148 : vector<1x32xi1>
    %150 = vector.shape_cast %149 : vector<1x32xi1> to vector<1x32xi1>
    %151 = vector.broadcast %150 : vector<1x32xi1> to vector<32x32xi1>
    %152 = arith.andi %12, %151 : vector<32x32xi1>
    %153 = arith.ori %8, %152 : vector<32x32xi1>
    %c1_56 = arith.constant 1 : index
    %c0_57 = arith.constant 0 : index
    %c0_58 = arith.constant 0 : index
    %154 = vector.load %arg3[%c1_56, %c0_57, %c0_58] : memref<4x48x16xf32, #tpu.memory_space<vmem>>, vector<1x48x16xf32>
    %155 = vector.shape_cast %154 : vector<1x48x16xf32> to vector<48x16xf32>
    %c1_59 = arith.constant 1 : index
    %c0_60 = arith.constant 0 : index
    %c0_61 = arith.constant 0 : index
    %c0_62 = arith.constant 0 : index
    %156 = vector.load %arg4[%c1_59, %c0_60, %c0_61, %c0_62] : memref<4x2x16x8xf32, #tpu.memory_space<vmem>>, vector<1x2x16x8xf32>
    %157 = vector.shape_cast %156 : vector<1x2x16x8xf32> to vector<2x16x8xf32>
    %c0_63 = arith.constant 0 : index
    %c0_64 = arith.constant 0 : index
    %c0_65 = arith.constant 0 : index
    %158 = vector.load %arg5[%c0_63, %c0_64, %c0_65] : memref<2x1x16xf32, #tpu.memory_space<vmem>>, vector<1x1x16xf32>
    %159 = vector.shape_cast %158 : vector<1x1x16xf32> to vector<1x16xf32>
    %cst_66 = arith.constant dense<0.000000e+00> : vector<32x48xf32>
    %160 = tpu.matmul %74, %155, %cst_66 {dimension_numbers = #tpu.dot_dimension_numbers<[1], [1], [0], [0], [0, 0, 1, 0], [], []>} : vector<32x16xf32>, vector<48x16xf32>, vector<32x48xf32> -> vector<32x48xf32>
    %cst_67 = arith.constant 0.000000e+00 : f32
    %161 = vector.broadcast %cst_67 : f32 to vector<32x16xf32>
    %162 = vector.extract_strided_slice %160 {offsets = [0, 0], sizes = [32, 8], strides = [1, 1]} : vector<32x48xf32> to vector<32x8xf32>
    %163 = vector.extract_strided_slice %160 {offsets = [0, 16], sizes = [32, 8], strides = [1, 1]} : vector<32x48xf32> to vector<32x8xf32>
    %164 = vector.extract_strided_slice %160 {offsets = [0, 32], sizes = [32, 8], strides = [1, 1]} : vector<32x48xf32> to vector<32x8xf32>
    %cst_68 = arith.constant dense<0.000000e+00> : vector<32x32xf32>
    %165 = tpu.matmul %162, %163, %cst_68 {dimension_numbers = #tpu.dot_dimension_numbers<[1], [1], [0], [0], [0, 0, 1, 0], [], []>} : vector<32x8xf32>, vector<32x8xf32>, vector<32x32xf32> -> vector<32x32xf32>
    %cst_69 = arith.constant -3.40282347E+38 : f32
    %166 = vector.broadcast %cst_69 : f32 to vector<32x32xf32>
    %167 = arith.select %153, %166, %165 : vector<32x32xi1>, vector<32x32xf32>
    %cst_70 = arith.constant dense<0xFF800000> : vector<32xf32>
    %168 = vector.multi_reduction <maximumf>, %167, %cst_70 [1] : vector<32x32xf32> to vector<32xf32>
    %169 = vector.shape_cast %168 : vector<32xf32> to vector<32x1xf32>
    %170 = vector.broadcast %169 : vector<32x1xf32> to vector<32x32xf32>
    %171 = arith.subf %167, %170 : vector<32x32xf32>
    %172 = math.exp %171 : vector<32x32xf32>
    %cst_71 = arith.constant dense<0.000000e+00> : vector<32xf32>
    %173 = vector.multi_reduction <add>, %172, %cst_71 [1] : vector<32x32xf32> to vector<32xf32>
    %174 = vector.shape_cast %173 : vector<32xf32> to vector<32x1xf32>
    %175 = tpu.reciprocal %174 {approx = true} : vector<32x1xf32> -> vector<32x1xf32>
    %176 = vector.broadcast %175 : vector<32x1xf32> to vector<32x32xf32>
    %177 = arith.mulf %172, %176 : vector<32x32xf32>
    %cst_72 = arith.constant dense<0.000000e+00> : vector<32x8xf32>
    %178 = tpu.matmul %177, %164, %cst_72 {dimension_numbers = #tpu.dot_dimension_numbers<[1], [0], [0], [1], [0, 0, 1, 1], [], []>} : vector<32x32xf32>, vector<32x8xf32>, vector<32x8xf32> -> vector<32x8xf32>
    %179 = vector.extract_strided_slice %157 {offsets = [0, 0, 0], sizes = [1, 16, 8], strides = [1, 1, 1]} : vector<2x16x8xf32> to vector<1x16x8xf32>
    %180 = vector.shape_cast %179 : vector<1x16x8xf32> to vector<16x8xf32>
    %cst_73 = arith.constant dense<0.000000e+00> : vector<32x16xf32>
    %181 = tpu.matmul %178, %180, %cst_73 {dimension_numbers = #tpu.dot_dimension_numbers<[1], [1], [0], [0], [0, 0, 1, 0], [], []>} : vector<32x8xf32>, vector<16x8xf32>, vector<32x16xf32> -> vector<32x16xf32>
    %182 = arith.addf %161, %181 : vector<32x16xf32>
    %183 = vector.extract_strided_slice %160 {offsets = [0, 8], sizes = [32, 8], strides = [1, 1]} : vector<32x48xf32> to vector<32x8xf32>
    %184 = vector.extract_strided_slice %160 {offsets = [0, 24], sizes = [32, 8], strides = [1, 1]} : vector<32x48xf32> to vector<32x8xf32>
    %185 = vector.extract_strided_slice %160 {offsets = [0, 40], sizes = [32, 8], strides = [1, 1]} : vector<32x48xf32> to vector<32x8xf32>
    %cst_74 = arith.constant dense<0.000000e+00> : vector<32x32xf32>
    %186 = tpu.matmul %183, %184, %cst_74 {dimension_numbers = #tpu.dot_dimension_numbers<[1], [1], [0], [0], [0, 0, 1, 0], [], []>} : vector<32x8xf32>, vector<32x8xf32>, vector<32x32xf32> -> vector<32x32xf32>
    %cst_75 = arith.constant -3.40282347E+38 : f32
    %187 = vector.broadcast %cst_75 : f32 to vector<32x32xf32>
    %188 = arith.select %153, %187, %186 : vector<32x32xi1>, vector<32x32xf32>
    %cst_76 = arith.constant dense<0xFF800000> : vector<32xf32>
    %189 = vector.multi_reduction <maximumf>, %188, %cst_76 [1] : vector<32x32xf32> to vector<32xf32>
    %190 = vector.shape_cast %189 : vector<32xf32> to vector<32x1xf32>
    %191 = vector.broadcast %190 : vector<32x1xf32> to vector<32x32xf32>
    %192 = arith.subf %188, %191 : vector<32x32xf32>
    %193 = math.exp %192 : vector<32x32xf32>
    %cst_77 = arith.constant dense<0.000000e+00> : vector<32xf32>
    %194 = vector.multi_reduction <add>, %193, %cst_77 [1] : vector<32x32xf32> to vector<32xf32>
    %195 = vector.shape_cast %194 : vector<32xf32> to vector<32x1xf32>
    %196 = tpu.reciprocal %195 {approx = true} : vector<32x1xf32> -> vector<32x1xf32>
    %197 = vector.broadcast %196 : vector<32x1xf32> to vector<32x32xf32>
    %198 = arith.mulf %193, %197 : vector<32x32xf32>
    %cst_78 = arith.constant dense<0.000000e+00> : vector<32x8xf32>
    %199 = tpu.matmul %198, %185, %cst_78 {dimension_numbers = #tpu.dot_dimension_numbers<[1], [0], [0], [1], [0, 0, 1, 1], [], []>} : vector<32x32xf32>, vector<32x8xf32>, vector<32x8xf32> -> vector<32x8xf32>
    %200 = vector.extract_strided_slice %157 {offsets = [1, 0, 0], sizes = [1, 16, 8], strides = [1, 1, 1]} : vector<2x16x8xf32> to vector<1x16x8xf32>
    %201 = vector.shape_cast %200 : vector<1x16x8xf32> to vector<16x8xf32>
    %cst_79 = arith.constant dense<0.000000e+00> : vector<32x16xf32>
    %202 = tpu.matmul %199, %201, %cst_79 {dimension_numbers = #tpu.dot_dimension_numbers<[1], [1], [0], [0], [0, 0, 1, 0], [], []>} : vector<32x8xf32>, vector<16x8xf32>, vector<32x16xf32> -> vector<32x16xf32>
    %203 = arith.addf %182, %202 : vector<32x16xf32>
    %204 = arith.addf %74, %203 : vector<32x16xf32>
    %205 = vector.broadcast %159 : vector<1x16xf32> to vector<32x16xf32>
    %206 = arith.addf %204, %205 : vector<32x16xf32>
    %c0_80 = arith.constant 0 : index
    %c0_81 = arith.constant 0 : index
    %c0_82 = arith.constant 0 : index
    %207 = vector.load %arg6[%c0_80, %c0_81, %c0_82] : memref<2x32x16xf32, #tpu.memory_space<vmem>>, vector<1x32x16xf32>
    %208 = vector.shape_cast %207 : vector<1x32x16xf32> to vector<32x16xf32>
    %cst_83 = arith.constant dense<0.000000e+00> : vector<32x32xf32>
    %209 = tpu.matmul %206, %208, %cst_83 {dimension_numbers = #tpu.dot_dimension_numbers<[1], [1], [0], [0], [0, 0, 1, 0], [], []>} : vector<32x16xf32>, vector<32x16xf32>, vector<32x32xf32> -> vector<32x32xf32>
    %c0_84 = arith.constant 0 : index
    %c0_85 = arith.constant 0 : index
    %c0_86 = arith.constant 0 : index
    %210 = vector.load %arg7[%c0_84, %c0_85, %c0_86] : memref<2x1x32xf32, #tpu.memory_space<vmem>>, vector<1x1x32xf32>
    %211 = vector.shape_cast %210 : vector<1x1x32xf32> to vector<1x32xf32>
    %212 = vector.broadcast %211 : vector<1x32xf32> to vector<32x32xf32>
    %213 = arith.addf %209, %212 : vector<32x32xf32>
    %cst_87 = arith.constant 5.000000e-01 : f32
    %214 = vector.broadcast %cst_87 : f32 to vector<32x32xf32>
    %215 = arith.mulf %214, %213 : vector<32x32xf32>
    %cst_88 = arith.constant 0.707106769 : f32
    %216 = vector.broadcast %cst_88 : f32 to vector<32x32xf32>
    %217 = arith.mulf %213, %216 : vector<32x32xf32>
    %cst_89 = arith.constant 0.000000e+00 : f32
    %218 = vector.broadcast %cst_89 : f32 to vector<32x32xf32>
    %219 = arith.cmpf olt, %217, %218 : vector<32x32xf32>
    %cst_90 = arith.constant -1.000000e+00 : f32
    %cst_91 = arith.constant 1.000000e+00 : f32
    %220 = vector.broadcast %cst_90 : f32 to vector<32x32xf32>
    %221 = vector.broadcast %cst_91 : f32 to vector<32x32xf32>
    %222 = arith.select %219, %220, %221 : vector<32x32xi1>, vector<32x32xf32>
    %223 = math.absf %217 : vector<32x32xf32>
    %cst_92 = arith.constant 0.327591091 : f32
    %224 = vector.broadcast %cst_92 : f32 to vector<32x32xf32>
    %225 = arith.mulf %224, %223 : vector<32x32xf32>
    %cst_93 = arith.constant 1.000000e+00 : f32
    %226 = vector.broadcast %cst_93 : f32 to vector<32x32xf32>
    %227 = arith.addf %226, %225 : vector<32x32xf32>
    %cst_94 = arith.constant 1.000000e+00 : f32
    %228 = vector.broadcast %cst_94 : f32 to vector<32x32xf32>
    %229 = arith.divf %228, %227 : vector<32x32xf32>
    %cst_95 = arith.constant 1.06140542 : f32
    %230 = vector.broadcast %cst_95 : f32 to vector<32x32xf32>
    %231 = arith.mulf %230, %229 : vector<32x32xf32>
    %cst_96 = arith.constant -1.45315206 : f32
    %232 = vector.broadcast %cst_96 : f32 to vector<32x32xf32>
    %233 = arith.addf %231, %232 : vector<32x32xf32>
    %234 = arith.mulf %233, %229 : vector<32x32xf32>
    %cst_97 = arith.constant 1.42141378 : f32
    %235 = vector.broadcast %cst_97 : f32 to vector<32x32xf32>
    %236 = arith.addf %234, %235 : vector<32x32xf32>
    %237 = arith.mulf %236, %229 : vector<32x32xf32>
    %cst_98 = arith.constant -0.284496725 : f32
    %238 = vector.broadcast %cst_98 : f32 to vector<32x32xf32>
    %239 = arith.addf %237, %238 : vector<32x32xf32>
    %240 = arith.mulf %239, %229 : vector<32x32xf32>
    %cst_99 = arith.constant 0.254829586 : f32
    %241 = vector.broadcast %cst_99 : f32 to vector<32x32xf32>
    %242 = arith.addf %240, %241 : vector<32x32xf32>
    %243 = arith.mulf %242, %229 : vector<32x32xf32>
    %cst_100 = arith.constant 0.000000e+00 : f32
    %244 = vector.broadcast %cst_100 : f32 to vector<32x32xf32>
    %245 = arith.subf %244, %223 : vector<32x32xf32>
    %246 = arith.mulf %245, %223 : vector<32x32xf32>
    %247 = math.exp %246 : vector<32x32xf32>
    %248 = arith.mulf %243, %247 : vector<32x32xf32>
    %cst_101 = arith.constant 1.000000e+00 : f32
    %249 = vector.broadcast %cst_101 : f32 to vector<32x32xf32>
    %250 = arith.subf %249, %248 : vector<32x32xf32>
    %251 = arith.mulf %222, %250 : vector<32x32xf32>
    %cst_102 = arith.constant 1.000000e+00 : f32
    %252 = vector.broadcast %cst_102 : f32 to vector<32x32xf32>
    %253 = arith.addf %252, %251 : vector<32x32xf32>
    %254 = arith.mulf %215, %253 : vector<32x32xf32>
    %c0_103 = arith.constant 0 : index
    %c0_104 = arith.constant 0 : index
    %c0_105 = arith.constant 0 : index
    %255 = vector.load %arg8[%c0_103, %c0_104, %c0_105] : memref<2x16x32xf32, #tpu.memory_space<vmem>>, vector<1x16x32xf32>
    %256 = vector.shape_cast %255 : vector<1x16x32xf32> to vector<16x32xf32>
    %cst_106 = arith.constant dense<0.000000e+00> : vector<32x16xf32>
    %257 = tpu.matmul %254, %256, %cst_106 {dimension_numbers = #tpu.dot_dimension_numbers<[1], [1], [0], [0], [0, 0, 1, 0], [], []>} : vector<32x32xf32>, vector<16x32xf32>, vector<32x16xf32> -> vector<32x16xf32>
    %258 = arith.addf %206, %257 : vector<32x16xf32>
    %c0_107 = arith.constant 0 : index
    %c0_108 = arith.constant 0 : index
    %c0_109 = arith.constant 0 : index
    %259 = vector.load %arg9[%c0_107, %c0_108, %c0_109] : memref<2x1x16xf32, #tpu.memory_space<vmem>>, vector<1x1x16xf32>
    %260 = vector.shape_cast %259 : vector<1x1x16xf32> to vector<1x16xf32>
    %261 = vector.broadcast %260 : vector<1x16xf32> to vector<32x16xf32>
    %262 = arith.addf %258, %261 : vector<32x16xf32>
    %c2_110 = arith.constant 2 : index
    %c0_111 = arith.constant 0 : index
    %c0_112 = arith.constant 0 : index
    %263 = vector.load %arg3[%c2_110, %c0_111, %c0_112] : memref<4x48x16xf32, #tpu.memory_space<vmem>>, vector<1x48x16xf32>
    %264 = vector.shape_cast %263 : vector<1x48x16xf32> to vector<48x16xf32>
    %c2_113 = arith.constant 2 : index
    %c0_114 = arith.constant 0 : index
    %c0_115 = arith.constant 0 : index
    %c0_116 = arith.constant 0 : index
    %265 = vector.load %arg4[%c2_113, %c0_114, %c0_115, %c0_116] : memref<4x2x16x8xf32, #tpu.memory_space<vmem>>, vector<1x2x16x8xf32>
    %266 = vector.shape_cast %265 : vector<1x2x16x8xf32> to vector<2x16x8xf32>
    %c1_117 = arith.constant 1 : index
    %c0_118 = arith.constant 0 : index
    %c0_119 = arith.constant 0 : index
    %267 = vector.load %arg5[%c1_117, %c0_118, %c0_119] : memref<2x1x16xf32, #tpu.memory_space<vmem>>, vector<1x1x16xf32>
    %268 = vector.shape_cast %267 : vector<1x1x16xf32> to vector<1x16xf32>
    %cst_120 = arith.constant dense<0.000000e+00> : vector<32x48xf32>
    %269 = tpu.matmul %262, %264, %cst_120 {dimension_numbers = #tpu.dot_dimension_numbers<[1], [1], [0], [0], [0, 0, 1, 0], [], []>} : vector<32x16xf32>, vector<48x16xf32>, vector<32x48xf32> -> vector<32x48xf32>
    %cst_121 = arith.constant 0.000000e+00 : f32
    %270 = vector.broadcast %cst_121 : f32 to vector<32x16xf32>
    %cst_122 = arith.constant 0.000000e+00 : f32
    %271 = vector.broadcast %cst_122 : f32 to vector<1x32xf32>
    %272 = vector.extract_strided_slice %269 {offsets = [0, 0], sizes = [32, 8], strides = [1, 1]} : vector<32x48xf32> to vector<32x8xf32>
    %273 = vector.extract_strided_slice %269 {offsets = [0, 16], sizes = [32, 8], strides = [1, 1]} : vector<32x48xf32> to vector<32x8xf32>
    %274 = vector.extract_strided_slice %269 {offsets = [0, 32], sizes = [32, 8], strides = [1, 1]} : vector<32x48xf32> to vector<32x8xf32>
    %cst_123 = arith.constant dense<0.000000e+00> : vector<32x32xf32>
    %275 = tpu.matmul %272, %273, %cst_123 {dimension_numbers = #tpu.dot_dimension_numbers<[1], [1], [0], [0], [0, 0, 1, 0], [], []>} : vector<32x8xf32>, vector<32x8xf32>, vector<32x32xf32> -> vector<32x32xf32>
    %cst_124 = arith.constant -3.40282347E+38 : f32
    %276 = vector.broadcast %cst_124 : f32 to vector<32x32xf32>
    %277 = arith.select %4, %276, %275 : vector<32x32xi1>, vector<32x32xf32>
    %cst_125 = arith.constant dense<0xFF800000> : vector<32xf32>
    %278 = vector.multi_reduction <maximumf>, %277, %cst_125 [1] : vector<32x32xf32> to vector<32xf32>
    %279 = vector.shape_cast %278 : vector<32xf32> to vector<32x1xf32>
    %280 = vector.broadcast %279 : vector<32x1xf32> to vector<32x32xf32>
    %281 = arith.subf %277, %280 : vector<32x32xf32>
    %282 = math.exp %281 : vector<32x32xf32>
    %cst_126 = arith.constant dense<0.000000e+00> : vector<32xf32>
    %283 = vector.multi_reduction <add>, %282, %cst_126 [1] : vector<32x32xf32> to vector<32xf32>
    %284 = vector.shape_cast %283 : vector<32xf32> to vector<32x1xf32>
    %285 = tpu.reciprocal %284 {approx = true} : vector<32x1xf32> -> vector<32x1xf32>
    %286 = vector.broadcast %285 : vector<32x1xf32> to vector<32x32xf32>
    %287 = arith.mulf %282, %286 : vector<32x32xf32>
    %cst_127 = arith.constant dense<0.000000e+00> : vector<32xf32>
    %288 = vector.multi_reduction <add>, %287, %cst_127 [0] : vector<32x32xf32> to vector<32xf32>
    %289 = vector.shape_cast %288 : vector<32xf32> to vector<1x32xf32>
    %290 = arith.addf %271, %289 : vector<1x32xf32>
    %cst_128 = arith.constant dense<0.000000e+00> : vector<32x8xf32>
    %291 = tpu.matmul %287, %274, %cst_128 {dimension_numbers = #tpu.dot_dimension_numbers<[1], [0], [0], [1], [0, 0, 1, 1], [], []>} : vector<32x32xf32>, vector<32x8xf32>, vector<32x8xf32> -> vector<32x8xf32>
    %292 = vector.extract_strided_slice %266 {offsets = [0, 0, 0], sizes = [1, 16, 8], strides = [1, 1, 1]} : vector<2x16x8xf32> to vector<1x16x8xf32>
    %293 = vector.shape_cast %292 : vector<1x16x8xf32> to vector<16x8xf32>
    %cst_129 = arith.constant dense<0.000000e+00> : vector<32x16xf32>
    %294 = tpu.matmul %291, %293, %cst_129 {dimension_numbers = #tpu.dot_dimension_numbers<[1], [1], [0], [0], [0, 0, 1, 0], [], []>} : vector<32x8xf32>, vector<16x8xf32>, vector<32x16xf32> -> vector<32x16xf32>
    %295 = arith.addf %270, %294 : vector<32x16xf32>
    %296 = vector.extract_strided_slice %269 {offsets = [0, 8], sizes = [32, 8], strides = [1, 1]} : vector<32x48xf32> to vector<32x8xf32>
    %297 = vector.extract_strided_slice %269 {offsets = [0, 24], sizes = [32, 8], strides = [1, 1]} : vector<32x48xf32> to vector<32x8xf32>
    %298 = vector.extract_strided_slice %269 {offsets = [0, 40], sizes = [32, 8], strides = [1, 1]} : vector<32x48xf32> to vector<32x8xf32>
    %cst_130 = arith.constant dense<0.000000e+00> : vector<32x32xf32>
    %299 = tpu.matmul %296, %297, %cst_130 {dimension_numbers = #tpu.dot_dimension_numbers<[1], [1], [0], [0], [0, 0, 1, 0], [], []>} : vector<32x8xf32>, vector<32x8xf32>, vector<32x32xf32> -> vector<32x32xf32>
    %cst_131 = arith.constant -3.40282347E+38 : f32
    %300 = vector.broadcast %cst_131 : f32 to vector<32x32xf32>
    %301 = arith.select %4, %300, %299 : vector<32x32xi1>, vector<32x32xf32>
    %cst_132 = arith.constant dense<0xFF800000> : vector<32xf32>
    %302 = vector.multi_reduction <maximumf>, %301, %cst_132 [1] : vector<32x32xf32> to vector<32xf32>
    %303 = vector.shape_cast %302 : vector<32xf32> to vector<32x1xf32>
    %304 = vector.broadcast %303 : vector<32x1xf32> to vector<32x32xf32>
    %305 = arith.subf %301, %304 : vector<32x32xf32>
    %306 = math.exp %305 : vector<32x32xf32>
    %cst_133 = arith.constant dense<0.000000e+00> : vector<32xf32>
    %307 = vector.multi_reduction <add>, %306, %cst_133 [1] : vector<32x32xf32> to vector<32xf32>
    %308 = vector.shape_cast %307 : vector<32xf32> to vector<32x1xf32>
    %309 = tpu.reciprocal %308 {approx = true} : vector<32x1xf32> -> vector<32x1xf32>
    %310 = vector.broadcast %309 : vector<32x1xf32> to vector<32x32xf32>
    %311 = arith.mulf %306, %310 : vector<32x32xf32>
    %cst_134 = arith.constant dense<0.000000e+00> : vector<32xf32>
    %312 = vector.multi_reduction <add>, %311, %cst_134 [0] : vector<32x32xf32> to vector<32xf32>
    %313 = vector.shape_cast %312 : vector<32xf32> to vector<1x32xf32>
    %314 = arith.addf %290, %313 : vector<1x32xf32>
    %cst_135 = arith.constant dense<0.000000e+00> : vector<32x8xf32>
    %315 = tpu.matmul %311, %298, %cst_135 {dimension_numbers = #tpu.dot_dimension_numbers<[1], [0], [0], [1], [0, 0, 1, 1], [], []>} : vector<32x32xf32>, vector<32x8xf32>, vector<32x8xf32> -> vector<32x8xf32>
    %316 = vector.extract_strided_slice %266 {offsets = [1, 0, 0], sizes = [1, 16, 8], strides = [1, 1, 1]} : vector<2x16x8xf32> to vector<1x16x8xf32>
    %317 = vector.shape_cast %316 : vector<1x16x8xf32> to vector<16x8xf32>
    %cst_136 = arith.constant dense<0.000000e+00> : vector<32x16xf32>
    %318 = tpu.matmul %315, %317, %cst_136 {dimension_numbers = #tpu.dot_dimension_numbers<[1], [1], [0], [0], [0, 0, 1, 0], [], []>} : vector<32x8xf32>, vector<16x8xf32>, vector<32x16xf32> -> vector<32x16xf32>
    %319 = arith.addf %295, %318 : vector<32x16xf32>
    %320 = arith.addf %262, %319 : vector<32x16xf32>
    %321 = vector.broadcast %268 : vector<1x16xf32> to vector<32x16xf32>
    %322 = arith.addf %320, %321 : vector<32x16xf32>
    %c0_i32_137 = arith.constant 0 : i32
    %323 = vector.broadcast %c0_i32_137 : i32 to vector<1x32xi32>
    %324 = arith.cmpi sge, %13, %323 : vector<1x32xi32>
    %c8_i32_138 = arith.constant 8 : i32
    %325 = vector.broadcast %c8_i32_138 : i32 to vector<1x32xi32>
    %326 = arith.cmpi slt, %13, %325 : vector<1x32xi32>
    %327 = arith.andi %324, %326 : vector<1x32xi1>
    %cst_139 = arith.constant -3.40282347E+38 : f32
    %328 = vector.broadcast %cst_139 : f32 to vector<1x32xf32>
    %329 = arith.select %327, %314, %328 : vector<1x32xi1>, vector<1x32xf32>
    %cst_140 = arith.constant dense<0xFF800000> : vector<1xf32>
    %330 = vector.multi_reduction <maximumf>, %329, %cst_140 [1] : vector<1x32xf32> to vector<1xf32>
    %331 = vector.shape_cast %330 : vector<1xf32> to vector<1x1xf32>
    %332 = vector.broadcast %331 : vector<1x1xf32> to vector<1x32xf32>
    %333 = arith.cmpf oge, %314, %332 : vector<1x32xf32>
    %334 = arith.andi %327, %333 : vector<1x32xi1>
    %cst_141 = arith.constant 3.200000e+01 : f32
    %335 = vector.broadcast %cst_141 : f32 to vector<1x32xf32>
    %336 = arith.select %334, %14, %335 : vector<1x32xi1>, vector<1x32xf32>
    %cst_142 = arith.constant dense<0x7F800000> : vector<1xf32>
    %337 = vector.multi_reduction <minimumf>, %336, %cst_142 [1] : vector<1x32xf32> to vector<1xf32>
    %338 = vector.shape_cast %337 : vector<1xf32> to vector<1x1xf32>
    %339 = vector.broadcast %338 : vector<1x1xf32> to vector<1x32xf32>
    %340 = arith.cmpf oeq, %14, %339 : vector<1x32xf32>
    %c8_i32_143 = arith.constant 8 : i32
    %341 = vector.broadcast %c8_i32_143 : i32 to vector<1x32xi32>
    %342 = arith.cmpi sge, %13, %341 : vector<1x32xi32>
    %c16_i32_144 = arith.constant 16 : i32
    %343 = vector.broadcast %c16_i32_144 : i32 to vector<1x32xi32>
    %344 = arith.cmpi slt, %13, %343 : vector<1x32xi32>
    %345 = arith.andi %342, %344 : vector<1x32xi1>
    %cst_145 = arith.constant -3.40282347E+38 : f32
    %346 = vector.broadcast %cst_145 : f32 to vector<1x32xf32>
    %347 = arith.select %345, %314, %346 : vector<1x32xi1>, vector<1x32xf32>
    %cst_146 = arith.constant dense<0xFF800000> : vector<1xf32>
    %348 = vector.multi_reduction <maximumf>, %347, %cst_146 [1] : vector<1x32xf32> to vector<1xf32>
    %349 = vector.shape_cast %348 : vector<1xf32> to vector<1x1xf32>
    %350 = vector.broadcast %349 : vector<1x1xf32> to vector<1x32xf32>
    %351 = arith.cmpf oge, %314, %350 : vector<1x32xf32>
    %352 = arith.andi %345, %351 : vector<1x32xi1>
    %cst_147 = arith.constant 3.200000e+01 : f32
    %353 = vector.broadcast %cst_147 : f32 to vector<1x32xf32>
    %354 = arith.select %352, %14, %353 : vector<1x32xi1>, vector<1x32xf32>
    %cst_148 = arith.constant dense<0x7F800000> : vector<1xf32>
    %355 = vector.multi_reduction <minimumf>, %354, %cst_148 [1] : vector<1x32xf32> to vector<1xf32>
    %356 = vector.shape_cast %355 : vector<1xf32> to vector<1x1xf32>
    %357 = vector.broadcast %356 : vector<1x1xf32> to vector<1x32xf32>
    %358 = arith.cmpf oeq, %14, %357 : vector<1x32xf32>
    %359 = arith.ori %340, %358 : vector<1x32xi1>
    %c16_i32_149 = arith.constant 16 : i32
    %360 = vector.broadcast %c16_i32_149 : i32 to vector<1x32xi32>
    %361 = arith.cmpi sge, %13, %360 : vector<1x32xi32>
    %c24_i32_150 = arith.constant 24 : i32
    %362 = vector.broadcast %c24_i32_150 : i32 to vector<1x32xi32>
    %363 = arith.cmpi slt, %13, %362 : vector<1x32xi32>
    %364 = arith.andi %361, %363 : vector<1x32xi1>
    %cst_151 = arith.constant -3.40282347E+38 : f32
    %365 = vector.broadcast %cst_151 : f32 to vector<1x32xf32>
    %366 = arith.select %364, %314, %365 : vector<1x32xi1>, vector<1x32xf32>
    %cst_152 = arith.constant dense<0xFF800000> : vector<1xf32>
    %367 = vector.multi_reduction <maximumf>, %366, %cst_152 [1] : vector<1x32xf32> to vector<1xf32>
    %368 = vector.shape_cast %367 : vector<1xf32> to vector<1x1xf32>
    %369 = vector.broadcast %368 : vector<1x1xf32> to vector<1x32xf32>
    %370 = arith.cmpf oge, %314, %369 : vector<1x32xf32>
    %371 = arith.andi %364, %370 : vector<1x32xi1>
    %cst_153 = arith.constant 3.200000e+01 : f32
    %372 = vector.broadcast %cst_153 : f32 to vector<1x32xf32>
    %373 = arith.select %371, %14, %372 : vector<1x32xi1>, vector<1x32xf32>
    %cst_154 = arith.constant dense<0x7F800000> : vector<1xf32>
    %374 = vector.multi_reduction <minimumf>, %373, %cst_154 [1] : vector<1x32xf32> to vector<1xf32>
    %375 = vector.shape_cast %374 : vector<1xf32> to vector<1x1xf32>
    %376 = vector.broadcast %375 : vector<1x1xf32> to vector<1x32xf32>
    %377 = arith.cmpf oeq, %14, %376 : vector<1x32xf32>
    %378 = arith.ori %359, %377 : vector<1x32xi1>
    %c24_i32_155 = arith.constant 24 : i32
    %379 = vector.broadcast %c24_i32_155 : i32 to vector<1x32xi32>
    %380 = arith.cmpi sge, %13, %379 : vector<1x32xi32>
    %c32_i32_156 = arith.constant 32 : i32
    %381 = vector.broadcast %c32_i32_156 : i32 to vector<1x32xi32>
    %382 = arith.cmpi slt, %13, %381 : vector<1x32xi32>
    %383 = arith.andi %380, %382 : vector<1x32xi1>
    %cst_157 = arith.constant -3.40282347E+38 : f32
    %384 = vector.broadcast %cst_157 : f32 to vector<1x32xf32>
    %385 = arith.select %383, %314, %384 : vector<1x32xi1>, vector<1x32xf32>
    %cst_158 = arith.constant dense<0xFF800000> : vector<1xf32>
    %386 = vector.multi_reduction <maximumf>, %385, %cst_158 [1] : vector<1x32xf32> to vector<1xf32>
    %387 = vector.shape_cast %386 : vector<1xf32> to vector<1x1xf32>
    %388 = vector.broadcast %387 : vector<1x1xf32> to vector<1x32xf32>
    %389 = arith.cmpf oge, %314, %388 : vector<1x32xf32>
    %390 = arith.andi %383, %389 : vector<1x32xi1>
    %cst_159 = arith.constant 3.200000e+01 : f32
    %391 = vector.broadcast %cst_159 : f32 to vector<1x32xf32>
    %392 = arith.select %390, %14, %391 : vector<1x32xi1>, vector<1x32xf32>
    %cst_160 = arith.constant dense<0x7F800000> : vector<1xf32>
    %393 = vector.multi_reduction <minimumf>, %392, %cst_160 [1] : vector<1x32xf32> to vector<1xf32>
    %394 = vector.shape_cast %393 : vector<1xf32> to vector<1x1xf32>
    %395 = vector.broadcast %394 : vector<1x1xf32> to vector<1x32xf32>
    %396 = arith.cmpf oeq, %14, %395 : vector<1x32xf32>
    %397 = arith.ori %378, %396 : vector<1x32xi1>
    %398 = vector.shape_cast %397 : vector<1x32xi1> to vector<1x32xi1>
    %399 = vector.broadcast %398 : vector<1x32xi1> to vector<32x32xi1>
    %400 = arith.andi %12, %399 : vector<32x32xi1>
    %401 = arith.ori %8, %400 : vector<32x32xi1>
    %c3 = arith.constant 3 : index
    %c0_161 = arith.constant 0 : index
    %c0_162 = arith.constant 0 : index
    %402 = vector.load %arg3[%c3, %c0_161, %c0_162] : memref<4x48x16xf32, #tpu.memory_space<vmem>>, vector<1x48x16xf32>
    %403 = vector.shape_cast %402 : vector<1x48x16xf32> to vector<48x16xf32>
    %c3_163 = arith.constant 3 : index
    %c0_164 = arith.constant 0 : index
    %c0_165 = arith.constant 0 : index
    %c0_166 = arith.constant 0 : index
    %404 = vector.load %arg4[%c3_163, %c0_164, %c0_165, %c0_166] : memref<4x2x16x8xf32, #tpu.memory_space<vmem>>, vector<1x2x16x8xf32>
    %405 = vector.shape_cast %404 : vector<1x2x16x8xf32> to vector<2x16x8xf32>
    %c1_167 = arith.constant 1 : index
    %c0_168 = arith.constant 0 : index
    %c0_169 = arith.constant 0 : index
    %406 = vector.load %arg5[%c1_167, %c0_168, %c0_169] : memref<2x1x16xf32, #tpu.memory_space<vmem>>, vector<1x1x16xf32>
    %407 = vector.shape_cast %406 : vector<1x1x16xf32> to vector<1x16xf32>
    %cst_170 = arith.constant dense<0.000000e+00> : vector<32x48xf32>
    %408 = tpu.matmul %322, %403, %cst_170 {dimension_numbers = #tpu.dot_dimension_numbers<[1], [1], [0], [0], [0, 0, 1, 0], [], []>} : vector<32x16xf32>, vector<48x16xf32>, vector<32x48xf32> -> vector<32x48xf32>
    %cst_171 = arith.constant 0.000000e+00 : f32
    %409 = vector.broadcast %cst_171 : f32 to vector<32x16xf32>
    %410 = vector.extract_strided_slice %408 {offsets = [0, 0], sizes = [32, 8], strides = [1, 1]} : vector<32x48xf32> to vector<32x8xf32>
    %411 = vector.extract_strided_slice %408 {offsets = [0, 16], sizes = [32, 8], strides = [1, 1]} : vector<32x48xf32> to vector<32x8xf32>
    %412 = vector.extract_strided_slice %408 {offsets = [0, 32], sizes = [32, 8], strides = [1, 1]} : vector<32x48xf32> to vector<32x8xf32>
    %cst_172 = arith.constant dense<0.000000e+00> : vector<32x32xf32>
    %413 = tpu.matmul %410, %411, %cst_172 {dimension_numbers = #tpu.dot_dimension_numbers<[1], [1], [0], [0], [0, 0, 1, 0], [], []>} : vector<32x8xf32>, vector<32x8xf32>, vector<32x32xf32> -> vector<32x32xf32>
    %cst_173 = arith.constant -3.40282347E+38 : f32
    %414 = vector.broadcast %cst_173 : f32 to vector<32x32xf32>
    %415 = arith.select %401, %414, %413 : vector<32x32xi1>, vector<32x32xf32>
    %cst_174 = arith.constant dense<0xFF800000> : vector<32xf32>
    %416 = vector.multi_reduction <maximumf>, %415, %cst_174 [1] : vector<32x32xf32> to vector<32xf32>
    %417 = vector.shape_cast %416 : vector<32xf32> to vector<32x1xf32>
    %418 = vector.broadcast %417 : vector<32x1xf32> to vector<32x32xf32>
    %419 = arith.subf %415, %418 : vector<32x32xf32>
    %420 = math.exp %419 : vector<32x32xf32>
    %cst_175 = arith.constant dense<0.000000e+00> : vector<32xf32>
    %421 = vector.multi_reduction <add>, %420, %cst_175 [1] : vector<32x32xf32> to vector<32xf32>
    %422 = vector.shape_cast %421 : vector<32xf32> to vector<32x1xf32>
    %423 = tpu.reciprocal %422 {approx = true} : vector<32x1xf32> -> vector<32x1xf32>
    %424 = vector.broadcast %423 : vector<32x1xf32> to vector<32x32xf32>
    %425 = arith.mulf %420, %424 : vector<32x32xf32>
    %cst_176 = arith.constant dense<0.000000e+00> : vector<32x8xf32>
    %426 = tpu.matmul %425, %412, %cst_176 {dimension_numbers = #tpu.dot_dimension_numbers<[1], [0], [0], [1], [0, 0, 1, 1], [], []>} : vector<32x32xf32>, vector<32x8xf32>, vector<32x8xf32> -> vector<32x8xf32>
    %427 = vector.extract_strided_slice %405 {offsets = [0, 0, 0], sizes = [1, 16, 8], strides = [1, 1, 1]} : vector<2x16x8xf32> to vector<1x16x8xf32>
    %428 = vector.shape_cast %427 : vector<1x16x8xf32> to vector<16x8xf32>
    %cst_177 = arith.constant dense<0.000000e+00> : vector<32x16xf32>
    %429 = tpu.matmul %426, %428, %cst_177 {dimension_numbers = #tpu.dot_dimension_numbers<[1], [1], [0], [0], [0, 0, 1, 0], [], []>} : vector<32x8xf32>, vector<16x8xf32>, vector<32x16xf32> -> vector<32x16xf32>
    %430 = arith.addf %409, %429 : vector<32x16xf32>
    %431 = vector.extract_strided_slice %408 {offsets = [0, 8], sizes = [32, 8], strides = [1, 1]} : vector<32x48xf32> to vector<32x8xf32>
    %432 = vector.extract_strided_slice %408 {offsets = [0, 24], sizes = [32, 8], strides = [1, 1]} : vector<32x48xf32> to vector<32x8xf32>
    %433 = vector.extract_strided_slice %408 {offsets = [0, 40], sizes = [32, 8], strides = [1, 1]} : vector<32x48xf32> to vector<32x8xf32>
    %cst_178 = arith.constant dense<0.000000e+00> : vector<32x32xf32>
    %434 = tpu.matmul %431, %432, %cst_178 {dimension_numbers = #tpu.dot_dimension_numbers<[1], [1], [0], [0], [0, 0, 1, 0], [], []>} : vector<32x8xf32>, vector<32x8xf32>, vector<32x32xf32> -> vector<32x32xf32>
    %cst_179 = arith.constant -3.40282347E+38 : f32
    %435 = vector.broadcast %cst_179 : f32 to vector<32x32xf32>
    %436 = arith.select %401, %435, %434 : vector<32x32xi1>, vector<32x32xf32>
    %cst_180 = arith.constant dense<0xFF800000> : vector<32xf32>
    %437 = vector.multi_reduction <maximumf>, %436, %cst_180 [1] : vector<32x32xf32> to vector<32xf32>
    %438 = vector.shape_cast %437 : vector<32xf32> to vector<32x1xf32>
    %439 = vector.broadcast %438 : vector<32x1xf32> to vector<32x32xf32>
    %440 = arith.subf %436, %439 : vector<32x32xf32>
    %441 = math.exp %440 : vector<32x32xf32>
    %cst_181 = arith.constant dense<0.000000e+00> : vector<32xf32>
    %442 = vector.multi_reduction <add>, %441, %cst_181 [1] : vector<32x32xf32> to vector<32xf32>
    %443 = vector.shape_cast %442 : vector<32xf32> to vector<32x1xf32>
    %444 = tpu.reciprocal %443 {approx = true} : vector<32x1xf32> -> vector<32x1xf32>
    %445 = vector.broadcast %444 : vector<32x1xf32> to vector<32x32xf32>
    %446 = arith.mulf %441, %445 : vector<32x32xf32>
    %cst_182 = arith.constant dense<0.000000e+00> : vector<32x8xf32>
    %447 = tpu.matmul %446, %433, %cst_182 {dimension_numbers = #tpu.dot_dimension_numbers<[1], [0], [0], [1], [0, 0, 1, 1], [], []>} : vector<32x32xf32>, vector<32x8xf32>, vector<32x8xf32> -> vector<32x8xf32>
    %448 = vector.extract_strided_slice %405 {offsets = [1, 0, 0], sizes = [1, 16, 8], strides = [1, 1, 1]} : vector<2x16x8xf32> to vector<1x16x8xf32>
    %449 = vector.shape_cast %448 : vector<1x16x8xf32> to vector<16x8xf32>
    %cst_183 = arith.constant dense<0.000000e+00> : vector<32x16xf32>
    %450 = tpu.matmul %447, %449, %cst_183 {dimension_numbers = #tpu.dot_dimension_numbers<[1], [1], [0], [0], [0, 0, 1, 0], [], []>} : vector<32x8xf32>, vector<16x8xf32>, vector<32x16xf32> -> vector<32x16xf32>
    %451 = arith.addf %430, %450 : vector<32x16xf32>
    %452 = arith.addf %322, %451 : vector<32x16xf32>
    %453 = vector.broadcast %407 : vector<1x16xf32> to vector<32x16xf32>
    %454 = arith.addf %452, %453 : vector<32x16xf32>
    %c1_184 = arith.constant 1 : index
    %c0_185 = arith.constant 0 : index
    %c0_186 = arith.constant 0 : index
    %455 = vector.load %arg6[%c1_184, %c0_185, %c0_186] : memref<2x32x16xf32, #tpu.memory_space<vmem>>, vector<1x32x16xf32>
    %456 = vector.shape_cast %455 : vector<1x32x16xf32> to vector<32x16xf32>
    %cst_187 = arith.constant dense<0.000000e+00> : vector<32x32xf32>
    %457 = tpu.matmul %454, %456, %cst_187 {dimension_numbers = #tpu.dot_dimension_numbers<[1], [1], [0], [0], [0, 0, 1, 0], [], []>} : vector<32x16xf32>, vector<32x16xf32>, vector<32x32xf32> -> vector<32x32xf32>
    %c1_188 = arith.constant 1 : index
    %c0_189 = arith.constant 0 : index
    %c0_190 = arith.constant 0 : index
    %458 = vector.load %arg7[%c1_188, %c0_189, %c0_190] : memref<2x1x32xf32, #tpu.memory_space<vmem>>, vector<1x1x32xf32>
    %459 = vector.shape_cast %458 : vector<1x1x32xf32> to vector<1x32xf32>
    %460 = vector.broadcast %459 : vector<1x32xf32> to vector<32x32xf32>
    %461 = arith.addf %457, %460 : vector<32x32xf32>
    %cst_191 = arith.constant 5.000000e-01 : f32
    %462 = vector.broadcast %cst_191 : f32 to vector<32x32xf32>
    %463 = arith.mulf %462, %461 : vector<32x32xf32>
    %cst_192 = arith.constant 0.707106769 : f32
    %464 = vector.broadcast %cst_192 : f32 to vector<32x32xf32>
    %465 = arith.mulf %461, %464 : vector<32x32xf32>
    %cst_193 = arith.constant 0.000000e+00 : f32
    %466 = vector.broadcast %cst_193 : f32 to vector<32x32xf32>
    %467 = arith.cmpf olt, %465, %466 : vector<32x32xf32>
    %cst_194 = arith.constant -1.000000e+00 : f32
    %cst_195 = arith.constant 1.000000e+00 : f32
    %468 = vector.broadcast %cst_194 : f32 to vector<32x32xf32>
    %469 = vector.broadcast %cst_195 : f32 to vector<32x32xf32>
    %470 = arith.select %467, %468, %469 : vector<32x32xi1>, vector<32x32xf32>
    %471 = math.absf %465 : vector<32x32xf32>
    %cst_196 = arith.constant 0.327591091 : f32
    %472 = vector.broadcast %cst_196 : f32 to vector<32x32xf32>
    %473 = arith.mulf %472, %471 : vector<32x32xf32>
    %cst_197 = arith.constant 1.000000e+00 : f32
    %474 = vector.broadcast %cst_197 : f32 to vector<32x32xf32>
    %475 = arith.addf %474, %473 : vector<32x32xf32>
    %cst_198 = arith.constant 1.000000e+00 : f32
    %476 = vector.broadcast %cst_198 : f32 to vector<32x32xf32>
    %477 = arith.divf %476, %475 : vector<32x32xf32>
    %cst_199 = arith.constant 1.06140542 : f32
    %478 = vector.broadcast %cst_199 : f32 to vector<32x32xf32>
    %479 = arith.mulf %478, %477 : vector<32x32xf32>
    %cst_200 = arith.constant -1.45315206 : f32
    %480 = vector.broadcast %cst_200 : f32 to vector<32x32xf32>
    %481 = arith.addf %479, %480 : vector<32x32xf32>
    %482 = arith.mulf %481, %477 : vector<32x32xf32>
    %cst_201 = arith.constant 1.42141378 : f32
    %483 = vector.broadcast %cst_201 : f32 to vector<32x32xf32>
    %484 = arith.addf %482, %483 : vector<32x32xf32>
    %485 = arith.mulf %484, %477 : vector<32x32xf32>
    %cst_202 = arith.constant -0.284496725 : f32
    %486 = vector.broadcast %cst_202 : f32 to vector<32x32xf32>
    %487 = arith.addf %485, %486 : vector<32x32xf32>
    %488 = arith.mulf %487, %477 : vector<32x32xf32>
    %cst_203 = arith.constant 0.254829586 : f32
    %489 = vector.broadcast %cst_203 : f32 to vector<32x32xf32>
    %490 = arith.addf %488, %489 : vector<32x32xf32>
    %491 = arith.mulf %490, %477 : vector<32x32xf32>
    %cst_204 = arith.constant 0.000000e+00 : f32
    %492 = vector.broadcast %cst_204 : f32 to vector<32x32xf32>
    %493 = arith.subf %492, %471 : vector<32x32xf32>
    %494 = arith.mulf %493, %471 : vector<32x32xf32>
    %495 = math.exp %494 : vector<32x32xf32>
    %496 = arith.mulf %491, %495 : vector<32x32xf32>
    %cst_205 = arith.constant 1.000000e+00 : f32
    %497 = vector.broadcast %cst_205 : f32 to vector<32x32xf32>
    %498 = arith.subf %497, %496 : vector<32x32xf32>
    %499 = arith.mulf %470, %498 : vector<32x32xf32>
    %cst_206 = arith.constant 1.000000e+00 : f32
    %500 = vector.broadcast %cst_206 : f32 to vector<32x32xf32>
    %501 = arith.addf %500, %499 : vector<32x32xf32>
    %502 = arith.mulf %463, %501 : vector<32x32xf32>
    %c1_207 = arith.constant 1 : index
    %c0_208 = arith.constant 0 : index
    %c0_209 = arith.constant 0 : index
    %503 = vector.load %arg8[%c1_207, %c0_208, %c0_209] : memref<2x16x32xf32, #tpu.memory_space<vmem>>, vector<1x16x32xf32>
    %504 = vector.shape_cast %503 : vector<1x16x32xf32> to vector<16x32xf32>
    %cst_210 = arith.constant dense<0.000000e+00> : vector<32x16xf32>
    %505 = tpu.matmul %502, %504, %cst_210 {dimension_numbers = #tpu.dot_dimension_numbers<[1], [1], [0], [0], [0, 0, 1, 0], [], []>} : vector<32x32xf32>, vector<16x32xf32>, vector<32x16xf32> -> vector<32x16xf32>
    %506 = arith.addf %454, %505 : vector<32x16xf32>
    %c1_211 = arith.constant 1 : index
    %c0_212 = arith.constant 0 : index
    %c0_213 = arith.constant 0 : index
    %507 = vector.load %arg9[%c1_211, %c0_212, %c0_213] : memref<2x1x16xf32, #tpu.memory_space<vmem>>, vector<1x1x16xf32>
    %508 = vector.shape_cast %507 : vector<1x1x16xf32> to vector<1x16xf32>
    %509 = vector.broadcast %508 : vector<1x16xf32> to vector<32x16xf32>
    %510 = arith.addf %506, %509 : vector<32x16xf32>
    %c0_214 = arith.constant 0 : index
    %c0_215 = arith.constant 0 : index
    %511 = vector.load %arg10[%c0_214, %c0_215] : memref<32x16xf32, #tpu.memory_space<vmem>>, vector<32x16xf32>
    tpu.vector_store %arg10[%c0_214, %c0_215], %510 {strides = array<i32>} : memref<32x16xf32, #tpu.memory_space<vmem>>, vector<32x16xf32>,
    return
  }
  func.func @transform_0(%arg0: i32) -> (i32, i32) {
    %c0_i32 = arith.constant 0 : i32
    %c0_i32_0 = arith.constant 0 : i32
    %c0_i32_1 = arith.constant 0 : i32
    return %c0_i32, %c0_i32_0 : i32, i32
  }
  func.func @transform_1(%arg0: i32) -> (i32, i32, i32) {
    %c0_i32 = arith.constant 0 : i32
    %c0_i32_0 = arith.constant 0 : i32
    %c0_i32_1 = arith.constant 0 : i32
    %c0_i32_2 = arith.constant 0 : i32
    return %c0_i32, %c0_i32_0, %c0_i32_1 : i32, i32, i32
  }
  func.func @transform_2(%arg0: i32) -> (i32, i32, i32) {
    %c0_i32 = arith.constant 0 : i32
    %c0_i32_0 = arith.constant 0 : i32
    %c0_i32_1 = arith.constant 0 : i32
    %c0_i32_2 = arith.constant 0 : i32
    return %c0_i32, %c0_i32_0, %c0_i32_1 : i32, i32, i32
  }
  func.func @transform_3(%arg0: i32) -> (i32, i32, i32, i32) {
    %c0_i32 = arith.constant 0 : i32
    %c0_i32_0 = arith.constant 0 : i32
    %c0_i32_1 = arith.constant 0 : i32
    %c0_i32_2 = arith.constant 0 : i32
    %c0_i32_3 = arith.constant 0 : i32
    return %c0_i32, %c0_i32_0, %c0_i32_1, %c0_i32_2 : i32, i32, i32, i32
  }
  func.func @transform_4(%arg0: i32) -> (i32, i32, i32) {
    %c0_i32 = arith.constant 0 : i32
    %c0_i32_0 = arith.constant 0 : i32
    %c0_i32_1 = arith.constant 0 : i32
    %c0_i32_2 = arith.constant 0 : i32
    return %c0_i32, %c0_i32_0, %c0_i32_1 : i32, i32, i32
  }
  func.func @transform_5(%arg0: i32) -> (i32, i32, i32) {
    %c0_i32 = arith.constant 0 : i32
    %c0_i32_0 = arith.constant 0 : i32
    %c0_i32_1 = arith.constant 0 : i32
    %c0_i32_2 = arith.constant 0 : i32
    return %c0_i32, %c0_i32_0, %c0_i32_1 : i32, i32, i32
  }
  func.func @transform_6(%arg0: i32) -> (i32, i32, i32) {
    %c0_i32 = arith.constant 0 : i32
    %c0_i32_0 = arith.constant 0 : i32
    %c0_i32_1 = arith.constant 0 : i32
    %c0_i32_2 = arith.constant 0 : i32
    return %c0_i32, %c0_i32_0, %c0_i32_1 : i32, i32, i32
  }
  func.func @transform_7(%arg0: i32) -> (i32, i32, i32) {
    %c0_i32 = arith.constant 0 : i32
    %c0_i32_0 = arith.constant 0 : i32
    %c0_i32_1 = arith.constant 0 : i32
    %c0_i32_2 = arith.constant 0 : i32
    return %c0_i32, %c0_i32_0, %c0_i32_1 : i32, i32, i32
  }
  func.func @transform_8(%arg0: i32) -> (i32, i32, i32) {
    %c0_i32 = arith.constant 0 : i32
    %c0_i32_0 = arith.constant 0 : i32
    %c0_i32_1 = arith.constant 0 : i32
    %c0_i32_2 = arith.constant 0 : i32
    return %c0_i32, %c0_i32_0, %c0_i32_1 : i32, i32, i32
  }
  func.func @transform_9(%arg0: i32) -> (i32, i32) {
    %c0_i32 = arith.constant 0 : i32
    %c0_i32_0 = arith.constant 0 : i32
    %c0_i32_1 = arith.constant 0 : i32
    return %c0_i32, %c0_i32_0 : i32, i32
  }
}

</mosaic_0001>

<bundles_post_ra>
// kernel: transformer_forward.1
= control target key start
LH: loop header
LB: loop body
LE: loop exit
PB: predicated region body
PF: predicated region fallthrough
CT: control target
= control target key end

     0   :  { %vm7510_vm0 = vcmask 130048   ;;  %s7493_s0 = inlined_call_operand.vmem [shape: f32[32,16], index: 0, kind: input, shape index: {}]   ;;  %s7494_s1 = inlined_call_operand.vmem [shape: f32[3,32,32], index: 1, kind: input, shape index: {}]   ;;  %s7495_s2 = inlined_call_operand.vmem [shape: f32[4,48,16], index: 2, kind: input, shape index: {}]   ;;  %s7496_s3 = inlined_call_operand.vmem [shape: f32[4,2,16,8], index: 3, kind: input, shape index: {}]   ;;  %s7497_s4 = inlined_call_operand.vmem [shape: f32[2,1,16], index: 4, kind: input, shape index: {}]   ;;  %s7498_s5 = inlined_call_operand.vmem [shape: f32[2,32,16], index: 5, kind: input, shape index: {}]   ;;  %s7499_s6 = inlined_call_operand.vmem [shape: f32[2,1,32], index: 6, kind: input, shape index: {}]   ;;  %s7500_s7 = inlined_call_operand.vmem [shape: f32[2,16,32], index: 7, kind: input, shape index: {}]   ;;  %s7501_s8 = inlined_call_operand.vmem [shape: f32[2,1,16], index: 8, kind: input, shape index: {}]   ;;  %s7502_s9 = inlined_call_operand.hbm [shape: f32[32,16], index: 9, kind: output, shape index: {}]  }
   0x1   :  { %v66_v0 = vld [vmem:[%s7495_s2] sm:$0xff]  ;;  %v67_v1 = vld [vmem:[%s7495_s2 + $0x8] sm:$0xff]  ;;  %v68_v2 = vld [vmem:[%s7495_s2 + $0x10] sm:$0xff] }
   0x2   :  { %v5457_v3 = vpack.c.bf16 %v67_v1, %v66_v0  ;;  %vm6212_vm1 = vmpackc.low %vm7510_vm0, %vm7510_vm0  ;;  %v69_v5 = vld [vmem:[%s7495_s2 + $0x18] sm:$0xff]  ;;  %v6222_v7 = vld [vmem:[%s7493_s0] sm:$0xff] }
   0x3   :  { %v5463_v6 = vpack.c.bf16 %v69_v5, %v68_v2  ;;  %5045 = vmatprep.mubr.msk.f32.mxu0 %vm7510_vm0, %v6222_v7 }
   0x4   :  { %5459 = vmatprep.subr.msk.bf16.mxu0 %vm6212_vm1, %v5457_v3 }
   0x5   :  { %14 = vsyncpa [#allocation3], 0  ;;  %5462 = vmatpush3.bf16.xpose.msk.msra.mxu0 %vm6212_vm1, %v5457_v3  ;;  %v70_v8 = vld [vmem:[%s7495_s2 + $0x20] sm:$0xff]  ;;  %v71_v9 = vld [vmem:[%s7495_s2 + $0x28] sm:$0xff]  ;;  %vm7512_vm2 = vcmask 64512   ;;  %s6142_s29 = smov 104  }
   0x6   :  { %5465 = vmatprep.subr.msk.bf16.mxu0 %vm6212_vm1, %v5463_v6  ;;  %v5469_v10 = vpack.c.bf16 %v71_v9, %v70_v8  ;;  %v6247_v11 = vld [vmem:[%s7493_s0 + $0x8] sm:$0xff]  ;;  %v6252_v12 = vld [vmem:[%s7493_s0 + $0x10] sm:$0xff]  ;;  %v6261_v13 = vld [vmem:[%s7493_s0 + $0x18] sm:$0xff]  ;;  %s6143_s30 = smov 112   ;;  %s6144_s0 = smov 120   ;;  %vm311_vm6 = vcmask 261120  }
   0x7   :  { %vm6284_vm3 = vmpackc.low %vm7512_vm2, %vm7512_vm2  ;;  %v6314_v41 = vld [vmem:[%s7494_s1 + $0x8] sm:$0xff]  ;;  %v6319_v42 = vld [vmem:[%s7494_s1] sm:$0xff]  ;;  %s6145_s18 = smov 96   ;;  %s6146_s19 = smov 88  }
   0x8   :  { %vm7507_vm4 = vcmp.gt.f32.partialorder %v6314_v41, 0.5  ;;  %vm7506_vm5 = vcmp.gt.f32.partialorder %v6319_v42, 0.5  ;;  %v6326_v45 = vld [vmem:[%s7494_s1 + $0x10] sm:$0xff]  ;;  %v6336_v51 = vld [vmem:[%s7494_s1 + $0x18] sm:$0xff]  ;;  %s6148_s23 = smov [#allocation2]  }
   0x9   :  { %vm7504_vm7 = vcmp.gt.f32.partialorder %v6326_v45, 0.5  ;;  %vm7503_vm8 = vcmp.gt.f32.partialorder %v6336_v51, 0.5 }
   0xd   :  { %5468 = vmatpush3.bf16.xpose.msk.msra.mxu0 %vm6212_vm1, %v5463_v6 }
   0xe   :  { %5471 = vmatprep.subr.msk.bf16.mxu0 %vm6212_vm1, %v5469_v10 }
  0x15   :  { %5474 = vmatpush3.bf16.xpose.msk.msra.mxu0 %vm6212_vm1, %v5469_v10 }
  0x1c   :  { %5046 = vmatmul.mubr.msk.f32.vlgmr.msra.gmra.mrb[0].mxu0 %vm7510_vm0, %v6247_v11 }
  0x1d   :  { %5048 = vmatprep.mubr.msk.f32.mxu0 %vm7510_vm0, %v6252_v12 }
  0x20   :  { %5049 = vmatmul.mubr.msk.f32.gmra.mrb[2].mxu0 %vm7510_vm0, %v6261_v13 }
  0xef   :  { %v5047_v14 = vpop.f32.mrb[0].mxu0 }
  0xf0   :  { %v174_v15 = vpop.f32.mrb[1].mxu0 }
  0xf1   :  { %5059 = vmatprep.mubr.msk.f32.mxu1 %vm7512_vm2, %v174_v15  ;;  %v6266_v16 = vpack.i.bf16 %v5047_v14, %v174_v15 }
  0xf3   :  { %5809 = vrot.lane.b32.xlu1 %v6266_v16, %s6142_s29  ;;  %5799 = vrot.lane.b32.xlu0 %v6266_v16, %s6143_s30  ;;  %v5050_v17 = vpop.f32.mrb[2].mxu0 }
  0xf4   :  { %v184_v18 = vpop.f32.mrb[3].mxu0 }
  0xf5   :  { %v6272_v19 = vpack.i.bf16 %v5050_v17, %v184_v18 }
  0xf7   :  { %5814 = vrot.lane.b32.xlu1 %v6272_v19, %s6142_s29  ;;  %5804 = vrot.lane.b32.xlu0 %v6272_v19, %s6143_s30 }
  0xfb   :  { %481 = vrot.lane.b32.xlu1 %v5047_v14, %s6144_s0  ;;  %479 = vrot.lane.b32.xlu0 %v174_v15, %s6144_s0 }
  0xff   :  { %485 = vrot.lane.b32.xlu1 %v5050_v17, %s6144_s0  ;;  %483 = vrot.lane.b32.xlu0 %v184_v18, %s6144_s0 }
 0x165   :  { %v5810_v20 = vpop.permute.xlu1 %5809  ;;  %v5800_v21 = vpop.permute.xlu0 %5799 }
 0x166   :  { %v5812_v22 = vunpack.i.h.bf16 %v5810_v20  ;;  %v5811_v23 = vunpack.i.l.bf16 %v5810_v20  ;;  %v5802_v24 = vunpack.i.h.bf16 %v5800_v21  ;;  %v5801_v25 = vunpack.i.l.bf16 %v5800_v21 }
 0x168   :  { %v5495_v27 = vpack.c.bf16 %v5812_v22, %v5811_v23  ;;  %v5475_v28 = vpack.c.bf16 %v5802_v24, %v5801_v25 }
 0x169   :  { %v5815_v29 = vpop.permute.xlu1 %5814  ;;  %v5805_v30 = vpop.permute.xlu0 %5804 }
 0x16a   :  { %v5817_v31 = vunpack.i.h.bf16 %v5815_v29  ;;  %v5816_v32 = vunpack.i.l.bf16 %v5815_v29  ;;  %v5807_v33 = vunpack.i.h.bf16 %v5805_v30  ;;  %v5806_v34 = vunpack.i.l.bf16 %v5805_v30  ;;  %5477 = vmatprep.subr.msk.bf16.mxu1 %vm6284_vm3, %v5475_v28  ;;  %5497 = vmatprep.subr.msk.bf16.mxu0 %vm6284_vm3, %v5495_v27 }
 0x16b   :  { %5480 = vmatpush3.bf16.xpose.msk.msra.mxu1 %vm6284_vm3, %v5475_v28  ;;  %5500 = vmatpush3.bf16.xpose.msk.msra.mxu0 %vm6284_vm3, %v5495_v27 }
 0x16c   :  { %v5501_v35 = vpack.c.bf16 %v5817_v31, %v5816_v32  ;;  %v5481_v36 = vpack.c.bf16 %v5807_v33, %v5806_v34 }
 0x16d   :  { %v480_v37 = vpop.permute.xlu0 %479  ;;  %v482_v38 = vpop.permute.xlu1 %481 }
 0x16e   :  { %5087 = vmatprep.mubr.msk.f32.mxu0 %vm7512_vm2, %v480_v37  ;;  %5503 = vmatprep.subr.msk.bf16.mxu0 %vm6284_vm3, %v5501_v35 }
 0x16f   :  { %5483 = vmatprep.subr.msk.bf16.mxu1 %vm6284_vm3, %v5481_v36 }
 0x171   :  { %v484_v39 = vpop.permute.xlu0 %483  ;;  %v486_v40 = vpop.permute.xlu1 %485 }
 0x173   :  { %5486 = vmatpush3.bf16.xpose.msk.msra.mxu1 %vm6284_vm3, %v5481_v36  ;;  %5506 = vmatpush3.bf16.xpose.msk.msra.mxu0 %vm6284_vm3, %v5501_v35 }
 0x17a   :  { %5060 = vmatmul.mubr.msk.f32.vlgmr.msra.gmra.mrb[0].mxu1 %vm7512_vm2, %v5047_v14  ;;  %5088 = vmatmul.mubr.msk.f32.vlgmr.msra.gmra.mrb[4].mxu0 %vm7512_vm2, %v482_v38 }
 0x17b   :  { %5062 = vmatprep.mubr.msk.f32.mxu1 %vm7512_vm2, %v184_v18  ;;  %5090 = vmatprep.mubr.msk.f32.mxu0 %vm7512_vm2, %v484_v39 }
 0x17e   :  { %5063 = vmatmul.mubr.msk.f32.gmra.mrb[2].mxu1 %vm7512_vm2, %v5050_v17  ;;  %5091 = vmatmul.mubr.msk.f32.gmra.mrb[6].mxu0 %vm7512_vm2, %v486_v40 }
 0x24d   :  { %v5061_v43 = vpop.f32.mrb[0].mxu1  ;;  %v5089_v44 = vpop.f32.mrb[4].mxu0 }
 0x24e   :  { %v308_v46 = vsel %vm7507_vm4, -3.4028235e+38, %v5061_v43  ;;  %v288_v47 = vpop.f32.mrb[1].mxu1  ;;  %v577_v48 = vpop.f32.mrb[5].mxu0  ;;  %v597_v1 = vsel %vm7507_vm4, -3.4028235e+38, %v5089_v44 }
 0x24f   :  { %v307_v49 = vsel %vm7506_vm5, -3.4028235e+38, %v288_v47  ;;  %v315_v50 = vsel %vm311_vm6, %v308_v46, -inf  ;;  %v596_v52 = vsel %vm7506_vm5, -3.4028235e+38, %v577_v48  ;;  %v603_v2 = vsel %vm311_vm6, %v597_v1, -inf }
 0x250   :  { %316 = vmax.xlane.f32.xlu1 %v315_v50  ;;  %v312_v53 = vsel %vm311_vm6, %v307_v49, -inf  ;;  %v600_v59 = vsel %vm311_vm6, %v596_v52, -inf }
 0x251   :  { %v5092_v54 = vpop.f32.mrb[6].mxu0  ;;  %313 = vmax.xlane.f32.xlu0 %v312_v53  ;;  %v5064_v55 = vpop.f32.mrb[2].mxu1 }
 0x252   :  { %v298_v56 = vpop.f32.mrb[3].mxu1  ;;  %v587_v57 = vpop.f32.mrb[7].mxu0  ;;  %v310_v62 = vsel %vm7503_vm8, -3.4028235e+38, %v5064_v55  ;;  %v599_v3 = vsel %vm7503_vm8, -3.4028235e+38, %v5092_v54 }
 0x253   :  { %v6345_v58 = vsel %vm7504_vm7, -3.4028235e+38, %v298_v56  ;;  %v6350_v60 = vsel %vm7504_vm7, -3.4028235e+38, %v587_v57  ;;  %v321_v0 = vsel %vm311_vm6, %v310_v62, -inf  ;;  %v609_v5 = vsel %vm311_vm6, %v599_v3, -inf }
 0x254   :  { %601 = vmax.xlane.f32.xlu1 %v600_v59  ;;  %v318_v61 = vsel %vm311_vm6, %v6345_v58, -inf  ;;  %v606_v63 = vsel %vm311_vm6, %v6350_v60, -inf }
 0x255   :  { %319 = vmax.xlane.f32.xlu0 %v318_v61 }
 0x258   :  { %607 = vmax.xlane.f32.xlu1 %v606_v63 }
 0x259   :  { %322 = vmax.xlane.f32.xlu0 %v321_v0 }
 0x25d   :  { %604 = vmax.xlane.f32.xlu0 %v603_v2 }
 0x261   :  { %610 = vmax.xlane.f32.xlu0 %v609_v5 }
 0x269   :  { %5819 = vrot.lane.b32.xlu1 %v6266_v16, %s6145_s18 }
 0x2dd   :  { %v317_v6 = vpop.xlane.xlu1 %316 }
 0x2de   :  { %v325_v8 = vsub.f32 %v308_v46, %v317_v6  ;;  %v314_v9 = vpop.xlane.xlu0 %313 }
 0x2df   :  { %v324_v10 = vsub.f32 %v307_v49, %v314_v9 }
 0x2e0   :  { %v330_v14 = vmul.f32 1.442695, %v325_v8 }
 0x2e1   :  { %v328_v15 = vmul.f32 1.442695, %v324_v10  ;;  %v602_v17 = vpop.xlane.xlu1 %601 }
 0x2e2   :  { %5958 = vpow2.f32 %v330_v14  ;;  %v612_v18 = vsub.f32 %v596_v52, %v602_v17  ;;  %v320_v20 = vpop.xlane.xlu0 %319 }
 0x2e3   :  { %5960 = vpow2.f32 %v328_v15  ;;  %v326_v53 = vsub.f32 %v6345_v58, %v320_v20 }
 0x2e4   :  { %v616_v21 = vmul.f32 1.442695, %v612_v18 }
 0x2e5   :  { %v608_v22 = vpop.xlane.xlu1 %607  ;;  %v332_v54 = vmul.f32 1.442695, %v326_v53 }
 0x2e6   :  { %5962 = vpow2.f32 %v616_v21  ;;  %v323_v23 = vpop.xlane.xlu0 %322  ;;  %v614_v55 = vsub.f32 %v6350_v60, %v608_v22 }
 0x2e7   :  { %v327_v24 = vsub.f32 %v310_v62, %v323_v23 }
 0x2e8   :  { %v620_v56 = vmul.f32 1.442695, %v614_v55 }
 0x2e9   :  { %v5820_v25 = vpop.permute.xlu1 %5819  ;;  %v334_v34 = vmul.f32 1.442695, %v327_v24 }
 0x2ea   :  { %v5822_v27 = vunpack.i.h.bf16 %v5820_v25  ;;  %v5821_v28 = vunpack.i.l.bf16 %v5820_v25  ;;  %v605_v29 = vpop.xlane.xlu0 %604 }
 0x2eb   :  { %v613_v30 = vsub.f32 %v597_v1, %v605_v29 }
 0x2ec   :  { %v5959_v31 = vpop.eup %5958  ;;  %v5487_v32 = vpack.c.bf16 %v5822_v27, %v5821_v28 }
 0x2ed   :  { %v5961_v33 = vpop.eup %5960  ;;  %v618_v35 = vmul.f32 1.442695, %v613_v30  ;;  %v339_v36 = vsel %vm311_vm6, %v5959_v31, 0.0 }
 0x2ee   :  { %5488 = vmatprep.subr.bf16.mxu1 %v5487_v32  ;;  %340 = vadd.xlane.f32.xlu0 %v339_v36  ;;  %v611_v37 = vpop.xlane.xlu0 %610  ;;  %v336_v38 = vsel %vm311_vm6, %v5961_v33, 0.0 }
 0x2ef   :  { %5964 = vpow2.f32 %v618_v35  ;;  %v615_v39 = vsub.f32 %v599_v3, %v611_v37  ;;  %5490 = vmatpush3.bf16.msra.mxu1 %v5487_v32  ;;  %337 = vadd.xlane.f32.xlu1 %v336_v38 }
 0x2f0   :  { %v5963_v40 = vpop.eup %5962  ;;  %5966 = vpow2.f32 %v334_v34 }
 0x2f1   :  { %v622_v43 = vmul.f32 1.442695, %v615_v39  ;;  %v624_v44 = vsel %vm311_vm6, %v5963_v40, 0.0 }
 0x2f3   :  { %625 = vadd.xlane.f32.xlu1 %v624_v44  ;;  %5968 = vpow2.f32 %v622_v43 }
 0x2f4   :  { %5970 = vpow2.f32 %v332_v54 }
 0x2f5   :  { %5972 = vpow2.f32 %v620_v56 }
 0x2f9   :  { %v5965_v46 = vpop.eup %5964 }
 0x2fa   :  { %v627_v47 = vsel %vm311_vm6, %v5965_v46, 0.0  ;;  %v6371_v48 = vpop.eup %5966 }
 0x2fb   :  { %628 = vadd.xlane.f32.xlu0 %v627_v47  ;;  %v345_v49 = vsel %vm311_vm6, %v6371_v48, 0.0 }
 0x2fd   :  { %v6375_v50 = vpop.eup %5968 }
 0x2fe   :  { %v633_v52 = vsel %vm311_vm6, %v6375_v50, 0.0  ;;  %v5971_v57 = vpop.eup %5970 }
 0x2ff   :  { %346 = vadd.xlane.f32.xlu0 %v345_v49  ;;  %v342_v59 = vsel %vm311_vm6, %v5971_v57, 0.0  ;;  %v6386_v61 = vpop.eup %5972 }
 0x303   :  { %634 = vadd.xlane.f32.xlu0 %v633_v52 }
 0x304   :  { %5829 = vrot.lane.b32.xlu1 %v6266_v16, %s6146_s19  ;;  %v630_v16 = vsel %vm311_vm6, %v6386_v61, 0.0 }
 0x319   :  { %5824 = vrot.lane.b32.xlu0 %v6272_v19, %s6145_s18 }
 0x328   :  { %343 = vadd.xlane.f32.xlu1 %v342_v59 }
 0x32c   :  { %631 = vadd.xlane.f32.xlu1 %v630_v16 }
 0x33d   :  { %5834 = vrot.lane.b32.xlu1 %v6272_v19, %s6146_s19 }
 0x37b   :  { %v341_v58 = vpop.xlane.xlu0 %340 }
 0x37c   :  { %5974 = vrcp.f32 %v341_v58  ;;  %v338_v60 = vpop.xlane.xlu1 %337 }
 0x37d   :  { %5976 = vrcp.f32 %v338_v60 }
 0x380   :  { %v626_v62 = vpop.xlane.xlu1 %625 }
 0x381   :  { %5978 = vrcp.f32 %v626_v62 }
 0x384   :  { %v5830_v14 = vpop.permute.xlu1 %5829 }
 0x385   :  { %v5832_v21 = vunpack.i.h.bf16 %v5830_v14  ;;  %v5831_v22 = vunpack.i.l.bf16 %v5830_v14 }
 0x386   :  { %v5975_v63 = vpop.eup %5974 }
 0x387   :  { %v5977_v0 = vpop.eup %5976  ;;  %v353_v1 = vmul.f32 %v5975_v63, %v5959_v31  ;;  %v5507_v30 = vpack.c.bf16 %v5832_v21, %v5831_v22  ;;  %v4582_v21 = vld [vmem:[%s7495_s2 + $0x48] sm:$0xff] }
 0x388   :  { %v629_v2 = vpop.xlane.xlu0 %628  ;;  %v352_v3 = vmul.f32 %v5977_v0, %v5961_v33 }
 0x389   :  { %5980 = vrcp.f32 %v629_v2  ;;  %v357_v5 = vsel %vm311_vm6, %v353_v1, 0.0 }
 0x38a   :  { %v356_v6 = vsel %vm311_vm6, %v352_v3, 0.0  ;;  %5073 = vmatprep.mubr.msk.f32.mxu1 %vm311_vm6, %v352_v3 }
 0x38b   :  { %v358_v8 = vadd.f32 %v357_v5, %v356_v6  ;;  %v5979_v9 = vpop.eup %5978  ;;  %v74_v6 = vld [vmem:[%s7496_s3 + $0x10] sm:$0xff] }
 0x38c   :  { %v347_v19 = vpop.xlane.xlu0 %346  ;;  %v640_v15 = vmul.f32 %v5979_v9, %v5963_v40  ;;  %v72_v9 = vld [vmem:[%s7496_s3] sm:$0xff] }
 0x38d   :  { %5982 = vrcp.f32 %v347_v19 }
 0x38e   :  { %v644_v25 = vsel %vm311_vm6, %v640_v15, 0.0 }
 0x390   :  { %v635_v10 = vpop.xlane.xlu0 %634 }
 0x393   :  { %v5981_v17 = vpop.eup %5980 }
 0x394   :  { %v641_v18 = vmul.f32 %v5981_v17, %v5965_v46  ;;  %v5825_v20 = vpop.permute.xlu0 %5824  ;;  %v4580_v17 = vld [vmem:[%s7495_s2 + $0x38] sm:$0xff] }
 0x395   :  { %v5827_v23 = vunpack.i.h.bf16 %v5825_v20  ;;  %v5826_v24 = vunpack.i.l.bf16 %v5825_v20 }
 0x396   :  { %v645_v27 = vsel %vm311_vm6, %v641_v18, 0.0 }
 0x397   :  { %v5491_v28 = vpack.c.bf16 %v5827_v23, %v5826_v24  ;;  %v646_v29 = vadd.f32 %v645_v27, %v644_v25  ;;  %v5983_v34 = vpop.eup %5982  ;;  %v4583_v23 = vld [vmem:[%s7495_s2 + $0x50] sm:$0xff]  ;;  %v4584_v24 = vld [vmem:[%s7495_s2 + $0x58] sm:$0xff] }
 0x398   :  { %v355_v40 = vmul.f32 %v5983_v34, %v6371_v48  ;;  %v5539_v25 = vpack.c.bf16 %v4584_v24, %v4583_v23 }
 0x399   :  { %5492 = vmatprep.subr.bf16.mxu1 %v5491_v28 }
 0x39a   :  { %5494 = vmatpush3.bf16.msra.mxu1 %v5491_v28  ;;  %v361_v49 = vsel %vm311_vm6, %v355_v40, 0.0 }
 0x39b   :  { %5508 = vmatprep.subr.bf16.mxu1 %v5507_v30 }
 0x39d   :  { %5074 = vmatmul.mubr.msk.f32.vlgmr.msra.gmra.mrb[4].mxu1 %vm311_vm6, %v353_v1 }
 0x39e   :  { %5510 = vmatpush3.bf16.msra.mxu1 %v5507_v30 }
 0x3b5   :  { %v344_v31 = vpop.xlane.xlu1 %343 }
 0x3b6   :  { %5984 = vrcp.f32 %v344_v31 }
 0x3b7   :  { %5986 = vrcp.f32 %v635_v10  ;;  %v73_v10 = vld [vmem:[%s7496_s3 + $0x8] sm:$0xff] }
 0x3b8   :  { %v5521_v14 = vpack.c.bf16 %v73_v10, %v72_v9 }
 0x3b9   :  { %v632_v32 = vpop.xlane.xlu1 %631 }
 0x3ba   :  { %5988 = vrcp.f32 %v632_v32 }
 0x3bd   :  { %v5835_v33 = vpop.permute.xlu1 %5834 }
 0x3be   :  { %v5837_v35 = vunpack.i.h.bf16 %v5835_v33  ;;  %v5836_v36 = vunpack.i.l.bf16 %v5835_v33 }
 0x3c0   :  { %v5985_v37 = vpop.eup %5984  ;;  %v5511_v38 = vpack.c.bf16 %v5837_v35, %v5836_v36  ;;  %v6474_v36 = vld [vmem:[%s7497_s4] ss:$0 sm:$0xff] }
 0x3c1   :  { %v354_v39 = vmul.f32 %v5985_v37, %v5971_v57  ;;  %v5987_v43 = vpop.eup %5986 }
 0x3c2   :  { %5512 = vmatprep.subr.bf16.mxu1 %v5511_v38  ;;  %v643_v53 = vmul.f32 %v5987_v43, %v6375_v50 }
 0x3c3   :  { %v359_v44 = vsel %vm311_vm6, %v354_v39, 0.0  ;;  %5076 = vmatprep.mubr.msk.f32.mxu1 %vm311_vm6, %v354_v39  ;;  %5514 = vmatpush3.bf16.msra.mxu1 %v5511_v38 }
 0x3c4   :  { %v5989_v46 = vpop.eup %5988  ;;  %v360_v47 = vadd.f32 %v359_v44, %v358_v8  ;;  %5077 = vmatmul.mubr.msk.f32.gmra.mrb[6].mxu1 %vm311_vm6, %v355_v40  ;;  %v649_v57 = vsel %vm311_vm6, %v643_v53, 0.0  ;;  %v75_v8 = vld [vmem:[%s7496_s3 + $0x18] sm:$0xff] }
 0x3c5   :  { %5101 = vmatprep.mubr.msk.f32.mxu1 %vm311_vm6, %v640_v15  ;;  %v642_v52 = vmul.f32 %v5989_v46, %v6386_v61  ;;  %v5515_v19 = vpack.c.bf16 %v75_v8, %v74_v6  ;;  %v4579_v15 = vld [vmem:[%s7495_s2 + $0x30] sm:$0xff] }
 0x3c6   :  { %v362_v48 = vadd.f32 %v361_v49, %v360_v47  ;;  %v5527_v20 = vpack.c.bf16 %v4580_v17, %v4579_v15 }
 0x3c7   :  { %v647_v54 = vsel %vm311_vm6, %v642_v52, 0.0  ;;  %5517 = vmatprep.subr.msk.bf16.mxu1 %vm6284_vm3, %v5515_v19 }
 0x3c8   :  { %v363_v55 = vrot.slane %v362_v48, 4  ;;  %5102 = vmatmul.mubr.msk.f32.vlgmr.msra.gmra.mrb[8].mxu1 %vm311_vm6, %v641_v18  ;;  %v648_v56 = vadd.f32 %v647_v54, %v646_v29  ;;  %v4581_v18 = vld [vmem:[%s7495_s2 + $0x40] sm:$0xff]  ;;  %5529 = vmatprep.subr.msk.bf16.mxu0 %vm6212_vm1, %v5527_v20 }
 0x3c9   :  { %5104 = vmatprep.mubr.msk.f32.mxu1 %vm311_vm6, %v642_v52  ;;  %v5533_v22 = vpack.c.bf16 %v4582_v21, %v4581_v18  ;;  %5532 = vmatpush3.bf16.xpose.msk.msra.mxu0 %vm6212_vm1, %v5527_v20 }
 0x3ca   :  { %v364_v59 = vadd.f32 %v363_v55, %v362_v48  ;;  %v650_v16 = vadd.f32 %v649_v57, %v648_v56  ;;  %v63_v55 = vlaneseq }
 0x3cb   :  { %5535 = vmatprep.subr.msk.bf16.mxu0 %vm6212_vm1, %v5533_v22 }
 0x3cc   :  { %v365_v58 = vrot.slane %v364_v59, 2  ;;  %v651_v60 = vrot.slane %v650_v16, 4  ;;  %5105 = vmatmul.mubr.msk.f32.gmra.mrb[10].mxu1 %vm311_vm6, %v643_v53  ;;  %v6517_v56 = vand.u32 127, %v63_v55  ;;  %v6615_v55 = vld [vmem:[%s7494_s1 + $0x40] sm:$0xff] }
 0x3cd   :  { %5520 = vmatpush3.bf16.xpose.msk.msra.mxu1 %vm6284_vm3, %v5515_v19  ;;  %vm7511_vm4 = vcmp.gt.f32.partialorder %v6615_v55, 0.5 }
 0x3ce   :  { %v366_v61 = vadd.f32 %v365_v58, %v364_v59  ;;  %v652_v62 = vadd.f32 %v651_v60, %v650_v16  ;;  %5523 = vmatprep.subr.msk.bf16.mxu1 %vm6284_vm3, %v5521_v14  ;;  %vm7505_vm9 = vcmp.lt.s32.totalorder %v6517_v56, 8  ;;  %vm1016_vm10 = vcmp.ge.s32.totalorder %v6517_v56, 16 }
 0x3cf   :  { %vm1017_vm11 = vcmp.lt.s32.totalorder %v6517_v56, 24  ;;  %vm1031_vm13 = vcmp.ge.s32.totalorder %v6517_v56, 24  ;;  %vm1032_vm14 = vcmp.lt.s32.totalorder %v6517_v56, 32  ;;  %vm1001_vm15 = vcmp.ge.s32.totalorder %v6517_v56, 8 }
 0x3d0   :  { %v653_v50 = vrot.slane %v652_v62, 2  ;;  %v367_v63 = vrot.slane %v366_v61, 1  ;;  %vm6525_vm12 = vmand %vm1016_vm10, %vm1017_vm11  ;;  %vm1002_vm8 = vcmp.lt.s32.totalorder %v6517_v56, 16 }
 0x3d1   :  { %5538 = vmatpush3.bf16.xpose.msk.msra.mxu0 %vm6212_vm1, %v5533_v22  ;;  %vm6537_vm7 = vmand %vm1031_vm13, %vm1032_vm14 }
 0x3d2   :  { %v654_v0 = vadd.f32 %v653_v50, %v652_v62  ;;  %v368_v2 = vadd.f32 %v367_v63, %v366_v61  ;;  %5541 = vmatprep.subr.msk.bf16.mxu0 %vm6212_vm1, %v5539_v25  ;;  %vm6541_vm10 = vmand %vm1001_vm15, %vm1002_vm8 }
 0x3d4   :  { %v655_v1 = vrot.slane %v654_v0, 1 }
 0x3d6   :  { %v656_v3 = vadd.f32 %v655_v1, %v654_v0 }
 0x3d8   :  { %v6411_v5 = vadd.f32 %v656_v3, %v368_v2 }
 0x3d9   :  { %5544 = vmatpush3.bf16.xpose.msk.msra.mxu0 %vm6212_vm1, %v5539_v25 }
 0x3da   :  { %v990_v57 = vsel %vm7505_vm9, %v6411_v5, -3.4028235e+38  ;;  %v1019_v58 = vsel %vm6525_vm12, %v6411_v5, -3.4028235e+38  ;;  %v1034_v50 = vsel %vm6537_vm7, %v6411_v5, -3.4028235e+38 }
 0x3db   :  { %v991_v16 = vsel %vm311_vm6, %v990_v57, -inf  ;;  %v1020_v62 = vsel %vm311_vm6, %v1019_v58, -inf  ;;  %v1004_v63 = vsel %vm6541_vm10, %v6411_v5, -3.4028235e+38  ;;  %v1035_v0 = vsel %vm311_vm6, %v1034_v50, -inf  ;;  %v6629_v58 = vld [vmem:[%s7494_s1 + $0x58] sm:$0xff] }
 0x3dc   :  { %v1005_v1 = vsel %vm311_vm6, %v1004_v63, -inf  ;;  %v6639_v50 = vld [vmem:[%s7494_s1 + $0x38] sm:$0xff] }
 0x470   :  { %v5075_v27 = vpop.f32.mrb[4].mxu1 }
 0x471   :  { %v460_v28 = vpop.f32.mrb[5].mxu1 }
 0x497   :  { %v5078_v29 = vpop.f32.mrb[6].mxu1 }
 0x498   :  { %v470_v30 = vpop.f32.mrb[7].mxu1 }
 0x49b   :  { %v5103_v31 = vpop.f32.mrb[8].mxu1 }
 0x49c   :  { %v748_v32 = vpop.f32.mrb[9].mxu1 }
 0x49d   :  { %5111 = vmatprep.mubr.msk.f32.mxu1 %vm7512_vm2, %v748_v32 }
 0x49e   :  { %5112 = vmatmul.mubr.msk.f32.vlgmr.msra.gmra.mrb[12].mxu1 %vm7512_vm2, %v5103_v31 }
 0x49f   :  { %v5106_v33 = vpop.f32.mrb[10].mxu1  ;;  %5526 = vmatpush3.bf16.xpose.msk.msra.mxu1 %vm6284_vm3, %v5521_v14 }
 0x4a0   :  { %v758_v34 = vpop.f32.mrb[11].mxu1 }
 0x4a1   :  { %5114 = vmatprep.mubr.msk.f32.mxu1 %vm7512_vm2, %v758_v34 }
 0x4a2   :  { %5115 = vmatmul.mubr.msk.f32.gmra.mrb[14].mxu1 %vm7512_vm2, %v5106_v33 }
 0x4a3   :  { %5121 = vmatprep.mubr.msk.f32.mxu1 %vm7512_vm2, %v460_v28 }
 0x4a6   :  { %5122 = vmatmul.mubr.msk.f32.vlgmr.msra.gmra.mrb[12].mxu1 %vm7512_vm2, %v5075_v27 }
 0x4a7   :  { %5124 = vmatprep.mubr.msk.f32.mxu1 %vm7512_vm2, %v470_v30  ;;  %v6578_v30 = vcvt.s32.f32 %v6517_v56 }
 0x4aa   :  { %5125 = vmatmul.mubr.msk.f32.gmra.mrb[14].mxu1 %vm7512_vm2, %v5078_v29 }
 0x579   :  { %v5123_v35 = vpop.f32.mrb[12].mxu1 }
 0x57a   :  { %v974_v37 = vadd.f32 %v5123_v35, %v6247_v11  ;;  %v954_v38 = vpop.f32.mrb[13].mxu1 }
 0x57b   :  { %v973_v39 = vadd.f32 %v954_v38, %v6222_v7 }
 0x57c   :  { %v6482_v44 = vadd.f32 %v6474_v36, %v974_v37 }
 0x57d   :  { %v6479_v40 = vadd.f32 %v6474_v36, %v973_v39  ;;  %v5126_v43 = vpop.f32.mrb[14].mxu1 }
 0x57e   :  { %v976_v46 = vadd.f32 %v5126_v43, %v6261_v13  ;;  %v964_v47 = vpop.f32.mrb[15].mxu1 }
 0x57f   :  { %v975_v49 = vadd.f32 %v964_v47, %v6252_v12  ;;  %5139 = vmatprep.mubr.msk.f32.mxu0 %vm7510_vm0, %v6479_v40 }
 0x580   :  { %5140 = vmatmul.mubr.msk.f32.vlgmr.msra.gmra.mrb[8].mxu0 %vm7510_vm0, %v6482_v44  ;;  %v6494_v11 = vadd.f32 %v6474_v36, %v976_v46 }
 0x581   :  { %v6491_v7 = vadd.f32 %v6474_v36, %v975_v49 }
 0x583   :  { %5142 = vmatprep.mubr.msk.f32.mxu0 %vm7510_vm0, %v6491_v7 }
 0x584   :  { %5143 = vmatmul.mubr.msk.f32.gmra.mrb[10].mxu0 %vm7510_vm0, %v6494_v11 }
 0x653   :  { %v5141_v13 = vpop.f32.mrb[8].mxu0 }
 0x654   :  { %v1164_v12 = vpop.f32.mrb[9].mxu0 }
 0x655   :  { %5153 = vmatprep.mubr.msk.f32.mxu1 %vm7512_vm2, %v1164_v12  ;;  %v6501_v52 = vpack.i.bf16 %v5141_v13, %v1164_v12 }
 0x657   :  { %5839 = vrot.lane.b32.xlu0 %v6501_v52, %s6143_s30  ;;  %v5144_v53 = vpop.f32.mrb[10].mxu0 }
 0x658   :  { %v1174_v48 = vpop.f32.mrb[11].mxu0 }
 0x659   :  { %v6505_v54 = vpack.i.bf16 %v5144_v53, %v1174_v48 }
 0x65b   :  { %5849 = vrot.lane.b32.xlu0 %v6501_v52, %s6142_s29  ;;  %5844 = vrot.lane.b32.xlu1 %v6505_v54, %s6143_s30 }
 0x65f   :  { %1453 = vrot.lane.b32.xlu0 %v1164_v12, %s6144_s0  ;;  %5854 = vrot.lane.b32.xlu1 %v6505_v54, %s6142_s29 }
 0x663   :  { %1457 = vrot.lane.b32.xlu0 %v1174_v48, %s6144_s0  ;;  %1455 = vrot.lane.b32.xlu1 %v5141_v13, %s6144_s0 }
 0x667   :  { %1459 = vrot.lane.b32.xlu1 %v5144_v53, %s6144_s0 }
 0x682   :  { %992 = vmax.xlane.f32.xlu0 %v991_v16  ;;  %v6622_v16 = vld [vmem:[%s7494_s1 + $0x20] sm:$0xff] }
 0x686   :  { %1021 = vmax.xlane.f32.xlu0 %v1020_v62 }
 0x68a   :  { %1036 = vmax.xlane.f32.xlu0 %v1035_v0  ;;  %v6649_v0 = vld [vmem:[%s7494_s1 + $0x50] sm:$0xff] }
 0x68b   :  { %1006 = vmax.xlane.f32.xlu1 %v1005_v1  ;;  %vm7516_vm0 = vcmp.gt.f32.partialorder %v6649_v0, 0.5 }
 0x6c9   :  { %v5840_v2 = vpop.permute.xlu0 %5839 }
 0x6ca   :  { %v5842_v3 = vunpack.i.h.bf16 %v5840_v2  ;;  %v5841_v6 = vunpack.i.l.bf16 %v5840_v2 }
 0x6cc   :  { %v5545_v8 = vpack.c.bf16 %v5842_v3, %v5841_v6  ;;  %v6661_v3 = vld [vmem:[%s7494_s1 + $0x30] sm:$0xff] }
 0x6cd   :  { %v5845_v19 = vpop.permute.xlu1 %5844  ;;  %v5850_v14 = vpop.permute.xlu0 %5849 }
 0x6ce   :  { %v5847_v9 = vunpack.i.h.bf16 %v5845_v19  ;;  %v5846_v10 = vunpack.i.l.bf16 %v5845_v19  ;;  %5547 = vmatprep.subr.msk.bf16.mxu1 %vm6284_vm3, %v5545_v8  ;;  %v5852_v17 = vunpack.i.h.bf16 %v5850_v14  ;;  %v5851_v18 = vunpack.i.l.bf16 %v5850_v14 }
 0x6cf   :  { %5550 = vmatpush3.bf16.xpose.msk.msra.mxu1 %vm6284_vm3, %v5545_v8 }
 0x6d0   :  { %v5551_v15 = vpack.c.bf16 %v5847_v9, %v5846_v10  ;;  %v5565_v20 = vpack.c.bf16 %v5852_v17, %v5851_v18 }
 0x6d1   :  { %v5855_v21 = vpop.permute.xlu1 %5854  ;;  %v1454_v25 = vpop.permute.xlu0 %1453 }
 0x6d2   :  { %5553 = vmatprep.subr.msk.bf16.mxu1 %vm6284_vm3, %v5551_v15  ;;  %v5857_v22 = vunpack.i.h.bf16 %v5855_v21  ;;  %v5856_v23 = vunpack.i.l.bf16 %v5855_v21 }
 0x6d4   :  { %v5571_v24 = vpack.c.bf16 %v5857_v22, %v5856_v23 }
 0x6d5   :  { %v1456_v27 = vpop.permute.xlu1 %1455  ;;  %v1458_v28 = vpop.permute.xlu0 %1457 }
 0x6d7   :  { %5556 = vmatpush3.bf16.xpose.msk.msra.mxu1 %vm6284_vm3, %v5551_v15 }
 0x6d8   :  { %5567 = vmatprep.subr.msk.bf16.mxu1 %vm6284_vm3, %v5565_v20 }
 0x6d9   :  { %v1460_v29 = vpop.permute.xlu1 %1459 }
 0x6de   :  { %5154 = vmatmul.mubr.msk.f32.vlgmr.msra.gmra.mrb[16].mxu1 %vm7512_vm2, %v5141_v13 }
 0x6df   :  { %5156 = vmatprep.mubr.msk.f32.mxu1 %vm7512_vm2, %v1174_v48  ;;  %5570 = vmatpush3.bf16.xpose.msk.msra.mxu1 %vm6284_vm3, %v5565_v20  ;;  %v6610_v48 = vld [vmem:[%s7494_s1 + $0x28] sm:$0xff] }
 0x6e0   :  { %5573 = vmatprep.subr.msk.bf16.mxu1 %vm6284_vm3, %v5571_v24 }
 0x6e2   :  { %5157 = vmatmul.mubr.msk.f32.gmra.mrb[18].mxu1 %vm7512_vm2, %v5144_v53 }
 0x6e3   :  { %5181 = vmatprep.mubr.msk.f32.mxu1 %vm7512_vm2, %v1454_v25 }
 0x6e7   :  { %5576 = vmatpush3.bf16.xpose.msk.msra.mxu1 %vm6284_vm3, %v5571_v24 }
 0x6ee   :  { %5182 = vmatmul.mubr.msk.f32.vlgmr.msra.gmra.mrb[20].mxu1 %vm7512_vm2, %v1456_v27 }
 0x6ef   :  { %5184 = vmatprep.mubr.msk.f32.mxu1 %vm7512_vm2, %v1458_v28 }
 0x6f2   :  { %5185 = vmatmul.mubr.msk.f32.gmra.mrb[22].mxu1 %vm7512_vm2, %v1460_v29  ;;  %vm7515_vm2 = vcmp.gt.f32.partialorder %v6661_v3, 0.5 }
 0x70f   :  { %v993_v31 = vpop.xlane.xlu0 %992 }
 0x710   :  { %vm994_vm8 = vcmp.ge.f32.partialorder %v6411_v5, %v993_v31 }
 0x711   :  { %vm995_vm11 = vmand %vm7505_vm9, %vm994_vm8 }
 0x712   :  { %v996_v32 = vsel %vm995_vm11, %v6578_v30, 32.0 }
 0x713   :  { %v1022_v33 = vpop.xlane.xlu0 %1021  ;;  %v997_v34 = vsel %vm311_vm6, %v996_v32, inf }
 0x714   :  { %vm1023_vm13 = vcmp.ge.f32.partialorder %v6411_v5, %v1022_v33  ;;  %998 = vmin.xlane.f32.xlu1 %v997_v34 }
 0x715   :  { %vm1024_vm14 = vmand %vm6525_vm12, %vm1023_vm13 }
 0x716   :  { %v1025_v35 = vsel %vm1024_vm14, %v6578_v30, 32.0 }
 0x717   :  { %v1037_v37 = vpop.xlane.xlu0 %1036  ;;  %v1026_v38 = vsel %vm311_vm6, %v1025_v35, inf }
 0x718   :  { %vm1038_vm15 = vcmp.ge.f32.partialorder %v6411_v5, %v1037_v37  ;;  %1027 = vmin.xlane.f32.xlu1 %v1026_v38  ;;  %v1007_v39 = vpop.xlane.xlu1 %1006 }
 0x719   :  { %vm1039_vm8 = vmand %vm6537_vm7, %vm1038_vm15  ;;  %vm1008_vm11 = vcmp.ge.f32.partialorder %v6411_v5, %v1007_v39  ;;  %v6605_v5 = vld [vmem:[%s7494_s1 + $0x48] sm:$0xff]  ;;  %s4513_s1 = sshll.u32 %s6148_s23, 4  ;;  %s4514_s1 = int_to_ptr.vmem [resolvable:$true] %s4513_s1 }
 0x71a   :  { %vm1009_vm9 = vmand %vm6541_vm10, %vm1008_vm11  ;;  %v1040_v47 = vsel %vm1039_vm8, %v6578_v30, 32.0  ;;  %vm7508_vm8 = vcmp.gt.f32.partialorder %v6605_v5, 0.5  ;;  %p6123_p1 = scmp.lt.s32.totalorder %s4514_s1, %s4514_s1 }
 0x71b   :  { %v1010_v43 = vsel %vm1009_vm9, %v6578_v30, 32.0  ;;  %v1041_v49 = vsel %vm311_vm6, %v1040_v47, inf }
 0x71c   :  { %v1011_v46 = vsel %vm311_vm6, %v1010_v43, inf }
 0x71d   :  { %1012 = vmin.xlane.f32.xlu0 %v1011_v46 }
 0x721   :  { %1042 = vmin.xlane.f32.xlu0 %v1041_v49 }
 0x7a1   :  { %v999_v13 = vpop.xlane.xlu1 %998 }
 0x7a2   :  { %vm1000_vm13 = vcmp.eq.f32.partialorder %v6578_v30, %v999_v13 }
 0x7a5   :  { %v1028_v53 = vpop.xlane.xlu1 %1027 }
 0x7a6   :  { %vm1029_vm15 = vcmp.eq.f32.partialorder %v6578_v30, %v1028_v53 }
 0x7aa   :  { %v1013_v12 = vpop.xlane.xlu0 %1012 }
 0x7ab   :  { %vm1014_vm14 = vcmp.eq.f32.partialorder %v6578_v30, %v1013_v12 }
 0x7ac   :  { %vm1015_vm9 = vmor %vm1000_vm13, %vm1014_vm14  ;;  %vm7509_vm14 = vcmp.gt.f32.partialorder %v6610_v48, 0.5 }
 0x7ad   :  { %vm1030_vm11 = vmor %vm1015_vm9, %vm1029_vm15  ;;  %vm7514_vm15 = vcmp.gt.f32.partialorder %v6622_v16, 0.5 }
 0x7ae   :  { %v1043_v57 = vpop.xlane.xlu0 %1042 }
 0x7af   :  { %vm1044_vm13 = vcmp.eq.f32.partialorder %v6578_v30, %v1043_v57 }
 0x7b0   :  { %vm6631_vm5 = vmor %vm1030_vm11, %vm1044_vm13  ;;  %vm7513_vm13 = vcmp.gt.f32.partialorder %v6629_v58, 0.5 }
 0x7b1   :  { %vm1049_vm9 = vmand %vm7508_vm8, %vm6631_vm5  ;;  %v5155_v63 = vpop.f32.mrb[16].mxu1 }
 0x7b2   :  { %vm6653_vm11 = vmor %vm7509_vm14, %vm1049_vm9  ;;  %v1277_v2 = vpop.f32.mrb[17].mxu1  ;;  %vm53_vm9 = vcmp.gt.f32.partialorder %v6639_v50, 0.5 }
 0x7b3   :  { %v1297_v6 = vsel %vm6653_vm11, -3.4028235e+38, %v5155_v63  ;;  %vm1048_vm8 = vmand %vm7511_vm4, %vm6631_vm5 }
 0x7b4   :  { %vm6672_vm14 = vmor %vm7514_vm15, %vm1048_vm8  ;;  %v1303_v19 = vsel %vm311_vm6, %v1297_v6, -inf }
 0x7b5   :  { %v1296_v9 = vsel %vm6672_vm14, -3.4028235e+38, %v1277_v2  ;;  %1304 = vmax.xlane.f32.xlu0 %v1303_v19  ;;  %vm1051_vm4 = vmand %vm7513_vm13, %vm6631_vm5  ;;  %v5158_v10 = vpop.f32.mrb[18].mxu1 }
 0x7b6   :  { %v1300_v14 = vsel %vm311_vm6, %v1296_v9, -inf  ;;  %vm6688_vm8 = vmor %vm53_vm9, %vm1051_vm4  ;;  %v1287_v17 = vpop.f32.mrb[19].mxu1  ;;  %vm7537_vm4 = vcmask 64512  }
 0x7b7   :  { %1301 = vmax.xlane.f32.xlu1 %v1300_v14  ;;  %v1299_v18 = vsel %vm6688_vm8, -3.4028235e+38, %v5158_v10  ;;  %vm1050_vm13 = vmand %vm7516_vm0, %vm6631_vm5 }
 0x7b8   :  { %vm6700_vm15 = vmor %vm7515_vm2, %vm1050_vm13  ;;  %v1309_v21 = vsel %vm311_vm6, %v1299_v18, -inf }
 0x7b9   :  { %v1298_v22 = vsel %vm6700_vm15, -3.4028235e+38, %v1287_v17  ;;  %1310 = vmax.xlane.f32.xlu0 %v1309_v21  ;;  %vm7538_vm5 = vmmov %vm7537_vm4 }
 0x7ba   :  { %v1306_v23 = vsel %vm311_vm6, %v1298_v22, -inf  ;;  %vm7542_vm13 = vmmov %vm7537_vm4 }
 0x7bb   :  { %1307 = vmax.xlane.f32.xlu1 %v1306_v23  ;;  %vm7544_vm2 = vmmov %vm7537_vm4 }
 0x7c1   :  { %v5183_v24 = vpop.f32.mrb[20].mxu1 }
 0x7c2   :  { %v1571_v25 = vsel %vm6653_vm11, -3.4028235e+38, %v5183_v24  ;;  %v1551_v27 = vpop.f32.mrb[21].mxu1  ;;  %vm7541_vm11 = vmmov %vm7537_vm4 }
 0x7c3   :  { %v1570_v28 = vsel %vm6672_vm14, -3.4028235e+38, %v1551_v27  ;;  %v1577_v29 = vsel %vm311_vm6, %v1571_v25, -inf  ;;  %vm7539_vm14 = vmmov %vm7537_vm4 }
 0x7c4   :  { %1578 = vmax.xlane.f32.xlu0 %v1577_v29  ;;  %v1574_v31 = vsel %vm311_vm6, %v1570_v28, -inf }
 0x7c5   :  { %v5186_v32 = vpop.f32.mrb[22].mxu1  ;;  %1575 = vmax.xlane.f32.xlu1 %v1574_v31 }
 0x7c6   :  { %v1573_v33 = vsel %vm6688_vm8, -3.4028235e+38, %v5186_v32  ;;  %v1561_v34 = vpop.f32.mrb[23].mxu1  ;;  %vm7543_vm8 = vmmov %vm7537_vm4 }
 0x7c7   :  { %v6718_v35 = vsel %vm6700_vm15, -3.4028235e+38, %v1561_v34  ;;  %v1583_v37 = vsel %vm311_vm6, %v1573_v33, -inf  ;;  %vm7540_vm15 = vmmov %vm7537_vm4 }
 0x7c8   :  { %1584 = vmax.xlane.f32.xlu0 %v1583_v37  ;;  %v1580_v38 = vsel %vm311_vm6, %v6718_v35, -inf }
 0x7c9   :  { %1581 = vmax.xlane.f32.xlu1 %v1580_v38 }
 0x7da   :  { %5859 = vrot.lane.b32.xlu1 %v6501_v52, %s6145_s18 }
 0x842   :  { %v1305_v39 = vpop.xlane.xlu0 %1304 }
 0x843   :  { %v1313_v43 = vsub.f32 %v1297_v6, %v1305_v39 }
 0x844   :  { %v1302_v46 = vpop.xlane.xlu1 %1301 }
 0x845   :  { %v1318_v47 = vmul.f32 1.442695, %v1313_v43  ;;  %v1312_v49 = vsub.f32 %v1296_v9, %v1302_v46 }
 0x846   :  { %v1311_v13 = vpop.xlane.xlu0 %1310 }
 0x847   :  { %5990 = vpow2.f32 %v1318_v47  ;;  %v1316_v12 = vmul.f32 1.442695, %v1312_v49  ;;  %v1315_v53 = vsub.f32 %v1299_v18, %v1311_v13 }
 0x848   :  { %v1308_v57 = vpop.xlane.xlu1 %1307 }
 0x849   :  { %5992 = vpow2.f32 %v1316_v12  ;;  %v1322_v62 = vmul.f32 1.442695, %v1315_v53  ;;  %v1314_v63 = vsub.f32 %v1298_v22, %v1308_v57 }
 0x84b   :  { %5994 = vpow2.f32 %v1322_v62  ;;  %v1320_v1 = vmul.f32 1.442695, %v1314_v63 }
 0x84d   :  { %5996 = vpow2.f32 %v1320_v1 }
 0x851   :  { %v6725_v2 = vpop.eup %5990  ;;  %v1579_v8 = vpop.xlane.xlu0 %1578 }
 0x852   :  { %v1587_v19 = vsub.f32 %v1571_v25, %v1579_v8  ;;  %v1576_v10 = vpop.xlane.xlu1 %1575  ;;  %v1327_v6 = vsel %vm311_vm6, %v6725_v2, 0.0 }
 0x853   :  { %v5993_v9 = vpop.eup %5992  ;;  %v1586_v14 = vsub.f32 %v1570_v28, %v1576_v10  ;;  %1328 = vadd.xlane.f32.xlu0 %v1327_v6 }
 0x854   :  { %v1592_v15 = vmul.f32 1.442695, %v1587_v19  ;;  %v1324_v17 = vsel %vm311_vm6, %v5993_v9, 0.0 }
 0x855   :  { %v6730_v18 = vpop.eup %5994  ;;  %v1590_v20 = vmul.f32 1.442695, %v1586_v14  ;;  %1325 = vadd.xlane.f32.xlu1 %v1324_v17  ;;  %v1585_v21 = vpop.xlane.xlu0 %1584 }
 0x856   :  { %5998 = vpow2.f32 %v1592_v15  ;;  %v1589_v22 = vsub.f32 %v1573_v33, %v1585_v21  ;;  %v1582_v23 = vpop.xlane.xlu1 %1581  ;;  %v1333_v24 = vsel %vm311_vm6, %v6730_v18, 0.0 }
 0x857   :  { %v5997_v25 = vpop.eup %5996  ;;  %6000 = vpow2.f32 %v1590_v20  ;;  %1334 = vadd.xlane.f32.xlu0 %v1333_v24  ;;  %v1588_v47 = vsub.f32 %v6718_v35, %v1582_v23 }
 0x858   :  { %v1596_v27 = vmul.f32 1.442695, %v1589_v22  ;;  %v1330_v28 = vsel %vm311_vm6, %v5997_v25, 0.0 }
 0x859   :  { %1331 = vadd.xlane.f32.xlu1 %v1330_v28  ;;  %v1594_v49 = vmul.f32 1.442695, %v1588_v47 }
 0x85a   :  { %6002 = vpow2.f32 %v1596_v27  ;;  %v5860_v29 = vpop.permute.xlu1 %5859 }
 0x85b   :  { %v5862_v31 = vunpack.i.h.bf16 %v5860_v29  ;;  %v5861_v32 = vunpack.i.l.bf16 %v5860_v29  ;;  %6004 = vpow2.f32 %v1594_v49 }
 0x85d   :  { %v5557_v34 = vpack.c.bf16 %v5862_v31, %v5861_v32 }
 0x85f   :  { %5558 = vmatprep.subr.bf16.mxu0 %v5557_v34 }
 0x860   :  { %v6735_v37 = vpop.eup %5998  ;;  %5560 = vmatpush3.bf16.msra.mxu0 %v5557_v34 }
 0x861   :  { %v6001_v33 = vpop.eup %6000  ;;  %v1601_v38 = vsel %vm311_vm6, %v6735_v37, 0.0 }
 0x862   :  { %1602 = vadd.xlane.f32.xlu0 %v1601_v38  ;;  %v1598_v39 = vsel %vm311_vm6, %v6001_v33, 0.0 }
 0x863   :  { %1599 = vadd.xlane.f32.xlu1 %v1598_v39 }
 0x864   :  { %v6740_v43 = vpop.eup %6002 }
 0x865   :  { %v1607_v46 = vsel %vm311_vm6, %v6740_v43, 0.0  ;;  %v6005_v13 = vpop.eup %6004 }
 0x866   :  { %1608 = vadd.xlane.f32.xlu0 %v1607_v46  ;;  %v1604_v12 = vsel %vm311_vm6, %v6005_v13, 0.0 }
 0x874   :  { %5869 = vrot.lane.b32.xlu1 %v6501_v52, %s6146_s19 }
 0x87c   :  { %5864 = vrot.lane.b32.xlu0 %v6505_v54, %s6145_s18 }
 0x898   :  { %1605 = vadd.xlane.f32.xlu1 %v1604_v12  ;;  %v4587_v12 = vld [vmem:[%s7496_s3 + $0x30] sm:$0xff] }
 0x8a9   :  { %5874 = vrot.lane.b32.xlu1 %v6505_v54, %s6146_s19 }
 0x8e0   :  { %v1329_v57 = vpop.xlane.xlu0 %1328 }
 0x8e2   :  { %v1326_v53 = vpop.xlane.xlu1 %1325 }
 0x8e3   :  { %6006 = vrcp.f32 %v1326_v53  ;;  %v4588_v53 = vld [vmem:[%s7496_s3 + $0x38] sm:$0xff] }
 0x8e4   :  { %v1335_v62 = vpop.xlane.xlu0 %1334  ;;  %6008 = vrcp.f32 %v1329_v57  ;;  %v5585_v57 = vpack.c.bf16 %v4588_v53, %v4587_v12  ;;  %v4635_v12 = vld [vmem:[%s7499_s6] ss:$0 sm:$0xff] }
 0x8e6   :  { %v1332_v63 = vpop.xlane.xlu1 %1331 }
 0x8e7   :  { %6010 = vrcp.f32 %v1332_v63  ;;  %v1942_v63 = vld [vmem:[%s7498_s5 + $0x8] sm:$0xff] }
 0x8e8   :  { %6012 = vrcp.f32 %v1335_v62  ;;  %v1941_v62 = vld [vmem:[%s7498_s5] sm:$0xff] }
 0x8ed   :  { %v6007_v52 = vpop.eup %6006 }
 0x8ee   :  { %v1340_v1 = vmul.f32 %v6007_v52, %v5993_v9  ;;  %v6009_v21 = vpop.eup %6008  ;;  %v1943_v52 = vld [vmem:[%s7498_s5 + $0x10] sm:$0xff] }
 0x8ef   :  { %v1603_v8 = vpop.xlane.xlu0 %1602  ;;  %v1341_v9 = vmul.f32 %v6009_v21, %v6725_v2 }
 0x8f0   :  { %5167 = vmatprep.mubr.msk.f32.mxu0 %vm311_vm6, %v1340_v1  ;;  %v1600_v35 = vpop.xlane.xlu1 %1599  ;;  %v5597_v1 = vpack.c.bf16 %v1942_v63, %v1941_v62 }
 0x8f1   :  { %6014 = vrcp.f32 %v1600_v35  ;;  %v6011_v22 = vpop.eup %6010 }
 0x8f2   :  { %v6013_v24 = vpop.eup %6012  ;;  %v1342_v27 = vmul.f32 %v6011_v22, %v5997_v25  ;;  %6016 = vrcp.f32 %v1603_v8  ;;  %v1944_v8 = vld [vmem:[%s7498_s5 + $0x18] sm:$0xff]  ;;  %5599 = vmatprep.subr.msk.bf16.mxu1 %vm6212_vm1, %v5597_v1 }
 0x8f3   :  { %v1609_v19 = vpop.xlane.xlu0 %1608  ;;  %v1343_v29 = vmul.f32 %v6013_v24, %v6730_v18  ;;  %v5603_v35 = vpack.c.bf16 %v1944_v8, %v1943_v52  ;;  %5602 = vmatpush3.bf16.xpose.msk.msra.mxu1 %vm6212_vm1, %v5597_v1 }
 0x8f4   :  { %v5870_v10 = vpop.permute.xlu1 %5869 }
 0x8f5   :  { %v5872_v14 = vunpack.i.h.bf16 %v5870_v10  ;;  %v5871_v54 = vunpack.i.l.bf16 %v5870_v10  ;;  %5605 = vmatprep.subr.msk.bf16.mxu1 %vm6212_vm1, %v5603_v35 }
 0x8f7   :  { %v5865_v6 = vpop.permute.xlu0 %5864  ;;  %v5577_v23 = vpack.c.bf16 %v5872_v14, %v5871_v54 }
 0x8f8   :  { %v5867_v15 = vunpack.i.h.bf16 %v5865_v6  ;;  %v5866_v17 = vunpack.i.l.bf16 %v5865_v6 }
 0x8fa   :  { %v5561_v20 = vpack.c.bf16 %v5867_v15, %v5866_v17 }
 0x8fb   :  { %v6015_v28 = vpop.eup %6014  ;;  %5608 = vmatpush3.bf16.xpose.msk.msra.mxu1 %vm6212_vm1, %v5603_v35 }
 0x8fc   :  { %5562 = vmatprep.subr.bf16.mxu0 %v5561_v20  ;;  %v1614_v31 = vmul.f32 %v6015_v28, %v6001_v33  ;;  %v6017_v39 = vpop.eup %6016 }
 0x8fd   :  { %5564 = vmatpush3.bf16.msra.mxu0 %v5561_v20  ;;  %v1615_v47 = vmul.f32 %v6017_v39, %v6735_v37  ;;  %v4585_v37 = vld [vmem:[%s7496_s3 + $0x20] sm:$0xff] }
 0x8fe   :  { %5578 = vmatprep.subr.bf16.mxu0 %v5577_v23 }
 0x900   :  { %5168 = vmatmul.mubr.msk.f32.vlgmr.msra.gmra.mrb[12].mxu0 %vm311_vm6, %v1341_v9 }
 0x901   :  { %5170 = vmatprep.mubr.msk.f32.mxu0 %vm311_vm6, %v1342_v27  ;;  %5580 = vmatpush3.bf16.msra.mxu0 %v5577_v23 }
 0x904   :  { %5171 = vmatmul.mubr.msk.f32.gmra.mrb[14].mxu0 %vm311_vm6, %v1343_v29 }
 0x905   :  { %5195 = vmatprep.mubr.msk.f32.mxu0 %vm311_vm6, %v1614_v31 }
 0x925   :  { %v1606_v32 = vpop.xlane.xlu1 %1605 }
 0x926   :  { %6018 = vrcp.f32 %v1606_v32 }
 0x927   :  { %6020 = vrcp.f32 %v1609_v19 }
 0x929   :  { %v5875_v2 = vpop.permute.xlu1 %5874 }
 0x92a   :  { %v5877_v34 = vunpack.i.h.bf16 %v5875_v2  ;;  %v5876_v25 = vunpack.i.l.bf16 %v5875_v2 }
 0x92c   :  { %v5581_v38 = vpack.c.bf16 %v5877_v34, %v5876_v25  ;;  %v4651_v34 = vld [vmem:[%s7495_s2 + $0x60] sm:$0xff]  ;;  %v4652_v25 = vld [vmem:[%s7495_s2 + $0x68] sm:$0xff] }
 0x92d   :  { %v5615_v39 = vpack.c.bf16 %v4652_v25, %v4651_v34 }
 0x92e   :  { %5582 = vmatprep.subr.bf16.mxu0 %v5581_v38 }
 0x92f   :  { %5584 = vmatpush3.bf16.msra.mxu0 %v5581_v38  ;;  %v4653_v38 = vld [vmem:[%s7495_s2 + $0x70] sm:$0xff]  ;;  %5617 = vmatprep.subr.msk.bf16.mxu1 %vm6212_vm1, %v5615_v39 }
 0x930   :  { %v6019_v46 = vpop.eup %6018  ;;  %5587 = vmatprep.subr.msk.bf16.mxu0 %vm6284_vm3, %v5585_v57 }
 0x931   :  { %v6021_v18 = vpop.eup %6020  ;;  %v1616_v33 = vmul.f32 %v6019_v46, %v6005_v13  ;;  %v4654_v46 = vld [vmem:[%s7495_s2 + $0x78] sm:$0xff] }
 0x932   :  { %5196 = vmatmul.mubr.msk.f32.vlgmr.msra.gmra.mrb[16].mxu0 %vm311_vm6, %v1615_v47  ;;  %v1617_v49 = vmul.f32 %v6021_v18, %v6740_v43  ;;  %v4586_v43 = vld [vmem:[%s7496_s3 + $0x28] sm:$0xff]  ;;  %v5621_v47 = vpack.c.bf16 %v4654_v46, %v4653_v38  ;;  %v4655_v18 = vld [vmem:[%s7495_s2 + $0x80] sm:$0xff] }
 0x933   :  { %5198 = vmatprep.mubr.msk.f32.mxu0 %vm311_vm6, %v1616_v33  ;;  %v5591_v13 = vpack.c.bf16 %v4586_v43, %v4585_v37  ;;  %v4656_v33 = vld [vmem:[%s7495_s2 + $0x88] sm:$0xff] }
 0x936   :  { %5199 = vmatmul.mubr.msk.f32.gmra.mrb[18].mxu0 %vm311_vm6, %v1617_v49  ;;  %v5627_v49 = vpack.c.bf16 %v4656_v33, %v4655_v18 }
 0x938   :  { %5590 = vmatpush3.bf16.xpose.msk.msra.mxu0 %vm6284_vm3, %v5585_v57 }
 0x939   :  { %5593 = vmatprep.subr.msk.bf16.mxu0 %vm6284_vm3, %v5591_v13 }
 0x9d3   :  { %v5169_v19 = vpop.f32.mrb[12].mxu0 }
 0x9d4   :  { %v1434_v10 = vpop.f32.mrb[13].mxu0 }
 0x9d7   :  { %v5172_v6 = vpop.f32.mrb[14].mxu0 }
 0x9d8   :  { %v1444_v14 = vpop.f32.mrb[15].mxu0 }
 0xa05   :  { %v5197_v54 = vpop.f32.mrb[16].mxu0 }
 0xa06   :  { %v1708_v15 = vpop.f32.mrb[17].mxu0 }
 0xa07   :  { %5205 = vmatprep.mubr.msk.f32.mxu0 %vm7537_vm4, %v1708_v15 }
 0xa08   :  { %5206 = vmatmul.mubr.msk.f32.vlgmr.msra.gmra.mrb[20].mxu0 %vm7538_vm5, %v5197_v54 }
 0xa09   :  { %v5200_v17 = vpop.f32.mrb[18].mxu0  ;;  %5596 = vmatpush3.bf16.xpose.msk.msra.mxu0 %vm6284_vm3, %v5591_v13 }
 0xa0a   :  { %v1718_v20 = vpop.f32.mrb[19].mxu0 }
 0xa0b   :  { %5208 = vmatprep.mubr.msk.f32.mxu0 %vm7539_vm14, %v1718_v20 }
 0xa0c   :  { %5209 = vmatmul.mubr.msk.f32.gmra.mrb[22].mxu0 %vm7540_vm15, %v5200_v17  ;;  %vm6844_vm15 = vmpackc.low %vm311_vm6, %vm311_vm6 }
 0xa0d   :  { %5215 = vmatprep.mubr.msk.f32.mxu0 %vm7541_vm11, %v1434_v10 }
 0xa10   :  { %5216 = vmatmul.mubr.msk.f32.vlgmr.msra.gmra.mrb[20].mxu0 %vm7542_vm13, %v5169_v19 }
 0xa11   :  { %5218 = vmatprep.mubr.msk.f32.mxu0 %vm7543_vm8, %v1444_v14 }
 0xa14   :  { %5219 = vmatmul.mubr.msk.f32.gmra.mrb[22].mxu0 %vm7544_vm2, %v5172_v6  ;;  %vm7545_vm2 = vcmask 130048  }
 0xa15   :  { %vm7546_vm4 = vmmov %vm7545_vm2 }
 0xa16   :  { %vm7547_vm5 = vmmov %vm7545_vm2 }
 0xa17   :  { %vm7548_vm14 = vmmov %vm7545_vm2 }
 0xae3   :  { %v5217_v21 = vpop.f32.mrb[20].mxu0 }
 0xae4   :  { %v1934_v22 = vadd.f32 %v5217_v21, %v6482_v44  ;;  %v1914_v23 = vpop.f32.mrb[21].mxu0 }
 0xae5   :  { %v1933_v9 = vadd.f32 %v1914_v23, %v6479_v40 }
 0xae6   :  { %v6818_v28 = vadd.f32 %v6474_v36, %v1934_v22 }
 0xae7   :  { %v6815_v24 = vadd.f32 %v6474_v36, %v1933_v9  ;;  %v5220_v27 = vpop.f32.mrb[22].mxu0 }
 0xae8   :  { %v1936_v29 = vadd.f32 %v5220_v27, %v6494_v11  ;;  %v1924_v31 = vpop.f32.mrb[23].mxu0  ;;  %v2170_v11 = vld [vmem:[%s7500_s7 + $0x8] sm:$0xff] }
 0xae9   :  { %v1935_v32 = vadd.f32 %v1924_v31, %v6491_v7  ;;  %5229 = vmatprep.mubr.msk.f32.mxu1 %vm7545_vm2, %v6815_v24  ;;  %v2169_v7 = vld [vmem:[%s7500_s7] sm:$0xff] }
 0xaea   :  { %5230 = vmatmul.mubr.msk.f32.vlgmr.msra.gmra.mrb[24].mxu1 %vm7546_vm4, %v6818_v28  ;;  %v6830_v44 = vadd.f32 %v6474_v36, %v1936_v29  ;;  %v5609_v2 = vpack.c.bf16 %v2170_v11, %v2169_v7 }
 0xaeb   :  { %v6827_v40 = vadd.f32 %v6474_v36, %v1935_v32  ;;  %5620 = vmatpush3.bf16.xpose.msk.msra.mxu1 %vm6212_vm1, %v5615_v39 }
 0xaec   :  { %5611 = vmatprep.subr.msk.bf16.mxu0 %vm6844_vm15, %v5609_v2  ;;  %5623 = vmatprep.subr.msk.bf16.mxu1 %vm6212_vm1, %v5621_v47 }
 0xaed   :  { %5232 = vmatprep.mubr.msk.f32.mxu1 %vm7547_vm5, %v6827_v40  ;;  %5614 = vmatpush3.bf16.xpose.msk.msra.mxu0 %vm6844_vm15, %v5609_v2  ;;  %vm7551_vm5 = vmmov %vm7546_vm4 }
 0xaee   :  { %5233 = vmatmul.mubr.msk.f32.gmra.mrb[26].mxu1 %vm7548_vm14, %v6830_v44  ;;  %vm7552_vm14 = vmmov %vm7546_vm4 }
 0xaf3   :  { %5626 = vmatpush3.bf16.xpose.msk.msra.mxu1 %vm6212_vm1, %v5621_v47 }
 0xaf4   :  { %5629 = vmatprep.subr.msk.bf16.mxu1 %vm6212_vm1, %v5627_v49 }
 0xafb   :  { %5632 = vmatpush3.bf16.xpose.msk.msra.mxu1 %vm6212_vm1, %v5627_v49 }
 0xbbd   :  { %v5231_v53 = vpop.f32.mrb[24].mxu1 }
 0xbbe   :  { %v6885_v57 = vadd.f32 %v5231_v53, %v4635_v12  ;;  %v2042_v37 = vpop.f32.mrb[25].mxu1 }
 0xbbf   :  { %v6887_v43 = vadd.f32 %v4635_v12, %v2042_v37 }
 0xbc0   :  { %v6890_v13 = vmul.f32 0.70710677, %v6885_v57 }
 0xbc1   :  { %v6893_v62 = vmul.f32 0.70710677, %v6887_v43  ;;  %v5234_v63 = vpop.f32.mrb[26].mxu1 }
 0xbc2   :  { %v2078_v52 = vand.u32 2147483647, %v6890_v13  ;;  %v6896_v1 = vadd.f32 %v5234_v63, %v4635_v12  ;;  %v2052_v8 = vpop.f32.mrb[27].mxu1  ;;  %vm2070_vm11 = vcmp.lt.f32.partialorder %v6890_v13, 0.0 }
 0xbc3   :  { %v2077_v35 = vand.u32 2147483647, %v6893_v62  ;;  %v6899_v19 = vadd.f32 %v4635_v12, %v2052_v8  ;;  %vm2069_vm13 = vcmp.lt.f32.partialorder %v6893_v62, 0.0 }
 0xbc4   :  { %v2082_v10 = vmul.f32 0.3275911, %v2078_v52  ;;  %v6902_v14 = vmul.f32 0.70710677, %v6896_v1  ;;  %v2134_v27 = vsub.f32 0.0, %v2078_v52 }
 0xbc5   :  { %v2081_v6 = vmul.f32 0.3275911, %v2077_v35  ;;  %v6905_v15 = vmul.f32 0.70710677, %v6899_v19  ;;  %v2133_v31 = vsub.f32 0.0, %v2077_v35 }
 0xbc6   :  { %v2086_v54 = vadd.f32 1.0, %v2082_v10  ;;  %v2080_v20 = vand.u32 2147483647, %v6902_v14  ;;  %v2138_v7 = vmul.f32 %v2134_v27, %v2078_v52  ;;  %vm2072_vm8 = vcmp.lt.f32.partialorder %v6902_v14, 0.0 }
 0xbc7   :  { %v2085_v17 = vadd.f32 1.0, %v2081_v6  ;;  %v2079_v22 = vand.u32 2147483647, %v6905_v15  ;;  %v2137_v34 = vmul.f32 %v2133_v31, %v2077_v35  ;;  %vm2071_vm2 = vcmp.lt.f32.partialorder %v6905_v15, 0.0 }
 0xbc8   :  { %6022 = vrcp.f32 %v2086_v54  ;;  %v2084_v21 = vmul.f32 0.3275911, %v2080_v20  ;;  %v2136_v25 = vsub.f32 0.0, %v2080_v20  ;;  %v2143_v46 = vmul.f32 1.442695, %v2138_v7 }
 0xbc9   :  { %6024 = vrcp.f32 %v2085_v17  ;;  %v2083_v9 = vmul.f32 0.3275911, %v2079_v22  ;;  %v2135_v18 = vsub.f32 0.0, %v2079_v22  ;;  %v2141_v12 = vmul.f32 1.442695, %v2137_v34 }
 0xbca   :  { %v2088_v23 = vadd.f32 1.0, %v2084_v21  ;;  %v2140_v53 = vmul.f32 %v2136_v25, %v2080_v20 }
 0xbcb   :  { %v2087_v29 = vadd.f32 1.0, %v2083_v9  ;;  %v2139_v54 = vmul.f32 %v2135_v18, %v2079_v22 }
 0xbcc   :  { %6026 = vrcp.f32 %v2088_v23  ;;  %v2147_v35 = vmul.f32 1.442695, %v2140_v53 }
 0xbcd   :  { %6028 = vrcp.f32 %v2087_v29 }
 0xbce   :  { %6030 = vpow2.f32 %v2143_v46 }
 0xbcf   :  { %6032 = vpow2.f32 %v2141_v12 }
 0xbd0   :  { %6034 = vpow2.f32 %v2147_v35 }
 0xbd2   :  { %v6023_v32 = vpop.eup %6022 }
 0xbd3   :  { %v6025_v11 = vpop.eup %6024  ;;  %v2098_v2 = vmul.f32 1.0614054, %v6023_v32 }
 0xbd4   :  { %v2097_v38 = vmul.f32 1.0614054, %v6025_v11 }
 0xbd5   :  { %v2102_v39 = vadd.f32 -1.4531521, %v2098_v2  ;;  %v2145_v2 = vmul.f32 1.442695, %v2139_v54 }
 0xbd6   :  { %v2101_v47 = vadd.f32 -1.4531521, %v2097_v38  ;;  %v6027_v33 = vpop.eup %6026 }
 0xbd7   :  { %v2106_v49 = vmul.f32 %v6023_v32, %v2102_v39  ;;  %v2100_v63 = vmul.f32 1.0614054, %v6027_v33  ;;  %v6029_v10 = vpop.eup %6028  ;;  %6036 = vpow2.f32 %v2145_v2 }
 0xbd8   :  { %v2105_v37 = vmul.f32 %v6025_v11, %v2101_v47  ;;  %v2099_v21 = vmul.f32 1.0614054, %v6029_v10  ;;  %v6031_v12 = vpop.eup %6030 }
 0xbd9   :  { %v2110_v8 = vadd.f32 1.4214138, %v2106_v49  ;;  %v2104_v52 = vadd.f32 -1.4531521, %v2100_v63  ;;  %v6033_v63 = vpop.eup %6032 }
 0xbda   :  { %v2109_v6 = vadd.f32 1.4214138, %v2105_v37  ;;  %v2103_v29 = vadd.f32 -1.4531521, %v2099_v21  ;;  %v6147_v21 = vmov 1.0  }
 0xbdb   :  { %v2114_v17 = vmul.f32 %v6023_v32, %v2110_v8  ;;  %v2108_v9 = vmul.f32 %v6027_v33, %v2104_v52  ;;  %v2075_v14 = vsel %vm2071_vm2, -1.0, %v6147_v21 }
 0xbdc   :  { %v2113_v23 = vmul.f32 %v6025_v11, %v2109_v6  ;;  %v2107_v34 = vmul.f32 %v6029_v10, %v2103_v29 }
 0xbdd   :  { %v2118_v27 = vadd.f32 -0.28449672, %v2114_v17  ;;  %v2112_v7 = vadd.f32 1.4214138, %v2108_v9 }
 0xbde   :  { %v2117_v31 = vadd.f32 -0.28449672, %v2113_v23  ;;  %v2111_v46 = vadd.f32 1.4214138, %v2107_v34  ;;  %v2074_v23 = vsel %vm2070_vm11, -1.0, %v6147_v21  ;;  %v2061_v34 = vmul.f32 0.5, %v6887_v43  ;;  %vm7553_vm11 = vmmov %vm7546_vm4 }
 0xbdf   :  { %v2122_v20 = vmul.f32 %v6023_v32, %v2118_v27  ;;  %v2116_v38 = vmul.f32 %v6027_v33, %v2112_v7  ;;  %v6035_v27 = vpop.eup %6034 }
 0xbe0   :  { %v2121_v25 = vmul.f32 %v6025_v11, %v2117_v31  ;;  %v2115_v49 = vmul.f32 %v6029_v10, %v2111_v46 }
 0xbe1   :  { %v2126_v39 = vadd.f32 0.2548296, %v2122_v20  ;;  %v2120_v22 = vadd.f32 -0.28449672, %v2116_v38  ;;  %v6037_v20 = vpop.eup %6036 }
 0xbe2   :  { %v2125_v47 = vadd.f32 0.2548296, %v2121_v25  ;;  %v2119_v6 = vadd.f32 -0.28449672, %v2115_v49 }
 0xbe3   :  { %v2130_v18 = vmul.f32 %v6023_v32, %v2126_v39  ;;  %v2124_v37 = vmul.f32 %v6027_v33, %v2120_v22  ;;  %v2062_v39 = vmul.f32 0.5, %v6885_v57 }
 0xbe4   :  { %v2129_v53 = vmul.f32 %v6025_v11, %v2125_v47  ;;  %v2123_v35 = vmul.f32 %v6029_v10, %v2119_v6  ;;  %v2073_v11 = vsel %vm2069_vm13, -1.0, %v6147_v21  ;;  %v4650_v6 = vld [vmem:[%s7501_s8] ss:$0 sm:$0xff]  ;;  %vm7554_vm13 = vcmask 64512  }
 0xbe5   :  { %v2150_v8 = vmul.f32 %v6031_v12, %v2130_v18  ;;  %v2128_v54 = vadd.f32 0.2548296, %v2124_v37  ;;  %v2063_v12 = vmul.f32 0.5, %v6899_v19 }
 0xbe6   :  { %v2149_v52 = vmul.f32 %v6033_v63, %v2129_v53  ;;  %v2127_v31 = vadd.f32 0.2548296, %v2123_v35  ;;  %v2064_v53 = vmul.f32 0.5, %v6896_v1 }
 0xbe7   :  { %v2154_v17 = vsub.f32 1.0, %v2150_v8  ;;  %v2132_v32 = vmul.f32 %v6027_v33, %v2128_v54  ;;  %v2076_v33 = vsel %vm2072_vm8, -1.0, %v6147_v21  ;;  %vm7555_vm8 = vmmov %vm7554_vm13 }
 0xbe8   :  { %v2153_v9 = vsub.f32 1.0, %v2149_v52  ;;  %v2131_v62 = vmul.f32 %v6029_v10, %v2127_v31  ;;  %vm7556_vm2 = vmmov %vm7555_vm8 }
 0xbe9   :  { %v2158_v29 = vmul.f32 %v2154_v17, %v2074_v23  ;;  %v2152_v13 = vmul.f32 %v6035_v27, %v2132_v32 }
 0xbea   :  { %v2157_v7 = vmul.f32 %v2153_v9, %v2073_v11  ;;  %v2151_v46 = vmul.f32 %v6037_v20, %v2131_v62 }
 0xbeb   :  { %v2162_v2 = vadd.f32 1.0, %v2158_v29  ;;  %v2156_v38 = vsub.f32 1.0, %v2152_v13 }
 0xbec   :  { %v2161_v25 = vadd.f32 1.0, %v2157_v7  ;;  %v2155_v49 = vsub.f32 1.0, %v2151_v46 }
 0xbed   :  { %v2160_v22 = vmul.f32 %v2156_v38, %v2076_v33  ;;  %v2166_v18 = vmul.f32 %v2162_v2, %v2062_v39 }
 0xbee   :  { %v2165_v47 = vmul.f32 %v2161_v25, %v2061_v34  ;;  %v2159_v10 = vmul.f32 %v2155_v49, %v2075_v14 }
 0xbef   :  { %v2164_v43 = vadd.f32 1.0, %v2160_v22 }
 0xbf0   :  { %5239 = vmatprep.mubr.msk.f32.mxu0 %vm311_vm6, %v2165_v47  ;;  %v2163_v57 = vadd.f32 1.0, %v2159_v10 }
 0xbf1   :  { %5240 = vmatmul.mubr.msk.f32.vlgmr.msra.gmra.mrb[24].mxu0 %vm311_vm6, %v2166_v18  ;;  %v2168_v15 = vmul.f32 %v2164_v43, %v2064_v53 }
 0xbf2   :  { %v2167_v37 = vmul.f32 %v2163_v57, %v2063_v12 }
 0xbf4   :  { %5242 = vmatprep.mubr.msk.f32.mxu0 %vm311_vm6, %v2167_v37 }
 0xbf5   :  { %5243 = vmatmul.mubr.msk.f32.gmra.mrb[26].mxu0 %vm311_vm6, %v2168_v15 }
 0xcc4   :  { %v5241_v63 = vpop.f32.mrb[24].mxu0 }
 0xcc5   :  { %v2275_v8 = vadd.f32 %v5241_v63, %v6818_v28  ;;  %v2255_v52 = vpop.f32.mrb[25].mxu0 }
 0xcc6   :  { %v2274_v54 = vadd.f32 %v2255_v52, %v6815_v24 }
 0xcc7   :  { %v6932_v17 = vadd.f32 %v4650_v6, %v2275_v8 }
 0xcc8   :  { %v6930_v19 = vadd.f32 %v4650_v6, %v2274_v54  ;;  %v5244_v1 = vpop.f32.mrb[26].mxu0 }
 0xcc9   :  { %v2277_v28 = vadd.f32 %v5244_v1, %v6830_v44  ;;  %v2265_v35 = vpop.f32.mrb[27].mxu0 }
 0xcca   :  { %5257 = vmatprep.mubr.msk.f32.mxu1 %vm7546_vm4, %v6930_v19  ;;  %v2276_v23 = vadd.f32 %v2265_v35, %v6827_v40  ;;  %vm7557_vm4 = vmmov %vm7556_vm2 }
 0xccb   :  { %5258 = vmatmul.mubr.msk.f32.vlgmr.msra.gmra.mrb[28].mxu1 %vm7551_vm5, %v6932_v17  ;;  %v6942_v32 = vadd.f32 %v4650_v6, %v2277_v28  ;;  %vm7558_vm5 = vmmov %vm7556_vm2 }
 0xccc   :  { %v6940_v9 = vadd.f32 %v4650_v6, %v2276_v23 }
 0xcce   :  { %5260 = vmatprep.mubr.msk.f32.mxu1 %vm7552_vm14, %v6940_v9  ;;  %vm7559_vm14 = vmmov %vm7556_vm2 }
 0xccf   :  { %5261 = vmatmul.mubr.msk.f32.gmra.mrb[30].mxu1 %vm7553_vm11, %v6942_v32  ;;  %vm7560_vm11 = vmmov %vm7556_vm2 }
 0xd9e   :  { %v5259_v24 = vpop.f32.mrb[28].mxu1 }
 0xd9f   :  { %v2399_v27 = vpop.f32.mrb[29].mxu1 }
 0xda0   :  { %5271 = vmatprep.mubr.msk.f32.mxu0 %vm7554_vm13, %v2399_v27  ;;  %v6949_v29 = vpack.i.bf16 %v5259_v24, %v2399_v27  ;;  %vm7561_vm13 = vmmov %vm7556_vm2 }
 0xda2   :  { %5879 = vrot.lane.b32.xlu0 %v6949_v29, %s6143_s30  ;;  %v5262_v40 = vpop.f32.mrb[30].mxu1 }
 0xda3   :  { %v2409_v44 = vpop.f32.mrb[31].mxu1 }
 0xda4   :  { %v6955_v11 = vpack.i.bf16 %v5262_v40, %v2409_v44 }
 0xda6   :  { %5889 = vrot.lane.b32.xlu0 %v6949_v29, %s6142_s29  ;;  %5884 = vrot.lane.b32.xlu1 %v6955_v11, %s6143_s30 }
 0xdaa   :  { %2702 = vrot.lane.b32.xlu0 %v2399_v27, %s6144_s0  ;;  %5894 = vrot.lane.b32.xlu1 %v6955_v11, %s6142_s29 }
 0xdae   :  { %2706 = vrot.lane.b32.xlu0 %v2409_v44, %s6144_s0  ;;  %2704 = vrot.lane.b32.xlu1 %v5259_v24, %s6144_s0 }
 0xdb2   :  { %2708 = vrot.lane.b32.xlu1 %v5262_v40, %s6144_s0 }
 0xe14   :  { %v5880_v31 = vpop.permute.xlu0 %5879 }
 0xe15   :  { %v5882_v7 = vunpack.i.h.bf16 %v5880_v31  ;;  %v5881_v13 = vunpack.i.l.bf16 %v5880_v31 }
 0xe17   :  { %v5633_v2 = vpack.c.bf16 %v5882_v7, %v5881_v13 }
 0xe18   :  { %v5890_v62 = vpop.permute.xlu0 %5889  ;;  %v5885_v38 = vpop.permute.xlu1 %5884 }
 0xe19   :  { %v5892_v20 = vunpack.i.h.bf16 %v5890_v62  ;;  %v5891_v34 = vunpack.i.l.bf16 %v5890_v62  ;;  %5635 = vmatprep.subr.msk.bf16.mxu0 %vm6284_vm3, %v5633_v2  ;;  %v5887_v39 = vunpack.i.h.bf16 %v5885_v38  ;;  %v5886_v33 = vunpack.i.l.bf16 %v5885_v38 }
 0xe1a   :  { %5638 = vmatpush3.bf16.xpose.msk.msra.mxu0 %vm6284_vm3, %v5633_v2 }
 0xe1b   :  { %v5653_v25 = vpack.c.bf16 %v5892_v20, %v5891_v34  ;;  %v5639_v47 = vpack.c.bf16 %v5887_v39, %v5886_v33 }
 0xe1c   :  { %v2703_v46 = vpop.permute.xlu0 %2702  ;;  %v5895_v22 = vpop.permute.xlu1 %5894 }
 0xe1d   :  { %5655 = vmatprep.subr.msk.bf16.mxu1 %vm6284_vm3, %v5653_v25  ;;  %5299 = vmatprep.mubr.msk.f32.mxu1 %vm7555_vm8, %v2703_v46  ;;  %v5897_v18 = vunpack.i.h.bf16 %v5895_v22  ;;  %v5896_v49 = vunpack.i.l.bf16 %v5895_v22  ;;  %vm7562_vm8 = vcmp.gt.f32.partialorder %v6314_v41, 0.5 }
 0xe1e   :  { %5658 = vmatpush3.bf16.xpose.msk.msra.mxu1 %vm6284_vm3, %v5653_v25  ;;  %5641 = vmatprep.subr.msk.bf16.mxu0 %vm6284_vm3, %v5639_v47 }
 0xe1f   :  { %v5659_v14 = vpack.c.bf16 %v5897_v18, %v5896_v49 }
 0xe20   :  { %v2705_v10 = vpop.permute.xlu1 %2704  ;;  %v2707_v43 = vpop.permute.xlu0 %2706 }
 0xe21   :  { %5661 = vmatprep.subr.msk.bf16.mxu1 %vm6284_vm3, %v5659_v14 }
 0xe22   :  { %5644 = vmatpush3.bf16.xpose.msk.msra.mxu0 %vm6284_vm3, %v5639_v47 }
 0xe24   :  { %v2709_v12 = vpop.permute.xlu1 %2708 }
 0xe26   :  { %5664 = vmatpush3.bf16.xpose.msk.msra.mxu1 %vm6284_vm3, %v5659_v14 }
 0xe29   :  { %5272 = vmatmul.mubr.msk.f32.vlgmr.msra.gmra.mrb[28].mxu0 %vm7556_vm2, %v5259_v24  ;;  %vm7563_vm2 = vcmp.gt.f32.partialorder %v6319_v42, 0.5 }
 0xe2a   :  { %5274 = vmatprep.mubr.msk.f32.mxu0 %vm7557_vm4, %v2409_v44  ;;  %vm7564_vm4 = vcmp.gt.f32.partialorder %v6326_v45, 0.5 }
 0xe2d   :  { %5275 = vmatmul.mubr.msk.f32.gmra.mrb[30].mxu0 %vm7558_vm5, %v5262_v40  ;;  %5300 = vmatmul.mubr.msk.f32.vlgmr.msra.gmra.mrb[32].mxu1 %vm7559_vm14, %v2705_v10  ;;  %vm7565_vm5 = vmmov %vm7563_vm2  ;;  %vm7566_vm14 = vcmp.gt.f32.partialorder %v6336_v51, 0.5 }
 0xe2e   :  { %5302 = vmatprep.mubr.msk.f32.mxu1 %vm7560_vm11, %v2707_v43  ;;  %vm7567_vm11 = vmmov %vm7564_vm4 }
 0xe31   :  { %5303 = vmatmul.mubr.msk.f32.gmra.mrb[34].mxu1 %vm7561_vm13, %v2709_v12  ;;  %vm7568_vm13 = vmmov %vm7562_vm8 }
 0xefc   :  { %v5273_v57 = vpop.f32.mrb[28].mxu0 }
 0xefd   :  { %v2532_v53 = vsel %vm7562_vm8, -3.4028235e+38, %v5273_v57  ;;  %v2512_v37 = vpop.f32.mrb[29].mxu0  ;;  %vm7569_vm8 = vmmov %vm7566_vm14 }
 0xefe   :  { %v2531_v15 = vsel %vm7563_vm2, -3.4028235e+38, %v2512_v37  ;;  %v2538_v63 = vsel %vm311_vm6, %v2532_v53, -inf  ;;  %vm7570_vm2 = vcmask 64512  }
 0xeff   :  { %2539 = vmax.xlane.f32.xlu1 %v2538_v63  ;;  %v2535_v8 = vsel %vm311_vm6, %v2531_v15, -inf  ;;  %vm7577_vm0 = vmmov %vm7570_vm2 }
 0xf00   :  { %v5301_v6 = vpop.f32.mrb[32].mxu1  ;;  %2536 = vmax.xlane.f32.xlu0 %v2535_v8  ;;  %v5276_v52 = vpop.f32.mrb[30].mxu0 }
 0xf01   :  { %v2522_v54 = vpop.f32.mrb[31].mxu0  ;;  %v2800_v1 = vpop.f32.mrb[33].mxu1  ;;  %v2534_v27 = vsel %vm7566_vm14, -3.4028235e+38, %v5276_v52  ;;  %v2820_v13 = vsel %vm7568_vm13, -3.4028235e+38, %v5301_v6  ;;  %vm7573_vm14 = vmmov %vm7570_vm2 }
 0xf02   :  { %v6996_v28 = vsel %vm7564_vm4, -3.4028235e+38, %v2522_v54  ;;  %v2819_v35 = vsel %vm7565_vm5, -3.4028235e+38, %v2800_v1  ;;  %v2544_v7 = vsel %vm311_vm6, %v2534_v27, -inf  ;;  %v2826_v2 = vsel %vm311_vm6, %v2820_v13, -inf  ;;  %vm7571_vm4 = vmmov %vm7570_vm2 }
 0xf03   :  { %v2823_v23 = vsel %vm311_vm6, %v2819_v35, -inf  ;;  %v2541_v24 = vsel %vm311_vm6, %v6996_v28, -inf  ;;  %vm7572_vm5 = vmmov %vm7570_vm2 }
 0xf04   :  { %v5304_v40 = vpop.f32.mrb[34].mxu1  ;;  %2824 = vmax.xlane.f32.xlu1 %v2823_v23  ;;  %2542 = vmax.xlane.f32.xlu0 %v2541_v24  ;;  %vm7575_vm13 = vmmov %vm7570_vm2 }
 0xf05   :  { %v2810_v44 = vpop.f32.mrb[35].mxu1  ;;  %v2822_v62 = vsel %vm7569_vm8, -3.4028235e+38, %v5304_v40  ;;  %vm7576_vm8 = vmmov %vm7570_vm2 }
 0xf06   :  { %v7007_v31 = vsel %vm7567_vm11, -3.4028235e+38, %v2810_v44  ;;  %v2832_v45 = vsel %vm311_vm6, %v2822_v62, -inf  ;;  %vm7574_vm11 = vmmov %vm7570_vm2 }
 0xf07   :  { %v2829_v42 = vsel %vm311_vm6, %v7007_v31, -inf }
 0xf08   :  { %2830 = vmax.xlane.f32.xlu1 %v2829_v42  ;;  %2545 = vmax.xlane.f32.xlu0 %v2544_v7 }
 0xf0c   :  { %2827 = vmax.xlane.f32.xlu0 %v2826_v2 }
 0xf10   :  { %2833 = vmax.xlane.f32.xlu0 %v2832_v45 }
 0xf19   :  { %5899 = vrot.lane.b32.xlu1 %v6949_v29, %s6145_s18 }
 0xf8c   :  { %v2540_v20 = vpop.xlane.xlu1 %2539 }
 0xf8d   :  { %v2548_v34 = vsub.f32 %v2532_v53, %v2540_v20  ;;  %v2537_v25 = vpop.xlane.xlu0 %2536 }
 0xf8e   :  { %v2547_v38 = vsub.f32 %v2531_v15, %v2537_v25 }
 0xf8f   :  { %v2553_v41 = vmul.f32 1.442695, %v2548_v34 }
 0xf90   :  { %v2551_v39 = vmul.f32 1.442695, %v2547_v38 }
 0xf91   :  { %6038 = vpow2.f32 %v2553_v41  ;;  %v2825_v33 = vpop.xlane.xlu1 %2824  ;;  %v2543_v46 = vpop.xlane.xlu0 %2542 }
 0xf92   :  { %6040 = vpow2.f32 %v2551_v39  ;;  %v2835_v47 = vsub.f32 %v2819_v35, %v2825_v33  ;;  %v2549_v2 = vsub.f32 %v6996_v28, %v2543_v46 }
 0xf94   :  { %v2839_v51 = vmul.f32 1.442695, %v2835_v47 }
 0xf95   :  { %v2831_v22 = vpop.xlane.xlu1 %2830  ;;  %v2546_v18 = vpop.xlane.xlu0 %2545 }
 0xf96   :  { %6042 = vpow2.f32 %v2839_v51  ;;  %v2550_v49 = vsub.f32 %v2534_v27, %v2546_v18  ;;  %v2837_v45 = vsub.f32 %v7007_v31, %v2831_v22 }
 0xf98   :  { %v2557_v15 = vmul.f32 1.442695, %v2550_v49  ;;  %v2843_v20 = vmul.f32 1.442695, %v2837_v45 }
 0xf99   :  { %v5900_v14 = vpop.permute.xlu1 %5899  ;;  %v2828_v10 = vpop.xlane.xlu0 %2827 }
 0xf9a   :  { %v5902_v43 = vunpack.i.h.bf16 %v5900_v14  ;;  %v5901_v12 = vunpack.i.l.bf16 %v5900_v14  ;;  %v2836_v57 = vsub.f32 %v2820_v13, %v2828_v10 }
 0xf9b   :  { %v6039_v53 = vpop.eup %6038 }
 0xf9c   :  { %v6041_v37 = vpop.eup %6040  ;;  %v5645_v63 = vpack.c.bf16 %v5902_v43, %v5901_v12  ;;  %v2841_v8 = vmul.f32 1.442695, %v2836_v57  ;;  %v2562_v6 = vsel %vm311_vm6, %v6039_v53, 0.0 }
 0xf9d   :  { %2563 = vadd.xlane.f32.xlu0 %v2562_v6  ;;  %v2834_v52 = vpop.xlane.xlu0 %2833  ;;  %v2559_v54 = vsel %vm311_vm6, %v6041_v37, 0.0 }
 0xf9e   :  { %6044 = vpow2.f32 %v2841_v8  ;;  %v2838_v1 = vsub.f32 %v2822_v62, %v2834_v52  ;;  %5646 = vmatprep.subr.bf16.mxu0 %v5645_v63  ;;  %2560 = vadd.xlane.f32.xlu1 %v2559_v54  ;;  %v2555_v62 = vmul.f32 1.442695, %v2549_v2 }
 0xf9f   :  { %5648 = vmatpush3.bf16.msra.mxu0 %v5645_v63  ;;  %6046 = vpow2.f32 %v2557_v15 }
 0xfa0   :  { %v6043_v35 = vpop.eup %6042  ;;  %v2845_v23 = vmul.f32 1.442695, %v2838_v1 }
 0xfa1   :  { %v2847_v24 = vsel %vm311_vm6, %v6043_v35, 0.0 }
 0xfa2   :  { %2848 = vadd.xlane.f32.xlu1 %v2847_v24  ;;  %6048 = vpow2.f32 %v2845_v23 }
 0xfa3   :  { %6050 = vpow2.f32 %v2555_v62 }
 0xfa4   :  { %6052 = vpow2.f32 %v2843_v20 }
 0xfa8   :  { %v6045_v27 = vpop.eup %6044 }
 0xfa9   :  { %v2850_v40 = vsel %vm311_vm6, %v6045_v27, 0.0  ;;  %v7024_v44 = vpop.eup %6046 }
 0xfaa   :  { %2851 = vadd.xlane.f32.xlu0 %v2850_v40  ;;  %v2568_v42 = vsel %vm311_vm6, %v7024_v44, 0.0 }
 0xfac   :  { %v7028_v7 = vpop.eup %6048 }
 0xfad   :  { %v2856_v13 = vsel %vm311_vm6, %v7028_v7, 0.0  ;;  %v6051_v34 = vpop.eup %6050 }
 0xfae   :  { %2569 = vadd.xlane.f32.xlu0 %v2568_v42  ;;  %v2565_v25 = vsel %vm311_vm6, %v6051_v34, 0.0  ;;  %v7039_v38 = vpop.eup %6052 }
 0xfb2   :  { %2857 = vadd.xlane.f32.xlu0 %v2856_v13 }
 0xfb3   :  { %5909 = vrot.lane.b32.xlu1 %v6949_v29, %s6146_s19  ;;  %v2853_v29 = vsel %vm311_vm6, %v7039_v38, 0.0 }
 0xfc8   :  { %5904 = vrot.lane.b32.xlu0 %v6955_v11, %s6145_s18 }
 0xfd7   :  { %2566 = vadd.xlane.f32.xlu1 %v2565_v25 }
 0xfdb   :  { %2854 = vadd.xlane.f32.xlu1 %v2853_v29 }
 0xfec   :  { %5914 = vrot.lane.b32.xlu1 %v6955_v11, %s6146_s19 }
0x102a   :  { %v2564_v28 = vpop.xlane.xlu0 %2563 }
0x102b   :  { %6054 = vrcp.f32 %v2564_v28  ;;  %v2561_v31 = vpop.xlane.xlu1 %2560 }
0x102c   :  { %6056 = vrcp.f32 %v2561_v31 }
0x102f   :  { %v2849_v41 = vpop.xlane.xlu1 %2848 }
0x1030   :  { %6058 = vrcp.f32 %v2849_v41 }
0x1033   :  { %v5910_v43 = vpop.permute.xlu1 %5909 }
0x1034   :  { %v5912_v8 = vunpack.i.h.bf16 %v5910_v43 }
0x1035   :  { %v6055_v39 = vpop.eup %6054 }
0x1036   :  { %v6057_v33 = vpop.eup %6056  ;;  %v2576_v46 = vmul.f32 %v6055_v39, %v6039_v53  ;;  %v5911_v53 = vunpack.i.l.bf16 %v5910_v43 }
0x1037   :  { %v2852_v47 = vpop.xlane.xlu0 %2851  ;;  %v2575_v51 = vmul.f32 %v6057_v33, %v6041_v37 }
0x1038   :  { %6060 = vrcp.f32 %v2852_v47  ;;  %v2580_v22 = vsel %vm311_vm6, %v2576_v46, 0.0  ;;  %v5665_v24 = vpack.c.bf16 %v5912_v8, %v5911_v53  ;;  %v4659_v53 = vld [vmem:[%s7496_s3 + $0x50] sm:$0xff] }
0x1039   :  { %v2579_v18 = vsel %vm311_vm6, %v2575_v51, 0.0  ;;  %5285 = vmatprep.mubr.msk.f32.mxu0 %vm311_vm6, %v2575_v51 }
0x103a   :  { %v2581_v49 = vadd.f32 %v2580_v22, %v2579_v18  ;;  %v6059_v14 = vpop.eup %6058 }
0x103b   :  { %v2570_v11 = vpop.xlane.xlu0 %2569  ;;  %v2863_v12 = vmul.f32 %v6059_v14, %v6043_v35 }
0x103c   :  { %6062 = vrcp.f32 %v2570_v11 }
0x103d   :  { %v2867_v52 = vsel %vm311_vm6, %v2863_v12, 0.0 }
0x103f   :  { %v2858_v10 = vpop.xlane.xlu0 %2857 }
0x1042   :  { %v6061_v57 = vpop.eup %6060 }
0x1043   :  { %v2864_v15 = vmul.f32 %v6061_v57, %v6045_v27  ;;  %v5905_v63 = vpop.permute.xlu0 %5904 }
0x1044   :  { %v5907_v6 = vunpack.i.h.bf16 %v5905_v63  ;;  %v5906_v37 = vunpack.i.l.bf16 %v5905_v63 }
0x1045   :  { %v2868_v54 = vsel %vm311_vm6, %v2864_v15, 0.0 }
0x1046   :  { %v5649_v1 = vpack.c.bf16 %v5907_v6, %v5906_v37  ;;  %v2869_v23 = vadd.f32 %v2868_v54, %v2867_v52  ;;  %v6063_v42 = vpop.eup %6062  ;;  %v4660_v6 = vld [vmem:[%s7496_s3 + $0x58] sm:$0xff]  ;;  %v4657_v52 = vld [vmem:[%s7496_s3 + $0x40] sm:$0xff]  ;;  %v4658_v54 = vld [vmem:[%s7496_s3 + $0x48] sm:$0xff] }
0x1047   :  { %v2578_v25 = vmul.f32 %v6063_v42, %v7024_v44  ;;  %v5673_v37 = vpack.c.bf16 %v4660_v6, %v4659_v53 }
0x1048   :  { %5650 = vmatprep.subr.bf16.mxu0 %v5649_v1 }
0x1049   :  { %5652 = vmatpush3.bf16.msra.mxu0 %v5649_v1  ;;  %v2584_v39 = vsel %vm311_vm6, %v2578_v25, 0.0  ;;  %v5679_v1 = vpack.c.bf16 %v4658_v54, %v4657_v52 }
0x104a   :  { %5666 = vmatprep.subr.bf16.mxu0 %v5665_v24 }
0x104c   :  { %5286 = vmatmul.mubr.msk.f32.vlgmr.msra.gmra.mrb[32].mxu0 %vm311_vm6, %v2576_v46 }
0x104d   :  { %5668 = vmatpush3.bf16.msra.mxu0 %v5665_v24  ;;  %v4710_v24 = vld [vmem:[%s7495_s2 + $0x98] sm:$0xff] }
0x1064   :  { %v2567_v35 = vpop.xlane.xlu1 %2566 }
0x1065   :  { %6064 = vrcp.f32 %v2567_v35  ;;  %v4711_v35 = vld [vmem:[%s7495_s2 + $0xa0] sm:$0xff] }
0x1066   :  { %6066 = vrcp.f32 %v2858_v10 }
0x1068   :  { %v2855_v27 = vpop.xlane.xlu1 %2854 }
0x1069   :  { %6068 = vrcp.f32 %v2855_v27 }
0x106c   :  { %v5915_v40 = vpop.permute.xlu1 %5914 }
0x106d   :  { %v5917_v13 = vunpack.i.h.bf16 %v5915_v40  ;;  %v5916_v2 = vunpack.i.l.bf16 %v5915_v40  ;;  %v4712_v40 = vld [vmem:[%s7495_s2 + $0xa8] sm:$0xff] }
0x106e   :  { %v5691_v42 = vpack.c.bf16 %v4712_v40, %v4711_v35 }
0x106f   :  { %v6065_v62 = vpop.eup %6064  ;;  %v5669_v45 = vpack.c.bf16 %v5917_v13, %v5916_v2  ;;  %v4713_v13 = vld [vmem:[%s7495_s2 + $0xb0] sm:$0xff]  ;;  %v4714_v2 = vld [vmem:[%s7495_s2 + $0xb8] sm:$0xff] }
0x1070   :  { %v2577_v20 = vmul.f32 %v6065_v62, %v6051_v34  ;;  %v6067_v29 = vpop.eup %6066  ;;  %v5697_v62 = vpack.c.bf16 %v4714_v2, %v4713_v13 }
0x1071   :  { %5670 = vmatprep.subr.bf16.mxu0 %v5669_v45  ;;  %v2866_v34 = vmul.f32 %v6067_v29, %v7028_v7 }
0x1072   :  { %v2582_v28 = vsel %vm311_vm6, %v2577_v20, 0.0  ;;  %5288 = vmatprep.mubr.msk.f32.mxu0 %vm311_vm6, %v2577_v20  ;;  %5672 = vmatpush3.bf16.msra.mxu0 %v5669_v45 }
0x1073   :  { %v6069_v31 = vpop.eup %6068  ;;  %v2583_v41 = vadd.f32 %v2582_v28, %v2581_v49  ;;  %5289 = vmatmul.mubr.msk.f32.gmra.mrb[34].mxu0 %vm311_vm6, %v2578_v25  ;;  %v2872_v22 = vsel %vm311_vm6, %v2866_v34, 0.0  ;;  %5675 = vmatprep.subr.msk.bf16.mxu0 %vm6284_vm3, %v5673_v37 }
0x1074   :  { %5313 = vmatprep.mubr.msk.f32.mxu0 %vm311_vm6, %v2863_v12  ;;  %v2865_v33 = vmul.f32 %v6069_v31, %v7039_v38 }
0x1075   :  { %v2585_v44 = vadd.f32 %v2584_v39, %v2583_v41 }
0x1076   :  { %v2870_v46 = vsel %vm311_vm6, %v2865_v33, 0.0 }
0x1077   :  { %v2586_v47 = vrot.slane %v2585_v44, 4  ;;  %5314 = vmatmul.mubr.msk.f32.vlgmr.msra.gmra.mrb[36].mxu0 %vm311_vm6, %v2864_v15  ;;  %v2871_v51 = vadd.f32 %v2870_v46, %v2869_v23  ;;  %v4709_v23 = vld [vmem:[%s7495_s2 + $0x90] sm:$0xff] }
0x1078   :  { %5316 = vmatprep.mubr.msk.f32.mxu0 %vm311_vm6, %v2865_v33  ;;  %v5685_v27 = vpack.c.bf16 %v4710_v24, %v4709_v23 }
0x1079   :  { %v2587_v18 = vadd.f32 %v2586_v47, %v2585_v44  ;;  %v2873_v49 = vadd.f32 %v2872_v22, %v2871_v51 }
0x107a   :  { %5687 = vmatprep.subr.msk.bf16.mxu1 %vm6212_vm1, %v5685_v27 }
0x107b   :  { %v2588_v11 = vrot.slane %v2587_v18, 2  ;;  %v2874_v14 = vrot.slane %v2873_v49, 4  ;;  %5317 = vmatmul.mubr.msk.f32.gmra.mrb[38].mxu0 %vm311_vm6, %v2866_v34  ;;  %5690 = vmatpush3.bf16.xpose.msk.msra.mxu1 %vm6212_vm1, %v5685_v27  ;;  %v7127_v34 = vld [vmem:[%s7497_s4 + $0x1] ss:$0 sm:$0xff] }
0x107c   :  { %5678 = vmatpush3.bf16.xpose.msk.msra.mxu0 %vm6284_vm3, %v5673_v37  ;;  %5693 = vmatprep.subr.msk.bf16.mxu1 %vm6212_vm1, %v5691_v42 }
0x107d   :  { %v2589_v38 = vadd.f32 %v2588_v11, %v2587_v18  ;;  %v2875_v10 = vadd.f32 %v2874_v14, %v2873_v49  ;;  %5681 = vmatprep.subr.msk.bf16.mxu0 %vm6284_vm3, %v5679_v1 }
0x107f   :  { %v2876_v7 = vrot.slane %v2875_v10, 2  ;;  %v2590_v43 = vrot.slane %v2589_v38, 1 }
0x1081   :  { %v2877_v12 = vadd.f32 %v2876_v7, %v2875_v10  ;;  %v2591_v63 = vadd.f32 %v2590_v43, %v2589_v38 }
0x1083   :  { %v2878_v57 = vrot.slane %v2877_v12, 1  ;;  %5696 = vmatpush3.bf16.xpose.msk.msra.mxu1 %vm6212_vm1, %v5691_v42 }
0x1084   :  { %5699 = vmatprep.subr.msk.bf16.mxu1 %vm6212_vm1, %v5697_v62 }
0x1085   :  { %v2879_v8 = vadd.f32 %v2878_v57, %v2877_v12 }
0x1087   :  { %v7064_v15 = vadd.f32 %v2879_v8, %v2591_v63 }
0x1089   :  { %v3233_v63 = vsel %vm6525_vm12, %v7064_v15, -3.4028235e+38  ;;  %v3245_v53 = vsel %vm6537_vm7, %v7064_v15, -3.4028235e+38  ;;  %v3221_v6 = vsel %vm6541_vm10, %v7064_v15, -3.4028235e+38 }
0x108a   :  { %v3234_v8 = vsel %vm311_vm6, %v3233_v63, -inf  ;;  %v3246_v37 = vsel %vm311_vm6, %v3245_v53, -inf  ;;  %v3222_v52 = vsel %vm311_vm6, %v3221_v6, -inf }
0x108b   :  { %5702 = vmatpush3.bf16.xpose.msk.msra.mxu1 %vm6212_vm1, %v5697_v62 }
0x111f   :  { %v5287_v45 = vpop.f32.mrb[32].mxu0 }
0x1120   :  { %v2683_v20 = vpop.f32.mrb[33].mxu0 }
0x1146   :  { %v5290_v25 = vpop.f32.mrb[34].mxu0 }
0x1147   :  { %v2693_v29 = vpop.f32.mrb[35].mxu0 }
0x114a   :  { %v5315_v28 = vpop.f32.mrb[36].mxu0 }
0x114b   :  { %v2971_v31 = vpop.f32.mrb[37].mxu0 }
0x114c   :  { %5323 = vmatprep.mubr.msk.f32.mxu0 %vm7570_vm2, %v2971_v31 }
0x114d   :  { %5324 = vmatmul.mubr.msk.f32.vlgmr.msra.gmra.mrb[40].mxu0 %vm7571_vm4, %v5315_v28 }
0x114e   :  { %v5318_v41 = vpop.f32.mrb[38].mxu0  ;;  %5684 = vmatpush3.bf16.xpose.msk.msra.mxu0 %vm6284_vm3, %v5679_v1 }
0x114f   :  { %v2981_v39 = vpop.f32.mrb[39].mxu0 }
0x1150   :  { %5326 = vmatprep.mubr.msk.f32.mxu0 %vm7572_vm5, %v2981_v39 }
0x1151   :  { %5327 = vmatmul.mubr.msk.f32.gmra.mrb[42].mxu0 %vm7573_vm14, %v5318_v41  ;;  %vm7582_vm14 = vmmov %vm7576_vm8 }
0x1152   :  { %5333 = vmatprep.mubr.msk.f32.mxu0 %vm7574_vm11, %v2683_v20  ;;  %vm7583_vm11 = vcmp.lt.s32.totalorder %v6517_v56, 8 }
0x1153   :  { %v3210_v12 = vsel %vm7583_vm11, %v7064_v15, -3.4028235e+38 }
0x1154   :  { %v3211_v57 = vsel %vm311_vm6, %v3210_v12, -inf }
0x1155   :  { %5334 = vmatmul.mubr.msk.f32.vlgmr.msra.gmra.mrb[40].mxu0 %vm7575_vm13, %v5287_v45  ;;  %vm7584_vm13 = vmmov %vm7576_vm8 }
0x1156   :  { %5336 = vmatprep.mubr.msk.f32.mxu0 %vm7576_vm8, %v2693_v29 }
0x1159   :  { %5337 = vmatmul.mubr.msk.f32.gmra.mrb[42].mxu0 %vm7577_vm0, %v5290_v25  ;;  %vm7578_vm0 = vcmask 130048  }
0x115a   :  { %vm7579_vm2 = vmmov %vm7578_vm0 }
0x115b   :  { %vm7580_vm4 = vmmov %vm7578_vm0 }
0x115c   :  { %vm7581_vm5 = vmmov %vm7578_vm0 }
0x1228   :  { %v5335_v33 = vpop.f32.mrb[40].mxu0 }
0x1229   :  { %v3197_v44 = vadd.f32 %v5335_v33, %v6932_v17  ;;  %v3177_v46 = vpop.f32.mrb[41].mxu0 }
0x122a   :  { %v3196_v47 = vadd.f32 %v3177_v46, %v6930_v19 }
0x122b   :  { %v7135_v18 = vadd.f32 %v7127_v34, %v3197_v44 }
0x122c   :  { %v7132_v51 = vadd.f32 %v7127_v34, %v3196_v47  ;;  %v5338_v22 = vpop.f32.mrb[42].mxu0 }
0x122d   :  { %v3199_v49 = vadd.f32 %v5338_v22, %v6942_v32  ;;  %v3187_v11 = vpop.f32.mrb[43].mxu0 }
0x122e   :  { %v3198_v14 = vadd.f32 %v3187_v11, %v6940_v9  ;;  %5351 = vmatprep.mubr.msk.f32.mxu1 %vm7578_vm0, %v7132_v51  ;;  %vm7585_vm0 = vmmov %vm7576_vm8 }
0x122f   :  { %5352 = vmatmul.mubr.msk.f32.vlgmr.msra.gmra.mrb[36].mxu1 %vm7579_vm2, %v7135_v18  ;;  %v7147_v17 = vadd.f32 %v7127_v34, %v3199_v49  ;;  %vm7586_vm2 = vmmov %vm7585_vm0 }
0x1230   :  { %v7144_v19 = vadd.f32 %v7127_v34, %v3198_v14 }
0x1232   :  { %5354 = vmatprep.mubr.msk.f32.mxu1 %vm7580_vm4, %v7144_v19  ;;  %vm7587_vm4 = vmmov %vm7585_vm0 }
0x1233   :  { %5355 = vmatmul.mubr.msk.f32.gmra.mrb[38].mxu1 %vm7581_vm5, %v7147_v17  ;;  %vm7588_vm5 = vmmov %vm7585_vm0 }
0x1302   :  { %v5353_v32 = vpop.f32.mrb[36].mxu1 }
0x1303   :  { %v3375_v9 = vpop.f32.mrb[37].mxu1 }
0x1304   :  { %5365 = vmatprep.mubr.msk.f32.mxu0 %vm7582_vm14, %v3375_v9  ;;  %v7154_v38 = vpack.i.bf16 %v5353_v32, %v3375_v9  ;;  %vm7589_vm14 = vmmov %vm7585_vm0 }
0x1306   :  { %5919 = vrot.lane.b32.xlu0 %v7154_v38, %s6143_s30  ;;  %v5356_v10 = vpop.f32.mrb[38].mxu1 }
0x1307   :  { %v3385_v7 = vpop.f32.mrb[39].mxu1 }
0x1308   :  { %v7158_v43 = vpack.i.bf16 %v5356_v10, %v3385_v7 }
0x130a   :  { %5929 = vrot.lane.b32.xlu0 %v7154_v38, %s6142_s29  ;;  %5924 = vrot.lane.b32.xlu1 %v7158_v43, %s6143_s30 }
0x130e   :  { %3664 = vrot.lane.b32.xlu0 %v3375_v9, %s6144_s0  ;;  %5934 = vrot.lane.b32.xlu1 %v7158_v43, %s6142_s29 }
0x1312   :  { %3668 = vrot.lane.b32.xlu0 %v3385_v7, %s6144_s0  ;;  %3666 = vrot.lane.b32.xlu1 %v5353_v32, %s6144_s0 }
0x1316   :  { %3670 = vrot.lane.b32.xlu1 %v5356_v10, %s6144_s0 }
0x1331   :  { %3212 = vmax.xlane.f32.xlu0 %v3211_v57 }
0x1335   :  { %3235 = vmax.xlane.f32.xlu0 %v3234_v8 }
0x1339   :  { %3247 = vmax.xlane.f32.xlu0 %v3246_v37 }
0x133a   :  { %3223 = vmax.xlane.f32.xlu1 %v3222_v52 }
0x1378   :  { %v5920_v54 = vpop.permute.xlu0 %5919 }
0x1379   :  { %v5922_v1 = vunpack.i.h.bf16 %v5920_v54  ;;  %v5921_v23 = vunpack.i.l.bf16 %v5920_v54 }
0x137b   :  { %v5703_v24 = vpack.c.bf16 %v5922_v1, %v5921_v23 }
0x137c   :  { %v5925_v35 = vpop.permute.xlu1 %5924  ;;  %v5930_v42 = vpop.permute.xlu0 %5929 }
0x137d   :  { %v5927_v27 = vunpack.i.h.bf16 %v5925_v35  ;;  %v5926_v40 = vunpack.i.l.bf16 %v5925_v35  ;;  %5705 = vmatprep.subr.msk.bf16.mxu0 %vm6284_vm3, %v5703_v24  ;;  %v5932_v2 = vunpack.i.h.bf16 %v5930_v42  ;;  %v5931_v62 = vunpack.i.l.bf16 %v5930_v42 }
0x137e   :  { %5708 = vmatpush3.bf16.xpose.msk.msra.mxu0 %vm6284_vm3, %v5703_v24 }
0x137f   :  { %v5709_v13 = vpack.c.bf16 %v5927_v27, %v5926_v40  ;;  %v5723_v45 = vpack.c.bf16 %v5932_v2, %v5931_v62 }
0x1380   :  { %v5935_v20 = vpop.permute.xlu1 %5934  ;;  %v3665_v31 = vpop.permute.xlu0 %3664 }
0x1381   :  { %5711 = vmatprep.subr.msk.bf16.mxu0 %vm6284_vm3, %v5709_v13  ;;  %v5937_v25 = vunpack.i.h.bf16 %v5935_v20  ;;  %v5936_v29 = vunpack.i.l.bf16 %v5935_v20 }
0x1383   :  { %v5729_v28 = vpack.c.bf16 %v5937_v25, %v5936_v29 }
0x1384   :  { %v3667_v41 = vpop.permute.xlu1 %3666  ;;  %v3669_v39 = vpop.permute.xlu0 %3668 }
0x1386   :  { %5714 = vmatpush3.bf16.xpose.msk.msra.mxu0 %vm6284_vm3, %v5709_v13 }
0x1387   :  { %5725 = vmatprep.subr.msk.bf16.mxu0 %vm6284_vm3, %v5723_v45 }
0x1388   :  { %v3671_v33 = vpop.permute.xlu1 %3670 }
0x138d   :  { %5366 = vmatmul.mubr.msk.f32.vlgmr.msra.gmra.mrb[44].mxu0 %vm7584_vm13, %v5353_v32  ;;  %vm7590_vm13 = vcmp.lt.s32.totalorder %v6517_v56, 8 }
0x138e   :  { %5368 = vmatprep.mubr.msk.f32.mxu0 %vm7576_vm8, %v3385_v7  ;;  %5728 = vmatpush3.bf16.xpose.msk.msra.mxu0 %vm6284_vm3, %v5723_v45 }
0x138f   :  { %5731 = vmatprep.subr.msk.bf16.mxu0 %vm6284_vm3, %v5729_v28 }
0x1391   :  { %5369 = vmatmul.mubr.msk.f32.gmra.mrb[46].mxu0 %vm7585_vm0, %v5356_v10 }
0x1392   :  { %5393 = vmatprep.mubr.msk.f32.mxu0 %vm7586_vm2, %v3665_v31 }
0x1396   :  { %5734 = vmatpush3.bf16.xpose.msk.msra.mxu0 %vm6284_vm3, %v5729_v28 }
0x139d   :  { %5394 = vmatmul.mubr.msk.f32.vlgmr.msra.gmra.mrb[48].mxu0 %vm7587_vm4, %v3667_v41 }
0x139e   :  { %5396 = vmatprep.mubr.msk.f32.mxu0 %vm7588_vm5, %v3669_v39 }
0x13a1   :  { %5397 = vmatmul.mubr.msk.f32.gmra.mrb[50].mxu0 %vm7589_vm14, %v3671_v33 }
0x13be   :  { %v3213_v44 = vpop.xlane.xlu0 %3212 }
0x13bf   :  { %vm3214_vm11 = vcmp.ge.f32.partialorder %v7064_v15, %v3213_v44 }
0x13c0   :  { %vm3215_vm8 = vmand %vm7590_vm13, %vm3214_vm11 }
0x13c1   :  { %v3216_v46 = vsel %vm3215_vm8, %v6578_v30, 32.0 }
0x13c2   :  { %v3236_v47 = vpop.xlane.xlu0 %3235  ;;  %v3217_v22 = vsel %vm311_vm6, %v3216_v46, inf }
0x13c3   :  { %vm3237_vm0 = vcmp.ge.f32.partialorder %v7064_v15, %v3236_v47  ;;  %3218 = vmin.xlane.f32.xlu1 %v3217_v22 }
0x13c4   :  { %vm3238_vm2 = vmand %vm6525_vm12, %vm3237_vm0 }
0x13c5   :  { %v3239_v49 = vsel %vm3238_vm2, %v6578_v30, 32.0 }
0x13c6   :  { %v3248_v11 = vpop.xlane.xlu0 %3247  ;;  %v3240_v14 = vsel %vm311_vm6, %v3239_v49, inf }
0x13c7   :  { %vm3249_vm4 = vcmp.ge.f32.partialorder %v7064_v15, %v3248_v11  ;;  %3241 = vmin.xlane.f32.xlu1 %v3240_v14  ;;  %v3224_v56 = vpop.xlane.xlu1 %3223 }
0x13c8   :  { %vm3250_vm5 = vmand %vm6537_vm7, %vm3249_vm4  ;;  %vm3225_vm14 = vcmp.ge.f32.partialorder %v7064_v15, %v3224_v56  ;;  %vm7593_vm4 = vcmp.gt.f32.partialorder %v6605_v5, 0.5 }
0x13c9   :  { %vm3226_vm11 = vmand %vm6541_vm10, %vm3225_vm14  ;;  %v3251_v9 = vsel %vm3250_vm5, %v6578_v30, 32.0  ;;  %vm7594_vm14 = vcmp.gt.f32.partialorder %v6610_v48, 0.5 }
0x13ca   :  { %v3227_v59 = vsel %vm3226_vm11, %v6578_v30, 32.0  ;;  %v3252_v10 = vsel %vm311_vm6, %v3251_v9, inf }
0x13cb   :  { %v3228_v32 = vsel %vm311_vm6, %v3227_v59, inf }
0x13cc   :  { %3229 = vmin.xlane.f32.xlu0 %v3228_v32 }
0x13d0   :  { %3253 = vmin.xlane.f32.xlu0 %v3252_v10 }
0x1450   :  { %v3219_v7 = vpop.xlane.xlu1 %3218 }
0x1451   :  { %vm3220_vm12 = vcmp.eq.f32.partialorder %v6578_v30, %v3219_v7 }
0x1454   :  { %v3242_v60 = vpop.xlane.xlu1 %3241 }
0x1455   :  { %vm3243_vm10 = vcmp.eq.f32.partialorder %v6578_v30, %v3242_v60 }
0x1459   :  { %v3230_v12 = vpop.xlane.xlu0 %3229 }
0x145a   :  { %vm3231_vm7 = vcmp.eq.f32.partialorder %v6578_v30, %v3230_v12 }
0x145b   :  { %vm3232_vm13 = vmor %vm3220_vm12, %vm3231_vm7  ;;  %vm7597_vm12 = vcmp.gt.f32.partialorder %v6615_v55, 0.5 }
0x145c   :  { %vm3244_vm8 = vmor %vm3232_vm13, %vm3243_vm10  ;;  %vm7598_vm13 = vcmp.gt.f32.partialorder %v6622_v16, 0.5 }
0x145d   :  { %v3254_v61 = vpop.xlane.xlu0 %3253 }
0x145e   :  { %vm3255_vm0 = vcmp.eq.f32.partialorder %v6578_v30, %v3254_v61 }
0x145f   :  { %vm7233_vm2 = vmor %vm3244_vm8, %vm3255_vm0  ;;  %vm7601_vm8 = vcmp.gt.f32.partialorder %v6629_v58, 0.5 }
0x1460   :  { %vm3260_vm5 = vmand %vm7593_vm4, %vm7233_vm2  ;;  %v5367_v57 = vpop.f32.mrb[44].mxu0 }
0x1461   :  { %vm7243_vm11 = vmor %vm7594_vm14, %vm3260_vm5  ;;  %v3488_v8 = vpop.f32.mrb[45].mxu0  ;;  %vm7604_vm5 = vcmp.gt.f32.partialorder %v6649_v0, 0.5 }
0x1462   :  { %v3508_v30 = vsel %vm7243_vm11, -3.4028235e+38, %v5367_v57  ;;  %vm3259_vm7 = vmand %vm7597_vm12, %vm7233_vm2  ;;  %vm7605_vm12 = vcmp.gt.f32.partialorder %v6661_v3, 0.5 }
0x1463   :  { %v3514_v53 = vsel %vm311_vm6, %v3508_v30, -inf  ;;  %vm7256_vm10 = vmor %vm7598_vm13, %vm3259_vm7 }
0x1464   :  { %v3507_v48 = vsel %vm7256_vm10, -3.4028235e+38, %v3488_v8  ;;  %3515 = vmax.xlane.f32.xlu0 %v3514_v53  ;;  %vm3262_vm0 = vmand %vm7601_vm8, %vm7233_vm2  ;;  %v5370_v6 = vpop.f32.mrb[46].mxu0 }
0x1465   :  { %v3511_v55 = vsel %vm311_vm6, %v3507_v48, -inf  ;;  %vm7269_vm4 = vmor %vm53_vm9, %vm3262_vm0  ;;  %v3498_v37 = vpop.f32.mrb[47].mxu0  ;;  %vm7608_vm9 = vcmask 64512  }
0x1466   :  { %3512 = vmax.xlane.f32.xlu1 %v3511_v55  ;;  %v3510_v52 = vsel %vm7269_vm4, -3.4028235e+38, %v5370_v6  ;;  %vm3261_vm14 = vmand %vm7604_vm5, %vm7233_vm2 }
0x1467   :  { %v3520_v58 = vsel %vm311_vm6, %v3510_v52, -inf  ;;  %vm7282_vm7 = vmor %vm7605_vm12, %vm3261_vm14 }
0x1468   :  { %v3509_v54 = vsel %vm7282_vm7, -3.4028235e+38, %v3498_v37  ;;  %3521 = vmax.xlane.f32.xlu0 %v3520_v58  ;;  %vm7609_vm2 = vmmov %vm7608_vm9 }
0x1469   :  { %v3517_v1 = vsel %vm311_vm6, %v3509_v54, -inf  ;;  %vm7611_vm13 = vmmov %vm7609_vm2 }
0x146a   :  { %3518 = vmax.xlane.f32.xlu1 %v3517_v1 }
0x1470   :  { %v5395_v23 = vpop.f32.mrb[48].mxu0 }
0x1471   :  { %v3782_v0 = vsel %vm7243_vm11, -3.4028235e+38, %v5395_v23  ;;  %v3762_v24 = vpop.f32.mrb[49].mxu0  ;;  %vm7610_vm11 = vmmov %vm7609_vm2 }
0x1472   :  { %v3788_v35 = vsel %vm311_vm6, %v3782_v0, -inf  ;;  %v3781_v3 = vsel %vm7256_vm10, -3.4028235e+38, %v3762_v24 }
0x1473   :  { %v3785_v27 = vsel %vm311_vm6, %v3781_v3, -inf  ;;  %3789 = vmax.xlane.f32.xlu0 %v3788_v35 }
0x1474   :  { %v5398_v40 = vpop.f32.mrb[50].mxu0  ;;  %3786 = vmax.xlane.f32.xlu1 %v3785_v27 }
0x1475   :  { %v3784_v42 = vsel %vm7269_vm4, -3.4028235e+38, %v5398_v40  ;;  %v3772_v13 = vpop.f32.mrb[51].mxu0 }
0x1476   :  { %v3794_v2 = vsel %vm311_vm6, %v3784_v42, -inf  ;;  %v7300_v62 = vsel %vm7282_vm7, -3.4028235e+38, %v3772_v13 }
0x1477   :  { %v3791_v45 = vsel %vm311_vm6, %v7300_v62, -inf  ;;  %3795 = vmax.xlane.f32.xlu0 %v3794_v2 }
0x1478   :  { %3792 = vmax.xlane.f32.xlu1 %v3791_v45 }
0x1489   :  { %5939 = vrot.lane.b32.xlu1 %v7154_v38, %s6145_s18 }
0x14f1   :  { %v3516_v20 = vpop.xlane.xlu0 %3515 }
0x14f2   :  { %v3524_v25 = vsub.f32 %v3508_v30, %v3516_v20 }
0x14f3   :  { %v3513_v29 = vpop.xlane.xlu1 %3512 }
0x14f4   :  { %v3529_v28 = vmul.f32 1.442695, %v3524_v25  ;;  %v3523_v31 = vsub.f32 %v3507_v48, %v3513_v29 }
0x14f5   :  { %v3522_v41 = vpop.xlane.xlu0 %3521 }
0x14f6   :  { %6070 = vpow2.f32 %v3529_v28  ;;  %v3527_v39 = vmul.f32 1.442695, %v3523_v31  ;;  %v3526_v33 = vsub.f32 %v3510_v52, %v3522_v41 }
0x14f7   :  { %v3519_v44 = vpop.xlane.xlu1 %3518 }
0x14f8   :  { %6072 = vpow2.f32 %v3527_v39  ;;  %v3533_v46 = vmul.f32 1.442695, %v3526_v33  ;;  %v3525_v47 = vsub.f32 %v3509_v54, %v3519_v44 }
0x14fa   :  { %6074 = vpow2.f32 %v3533_v46  ;;  %v3531_v22 = vmul.f32 1.442695, %v3525_v47 }
0x14fc   :  { %6076 = vpow2.f32 %v3531_v22 }
0x1500   :  { %v7306_v49 = vpop.eup %6070  ;;  %v3790_v11 = vpop.xlane.xlu0 %3789 }
0x1501   :  { %v3798_v14 = vsub.f32 %v3782_v0, %v3790_v11  ;;  %v3787_v56 = vpop.xlane.xlu1 %3786  ;;  %v3538_v59 = vsel %vm311_vm6, %v7306_v49, 0.0 }
0x1502   :  { %v6073_v32 = vpop.eup %6072  ;;  %v3797_v9 = vsub.f32 %v3781_v3, %v3787_v56  ;;  %3539 = vadd.xlane.f32.xlu0 %v3538_v59 }
0x1503   :  { %v3803_v10 = vmul.f32 1.442695, %v3798_v14  ;;  %v3535_v7 = vsel %vm311_vm6, %v6073_v32, 0.0 }
0x1504   :  { %v7311_v12 = vpop.eup %6074  ;;  %v3801_v60 = vmul.f32 1.442695, %v3797_v9  ;;  %3536 = vadd.xlane.f32.xlu1 %v3535_v7  ;;  %v3796_v61 = vpop.xlane.xlu0 %3795 }
0x1505   :  { %6078 = vpow2.f32 %v3803_v10  ;;  %v3800_v15 = vsub.f32 %v3784_v42, %v3796_v61  ;;  %v3793_v57 = vpop.xlane.xlu1 %3792  ;;  %v3544_v63 = vsel %vm311_vm6, %v7311_v12, 0.0 }
0x1506   :  { %v6077_v8 = vpop.eup %6076  ;;  %6080 = vpow2.f32 %v3801_v60  ;;  %3545 = vadd.xlane.f32.xlu0 %v3544_v63  ;;  %v3799_v1 = vsub.f32 %v7300_v62, %v3793_v57  ;;  %v4717_v57 = vld [vmem:[%s7496_s3 + $0x70] sm:$0xff]  ;;  %v4718_v63 = vld [vmem:[%s7496_s3 + $0x78] sm:$0xff] }
0x1507   :  { %v3807_v30 = vmul.f32 1.442695, %v3800_v15  ;;  %v3541_v53 = vsel %vm311_vm6, %v6077_v8, 0.0 }
0x1508   :  { %3542 = vadd.xlane.f32.xlu1 %v3541_v53  ;;  %v3805_v23 = vmul.f32 1.442695, %v3799_v1  ;;  %v4716_v53 = vld [vmem:[%s7496_s3 + $0x68] sm:$0xff] }
0x1509   :  { %6082 = vpow2.f32 %v3807_v30  ;;  %v5940_v5 = vpop.permute.xlu1 %5939  ;;  %v4715_v30 = vld [vmem:[%s7496_s3 + $0x60] sm:$0xff] }
0x150a   :  { %v5942_v48 = vunpack.i.h.bf16 %v5940_v5  ;;  %v5941_v6 = vunpack.i.l.bf16 %v5940_v5  ;;  %6084 = vpow2.f32 %v3805_v23  ;;  %v5749_v5 = vpack.c.bf16 %v4716_v53, %v4715_v30 }
0x150c   :  { %v5715_v55 = vpack.c.bf16 %v5942_v48, %v5941_v6  ;;  %v4765_v48 = vld [vmem:[%s7498_s5 + $0x20] sm:$0xff]  ;;  %v4766_v6 = vld [vmem:[%s7498_s5 + $0x28] sm:$0xff] }
0x150e   :  { %5716 = vmatprep.subr.bf16.mxu1 %v5715_v55 }
0x150f   :  { %v7316_v16 = vpop.eup %6078  ;;  %5718 = vmatpush3.bf16.msra.mxu1 %v5715_v55  ;;  %v4767_v55 = vld [vmem:[%s7498_s5 + $0x30] sm:$0xff] }
0x1510   :  { %v6081_v37 = vpop.eup %6080  ;;  %v3812_v52 = vsel %vm311_vm6, %v7316_v16, 0.0 }
0x1511   :  { %3813 = vadd.xlane.f32.xlu0 %v3812_v52  ;;  %v3809_v58 = vsel %vm311_vm6, %v6081_v37, 0.0 }
0x1512   :  { %3810 = vadd.xlane.f32.xlu1 %v3809_v58 }
0x1513   :  { %v7321_v50 = vpop.eup %6082 }
0x1514   :  { %v3818_v54 = vsel %vm311_vm6, %v7321_v50, 0.0  ;;  %v6085_v0 = vpop.eup %6084 }
0x1515   :  { %3819 = vadd.xlane.f32.xlu0 %v3818_v54  ;;  %v3815_v24 = vsel %vm311_vm6, %v6085_v0, 0.0 }
0x1523   :  { %5949 = vrot.lane.b32.xlu1 %v7154_v38, %s6146_s19 }
0x152b   :  { %5944 = vrot.lane.b32.xlu0 %v7158_v43, %s6145_s18 }
0x1547   :  { %3816 = vadd.xlane.f32.xlu1 %v3815_v24 }
0x1558   :  { %5954 = vrot.lane.b32.xlu1 %v7158_v43, %s6146_s19 }
0x158f   :  { %v3540_v3 = vpop.xlane.xlu0 %3539 }
0x1591   :  { %v3537_v35 = vpop.xlane.xlu1 %3536 }
0x1592   :  { %6086 = vrcp.f32 %v3537_v35 }
0x1593   :  { %v3546_v27 = vpop.xlane.xlu0 %3545  ;;  %6088 = vrcp.f32 %v3540_v3 }
0x1595   :  { %v3543_v40 = vpop.xlane.xlu1 %3542 }
0x1596   :  { %6090 = vrcp.f32 %v3543_v40 }
0x1597   :  { %6092 = vrcp.f32 %v3546_v27 }
0x159c   :  { %v6087_v38 = vpop.eup %6086 }
0x159d   :  { %v3551_v42 = vmul.f32 %v6087_v38, %v6073_v32  ;;  %v6089_v41 = vpop.eup %6088 }
0x159e   :  { %v3814_v13 = vpop.xlane.xlu0 %3813  ;;  %v3552_v44 = vmul.f32 %v6089_v41, %v7306_v49 }
0x159f   :  { %5379 = vmatprep.mubr.msk.f32.mxu1 %vm311_vm6, %v3551_v42  ;;  %v3811_v2 = vpop.xlane.xlu1 %3810 }
0x15a0   :  { %6094 = vrcp.f32 %v3811_v2  ;;  %v6091_v39 = vpop.eup %6090 }
0x15a1   :  { %v6093_v46 = vpop.eup %6092  ;;  %v3553_v47 = vmul.f32 %v6091_v39, %v6077_v8  ;;  %6096 = vrcp.f32 %v3814_v13  ;;  %v5743_v8 = vpack.c.bf16 %v4718_v63, %v4717_v57 }
0x15a2   :  { %v3820_v62 = vpop.xlane.xlu0 %3819  ;;  %v3554_v11 = vmul.f32 %v6093_v46, %v7311_v12 }
0x15a3   :  { %v5950_v45 = vpop.permute.xlu1 %5949 }
0x15a4   :  { %v5952_v25 = vunpack.i.h.bf16 %v5950_v45  ;;  %v5951_v43 = vunpack.i.l.bf16 %v5950_v45 }
0x15a6   :  { %v5945_v20 = vpop.permute.xlu0 %5944  ;;  %v5735_v33 = vpack.c.bf16 %v5952_v25, %v5951_v43 }
0x15a7   :  { %v5947_v29 = vunpack.i.h.bf16 %v5945_v20  ;;  %v5946_v28 = vunpack.i.l.bf16 %v5945_v20 }
0x15a9   :  { %v5719_v31 = vpack.c.bf16 %v5947_v29, %v5946_v28 }
0x15aa   :  { %v6095_v22 = vpop.eup %6094 }
0x15ab   :  { %5720 = vmatprep.subr.bf16.mxu1 %v5719_v31  ;;  %v3825_v14 = vmul.f32 %v6095_v22, %v6081_v37  ;;  %v6097_v10 = vpop.eup %6096  ;;  %v4768_v37 = vld [vmem:[%s7498_s5 + $0x38] sm:$0xff] }
0x15ac   :  { %5722 = vmatpush3.bf16.msra.mxu1 %v5719_v31  ;;  %v3826_v60 = vmul.f32 %v6097_v10, %v7316_v16  ;;  %v5755_v16 = vpack.c.bf16 %v4766_v6, %v4765_v48  ;;  %v5761_v52 = vpack.c.bf16 %v4768_v37, %v4767_v55 }
0x15ad   :  { %5736 = vmatprep.subr.bf16.mxu1 %v5735_v33 }
0x15ae   :  { %5757 = vmatprep.subr.msk.bf16.mxu0 %vm6212_vm1, %v5755_v16 }
0x15af   :  { %5380 = vmatmul.mubr.msk.f32.vlgmr.msra.gmra.mrb[40].mxu1 %vm311_vm6, %v3552_v44  ;;  %5760 = vmatpush3.bf16.xpose.msk.msra.mxu0 %vm6212_vm1, %v5755_v16 }
0x15b0   :  { %5382 = vmatprep.mubr.msk.f32.mxu1 %vm311_vm6, %v3553_v47  ;;  %5738 = vmatpush3.bf16.msra.mxu1 %v5735_v33 }
0x15b1   :  { %5763 = vmatprep.subr.msk.bf16.mxu0 %vm6212_vm1, %v5761_v52 }
0x15b3   :  { %5383 = vmatmul.mubr.msk.f32.gmra.mrb[42].mxu1 %vm311_vm6, %v3554_v11 }
0x15b4   :  { %5407 = vmatprep.mubr.msk.f32.mxu1 %vm311_vm6, %v3825_v14 }
0x15b7   :  { %5766 = vmatpush3.bf16.xpose.msk.msra.mxu0 %vm6212_vm1, %v5761_v52  ;;  %vm7612_vm1 = vmmov %vm7609_vm2 }
0x15b8   :  { %vm7613_vm10 = vmmov %vm7612_vm1 }
0x15b9   :  { %vm7614_vm8 = vmmov %vm7612_vm1 }
0x15ba   :  { %vm7615_vm0 = vmmov %vm7612_vm1 }
0x15d4   :  { %v3817_v56 = vpop.xlane.xlu1 %3816 }
0x15d5   :  { %6098 = vrcp.f32 %v3817_v56 }
0x15d6   :  { %6100 = vrcp.f32 %v3820_v62 }
0x15d8   :  { %v5955_v49 = vpop.permute.xlu1 %5954 }
0x15d9   :  { %v5957_v59 = vunpack.i.h.bf16 %v5955_v49  ;;  %v5956_v32 = vunpack.i.l.bf16 %v5955_v49 }
0x15db   :  { %v5739_v9 = vpack.c.bf16 %v5957_v59, %v5956_v32 }
0x15dd   :  { %5740 = vmatprep.subr.bf16.mxu1 %v5739_v9 }
0x15de   :  { %5742 = vmatpush3.bf16.msra.mxu1 %v5739_v9 }
0x15df   :  { %v6099_v7 = vpop.eup %6098  ;;  %5745 = vmatprep.subr.msk.bf16.mxu1 %vm6284_vm3, %v5743_v8 }
0x15e0   :  { %v6101_v12 = vpop.eup %6100  ;;  %v3827_v61 = vmul.f32 %v6099_v7, %v6085_v0 }
0x15e1   :  { %5408 = vmatmul.mubr.msk.f32.vlgmr.msra.gmra.mrb[44].mxu1 %vm311_vm6, %v3826_v60  ;;  %v3828_v15 = vmul.f32 %v6101_v12, %v7321_v50 }
0x15e2   :  { %5410 = vmatprep.mubr.msk.f32.mxu1 %vm311_vm6, %v3827_v61 }
0x15e5   :  { %5411 = vmatmul.mubr.msk.f32.gmra.mrb[46].mxu1 %vm311_vm6, %v3828_v15 }
0x15e7   :  { %5748 = vmatpush3.bf16.xpose.msk.msra.mxu1 %vm6284_vm3, %v5743_v8 }
0x15e8   :  { %5751 = vmatprep.subr.msk.bf16.mxu1 %vm6284_vm3, %v5749_v5 }
0x1682   :  { %v5381_v58 = vpop.f32.mrb[40].mxu1 }
0x1683   :  { %v3645_v50 = vpop.f32.mrb[41].mxu1 }
0x1686   :  { %v5384_v54 = vpop.f32.mrb[42].mxu1 }
0x1687   :  { %v3655_v1 = vpop.f32.mrb[43].mxu1 }
0x16b4   :  { %v5409_v23 = vpop.f32.mrb[44].mxu1 }
0x16b5   :  { %v3919_v0 = vpop.f32.mrb[45].mxu1 }
0x16b6   :  { %5417 = vmatprep.mubr.msk.f32.mxu1 %vm7608_vm9, %v3919_v0 }
0x16b7   :  { %5418 = vmatmul.mubr.msk.f32.vlgmr.msra.gmra.mrb[48].mxu1 %vm7609_vm2, %v5409_v23 }
0x16b8   :  { %v5412_v24 = vpop.f32.mrb[46].mxu1  ;;  %5754 = vmatpush3.bf16.xpose.msk.msra.mxu1 %vm6284_vm3, %v5749_v5  ;;  %vm7616_vm3 = vcmask 130048  }
0x16b9   :  { %v3929_v35 = vpop.f32.mrb[47].mxu1  ;;  %vm7617_vm4 = vmmov %vm7616_vm3 }
0x16ba   :  { %5420 = vmatprep.mubr.msk.f32.mxu1 %vm7610_vm11, %v3929_v35  ;;  %vm7618_vm5 = vmmov %vm7616_vm3 }
0x16bb   :  { %5421 = vmatmul.mubr.msk.f32.gmra.mrb[50].mxu1 %vm7611_vm13, %v5412_v24  ;;  %vm7619_vm14 = vmmov %vm7616_vm3 }
0x16bc   :  { %5427 = vmatprep.mubr.msk.f32.mxu1 %vm7612_vm1, %v3645_v50  ;;  %vm7620_vm2 = vmmov %vm7616_vm3 }
0x16bd   :  { %vm7621_vm11 = vmmov %vm7620_vm2 }
0x16be   :  { %vm7623_vm13 = vmmov %vm7620_vm2 }
0x16bf   :  { %5428 = vmatmul.mubr.msk.f32.vlgmr.msra.gmra.mrb[48].mxu1 %vm7613_vm10, %v5381_v58 }
0x16c0   :  { %5430 = vmatprep.mubr.msk.f32.mxu1 %vm7614_vm8, %v3655_v1 }
0x16c3   :  { %5431 = vmatmul.mubr.msk.f32.gmra.mrb[50].mxu1 %vm7615_vm0, %v5384_v54 }
0x1792   :  { %v5429_v4 = vpop.f32.mrb[48].mxu1 }
0x1793   :  { %v4145_v3 = vadd.f32 %v5429_v4, %v7135_v18  ;;  %v4125_v27 = vpop.f32.mrb[49].mxu1 }
0x1794   :  { %v4144_v26 = vadd.f32 %v4125_v27, %v7132_v51 }
0x1795   :  { %v7399_v42 = vadd.f32 %v7127_v34, %v4145_v3 }
0x1796   :  { %v7396_v40 = vadd.f32 %v7127_v34, %v4144_v26  ;;  %v5432_v38 = vpop.f32.mrb[50].mxu1 }
0x1797   :  { %v4147_v13 = vadd.f32 %v5432_v38, %v7147_v17  ;;  %v4135_v2 = vpop.f32.mrb[51].mxu1  ;;  %v4780_v17 = vld [vmem:[%s7500_s7 + $0x18] sm:$0xff] }
0x1798   :  { %v4146_v62 = vadd.f32 %v4135_v2, %v7144_v19  ;;  %5441 = vmatprep.mubr.msk.f32.mxu0 %vm7616_vm3, %v7396_v40  ;;  %v4779_v19 = vld [vmem:[%s7500_s7 + $0x10] sm:$0xff] }
0x1799   :  { %5442 = vmatmul.mubr.msk.f32.vlgmr.msra.gmra.mrb[52].mxu0 %vm7617_vm4, %v7399_v42  ;;  %v7411_v18 = vadd.f32 %v7127_v34, %v4147_v13  ;;  %v5767_v45 = vpack.c.bf16 %v4780_v17, %v4779_v19 }
0x179a   :  { %v7408_v51 = vadd.f32 %v7127_v34, %v4146_v62  ;;  %v4770_v34 = vld [vmem:[%s7499_s6 + $0x1] ss:$0 sm:$0xff] }
0x179b   :  { %5769 = vmatprep.subr.msk.bf16.mxu1 %vm6844_vm15, %v5767_v45 }
0x179c   :  { %5444 = vmatprep.mubr.msk.f32.mxu0 %vm7618_vm5, %v7408_v51  ;;  %5772 = vmatpush3.bf16.xpose.msk.msra.mxu1 %vm6844_vm15, %v5767_v45 }
0x179d   :  { %5445 = vmatmul.mubr.msk.f32.gmra.mrb[54].mxu0 %vm7619_vm14, %v7411_v18 }
0x186c   :  { %v5443_v20 = vpop.f32.mrb[52].mxu0 }
0x186d   :  { %v7430_v25 = vadd.f32 %v5443_v20, %v4770_v34  ;;  %v4255_v43 = vpop.f32.mrb[53].mxu0 }
0x186e   :  { %v7432_v29 = vadd.f32 %v4770_v34, %v4255_v43 }
0x186f   :  { %v7435_v28 = vmul.f32 0.70710677, %v7430_v25 }
0x1870   :  { %v7438_v31 = vmul.f32 0.70710677, %v7432_v29  ;;  %v5446_v41 = vpop.f32.mrb[54].mxu0 }
0x1871   :  { %v4291_v36 = vand.u32 2147483647, %v7435_v28  ;;  %v7441_v39 = vadd.f32 %v5446_v41, %v4770_v34  ;;  %v4265_v33 = vpop.f32.mrb[55].mxu0  ;;  %vm4283_vm15 = vcmp.lt.f32.partialorder %v7435_v28, 0.0 }
0x1872   :  { %v4290_v44 = vand.u32 2147483647, %v7438_v31  ;;  %v7444_v46 = vadd.f32 %v4770_v34, %v4265_v33  ;;  %vm4282_vm12 = vcmp.lt.f32.partialorder %v7438_v31, 0.0 }
0x1873   :  { %v4295_v47 = vmul.f32 0.3275911, %v4291_v36  ;;  %v7447_v11 = vmul.f32 0.70710677, %v7441_v39  ;;  %v4347_v60 = vsub.f32 0.0, %v4291_v36 }
0x1874   :  { %v4294_v22 = vmul.f32 0.3275911, %v4290_v44  ;;  %v7450_v56 = vmul.f32 0.70710677, %v7444_v46  ;;  %v4346_v61 = vsub.f32 0.0, %v4290_v44 }
0x1875   :  { %v4299_v14 = vadd.f32 1.0, %v4295_v47  ;;  %v4293_v59 = vand.u32 2147483647, %v7447_v11  ;;  %v4351_v57 = vmul.f32 %v4347_v60, %v4291_v36  ;;  %vm4285_vm7 = vcmp.lt.f32.partialorder %v7447_v11, 0.0 }
0x1876   :  { %v4298_v49 = vadd.f32 1.0, %v4294_v22  ;;  %v4292_v9 = vand.u32 2147483647, %v7450_v56  ;;  %v4350_v30 = vmul.f32 %v4346_v61, %v4290_v44  ;;  %vm4284_vm9 = vcmp.lt.f32.partialorder %v7450_v56, 0.0 }
0x1877   :  { %6102 = vrcp.f32 %v4299_v14  ;;  %v4297_v32 = vmul.f32 0.3275911, %v4293_v59  ;;  %v4349_v53 = vsub.f32 0.0, %v4293_v59  ;;  %v4356_v6 = vmul.f32 1.442695, %v4351_v57 }
0x1878   :  { %6104 = vrcp.f32 %v4298_v49  ;;  %v4296_v7 = vmul.f32 0.3275911, %v4292_v9  ;;  %v4348_v16 = vsub.f32 0.0, %v4292_v9  ;;  %v4354_v58 = vmul.f32 1.442695, %v4350_v30 }
0x1879   :  { %v4301_v10 = vadd.f32 1.0, %v4297_v32  ;;  %v4353_v50 = vmul.f32 %v4349_v53, %v4293_v59  ;;  %v4288_v11 = vsel %vm4284_vm9, -1.0, %v6147_v21 }
0x187a   :  { %v4300_v12 = vadd.f32 1.0, %v4296_v7  ;;  %v4352_v4 = vmul.f32 %v4348_v16, %v4292_v9 }
0x187b   :  { %6106 = vrcp.f32 %v4301_v10  ;;  %v4360_v27 = vmul.f32 1.442695, %v4353_v50 }
0x187c   :  { %6108 = vrcp.f32 %v4300_v12  ;;  %v4358_v45 = vmul.f32 1.442695, %v4352_v4 }
0x187d   :  { %6110 = vpow2.f32 %v4356_v6 }
0x187e   :  { %6112 = vpow2.f32 %v4354_v58 }
0x187f   :  { %6114 = vpow2.f32 %v4360_v27  ;;  %v4277_v27 = vmul.f32 0.5, %v7441_v39 }
0x1880   :  { %6116 = vpow2.f32 %v4358_v45 }
0x1881   :  { %v6103_v15 = vpop.eup %6102 }
0x1882   :  { %v6105_v63 = vpop.eup %6104  ;;  %v4311_v8 = vmul.f32 1.0614054, %v6103_v15 }
0x1883   :  { %v4310_v5 = vmul.f32 1.0614054, %v6105_v63 }
0x1884   :  { %v4315_v48 = vadd.f32 -1.4531521, %v4311_v8  ;;  %v4287_v8 = vsel %vm4283_vm15, -1.0, %v6147_v21 }
0x1885   :  { %v4314_v55 = vadd.f32 -1.4531521, %v4310_v5  ;;  %v6107_v37 = vpop.eup %6106 }
0x1886   :  { %v4319_v52 = vmul.f32 %v6103_v15, %v4315_v48  ;;  %v4313_v1 = vmul.f32 1.0614054, %v6107_v37  ;;  %v6109_v0 = vpop.eup %6108 }
0x1887   :  { %v4318_v54 = vmul.f32 %v6105_v63, %v4314_v55  ;;  %v4312_v26 = vmul.f32 1.0614054, %v6109_v0  ;;  %v6111_v49 = vpop.eup %6110 }
0x1888   :  { %v4323_v23 = vadd.f32 1.4214138, %v4319_v52  ;;  %v4317_v35 = vadd.f32 -1.4531521, %v4313_v1  ;;  %v6113_v9 = vpop.eup %6112  ;;  %v4274_v52 = vmul.f32 0.5, %v7432_v29 }
0x1889   :  { %v4322_v24 = vadd.f32 1.4214138, %v4318_v54  ;;  %v4316_v62 = vadd.f32 -1.4531521, %v4312_v26  ;;  %v4275_v54 = vmul.f32 0.5, %v7430_v25 }
0x188a   :  { %v4327_v3 = vmul.f32 %v6103_v15, %v4323_v23  ;;  %v4321_v13 = vmul.f32 %v6107_v37, %v4317_v35 }
0x188b   :  { %v4326_v38 = vmul.f32 %v6105_v63, %v4322_v24  ;;  %v4320_v20 = vmul.f32 %v6109_v0, %v4316_v62 }
0x188c   :  { %v4331_v2 = vadd.f32 -0.28449672, %v4327_v3  ;;  %v4325_v17 = vadd.f32 1.4214138, %v4321_v13  ;;  %v4276_v3 = vmul.f32 0.5, %v7444_v46 }
0x188d   :  { %v4330_v19 = vadd.f32 -0.28449672, %v4326_v38  ;;  %v4324_v33 = vadd.f32 1.4214138, %v4320_v20 }
0x188e   :  { %v4335_v34 = vmul.f32 %v6103_v15, %v4331_v2  ;;  %v4329_v41 = vmul.f32 %v6107_v37, %v4325_v17 }
0x188f   :  { %v4334_v43 = vmul.f32 %v6105_v63, %v4330_v19  ;;  %v4328_v14 = vmul.f32 %v6109_v0, %v4324_v33 }
0x1890   :  { %v4339_v36 = vadd.f32 0.2548296, %v4335_v34  ;;  %v4333_v47 = vadd.f32 -0.28449672, %v4329_v41 }
0x1891   :  { %v4338_v44 = vadd.f32 0.2548296, %v4334_v43  ;;  %v4332_v7 = vadd.f32 -0.28449672, %v4328_v14 }
0x1892   :  { %v4343_v22 = vmul.f32 %v6103_v15, %v4339_v36  ;;  %v4337_v32 = vmul.f32 %v6107_v37, %v4333_v47  ;;  %v6115_v15 = vpop.eup %6114 }
0x1893   :  { %v4342_v59 = vmul.f32 %v6105_v63, %v4338_v44  ;;  %v4336_v57 = vmul.f32 %v6109_v0, %v4332_v7  ;;  %v4286_v63 = vsel %vm4282_vm12, -1.0, %v6147_v21  ;;  %v6117_v31 = vpop.eup %6116 }
0x1894   :  { %v4363_v10 = vmul.f32 %v6111_v49, %v4343_v22  ;;  %v4341_v12 = vadd.f32 0.2548296, %v4337_v32 }
0x1895   :  { %v4362_v60 = vmul.f32 %v6113_v9, %v4342_v59  ;;  %v4340_v48 = vadd.f32 0.2548296, %v4336_v57 }
0x1896   :  { %v4367_v61 = vsub.f32 1.0, %v4363_v10  ;;  %v4345_v53 = vmul.f32 %v6107_v37, %v4341_v12  ;;  %v4289_v37 = vsel %vm4285_vm7, -1.0, %v6147_v21  ;;  %v4788_v21 = vld [vmem:[%s7501_s8 + $0x1] ss:$0 sm:$0xff]  ;;  %s6118_s8 = scalar_lea.vmem %s4514_s1, 512 }
0x1897   :  { %v4366_v30 = vsub.f32 1.0, %v4362_v60  ;;  %v4344_v16 = vmul.f32 %v6109_v0, %v4340_v48  ;;  %p6119_p0 = scmp.ne.s32.totalorder %s4514_s1, %s6118_s8  ;;  %p6124_p2 = scmp.lt.s32.totalorder %s6118_s8, %s6118_s8 }
0x1898   :  { %v4371_v5 = vmul.f32 %v4367_v61, %v4287_v8  ;;  %v4365_v28 = vmul.f32 %v6115_v15, %v4345_v53 }
0x1899   :  { %v4370_v6 = vmul.f32 %v4366_v30, %v4286_v63  ;;  %v4364_v1 = vmul.f32 %v6117_v31, %v4344_v16  ;;  %p6125_p3 = por %p6124_p2, %p6123_p1 }
0x189a   :  { %v4375_v55 = vadd.f32 1.0, %v4371_v5  ;;  %v4369_v50 = vsub.f32 1.0, %v4365_v28 }
0x189b   :  { %v4374_v58 = vadd.f32 1.0, %v4370_v6  ;;  %v4368_v4 = vsub.f32 1.0, %v4364_v1  ;;  %p6126_p4 = pnand %p6125_p3, %p6119_p0 }
0x189c   :  { %v4373_v24 = vmul.f32 %v4369_v50, %v4289_v37  ;;  %v4379_v35 = vmul.f32 %v4375_v55, %v4275_v54 }
0x189d   :  { %v4378_v23 = vmul.f32 %v4374_v58, %v4274_v52  ;;  %v4372_v0 = vmul.f32 %v4368_v4, %v4288_v11 }
0x189e   :  { %v4377_v29 = vadd.f32 1.0, %v4373_v24 }
0x189f   :  { %5451 = vmatprep.mubr.msk.f32.mxu1 %vm311_vm6, %v4378_v23  ;;  %v4376_v25 = vadd.f32 1.0, %v4372_v0 }
0x18a0   :  { %5452 = vmatmul.mubr.msk.f32.vlgmr.msra.gmra.mrb[52].mxu1 %vm311_vm6, %v4379_v35  ;;  %v4381_v56 = vmul.f32 %v4377_v29, %v4277_v27 }
0x18a1   :  { %v4380_v26 = vmul.f32 %v4376_v25, %v4276_v3 }
0x18a3   :  { %5454 = vmatprep.mubr.msk.f32.mxu1 %vm311_vm6, %v4380_v26 }
0x18a4   :  { %5455 = vmatmul.mubr.msk.f32.gmra.mrb[54].mxu1 %vm311_vm6, %v4381_v56  ;;  %vm7622_vm6 = vmmov %vm7620_vm2 }
0x1973   :  { %v5453_v38 = vpop.f32.mrb[52].mxu1 }
0x1974   :  { %v4489_v13 = vadd.f32 %v5453_v38, %v7399_v42  ;;  %v4469_v2 = vpop.f32.mrb[53].mxu1 }
0x1975   :  { %v4488_v62 = vadd.f32 %v4469_v2, %v7396_v40 }
0x1976   :  { %v4501_v46 = vadd.f32 %v4788_v21, %v4489_v13 }
0x1977   :  { %v4500_v19 = vadd.f32 %v4788_v21, %v4488_v62  ;;  %v5456_v39 = vpop.f32.mrb[54].mxu1 }
0x1978   :  { %4505 = vst.msk [vmem:[#allocation2 + $0x8] sm:$0xff] %vm7620_vm2, %v4501_v46  ;;  %v4491_v17 = vadd.f32 %v5456_v39, %v7411_v18  ;;  %v4479_v45 = vpop.f32.mrb[55].mxu1 }
0x1979   :  { %4504 = vst.msk [vmem:[#allocation2] sm:$0xff] %vm7621_vm11, %v4500_v19  ;;  %v4490_v34 = vadd.f32 %v4479_v45, %v7408_v51 }
0x197a   :  { %v4503_v20 = vadd.f32 %v4788_v21, %v4491_v17 }
0x197b   :  { %v4502_v43 = vadd.f32 %v4788_v21, %v4490_v34 }
0x197c   :  { %4507 = vst.msk [vmem:[#allocation2 + $0x18] sm:$0xff] %vm7622_vm6, %v4503_v20 }
0x197d   :  { %4506 = vst.msk [vmem:[#allocation2 + $0x10] sm:$0xff] %vm7623_vm13, %v4502_v43 }
0x197e   :  { %6129 = shalt.err (!%p6126_p4)
}
0x197f   :  { %s6130_s25 = scalar_lea.hbm %s7502_s9, 512 }
0x1980   :  { %p6131_p5 = scmp.ne.s32.totalorder %s7502_s9, %s6130_s25  ;;  %p6134_p6 = scmp.lt.u32.totalorder %s6130_s25, %s7502_s9 }
0x1982   :  { %p6136_p7 = pnand %p6134_p6, %p6131_p5 }
0x1984   :  { %6139 = shalt.err (!%p6136_p7)
}
0x1985   :  { %s6149_s18 = smov 128   ;;  %s6150_s19 = smov 8  }
0x1986   :  { %4519 = dma.vmem_to_hbm [thread:$0]  %s4514_s1, 512, %s7502_s9, [#allocation3], %s6149_s18, %s6149_s18, %s6150_s19  }
0x1987   :  { %6140 = dma.done.wait [#allocation3], 512  }
0x1988   :  { %6141 = vsyncadd [#allocation3], 4294966784 }
0x1989   :  { %4523 = vsyncpa [#allocation3], 1 }

</bundles_post_ra>
